<compile_context>
chip_gen: v5e
topology: v5e:2x2
jax: 0.10.0
libtpu: 0.0.40
codegen_flags: <defaults>
</compile_context>

<pallas_src>
import jax
import jax.numpy as jnp
from jax import lax
from jax.experimental import pallas as pl
from jax.experimental.pallas import tpu as pltpu

VMEM_SPEC = pl.BlockSpec(memory_space=pltpu.MemorySpace.VMEM)

KSIZE = 9          # Conv1d kernel_size (model spec)
BATCH_PAD = 8      # pad batch to one sublane tile


# ------------------------------ fused kernel ------------------------------- #

def fused_gru_model_kernel(
    patches_ref,                     # (T*8, KC_pad)  bf16 im2col (time-major, batch padded)
    convw_ref, convb_ref,            # (KC_pad, C_out) bf16, (1, C_out) f32
    wih_ref, gib_ref,                # (C_out, 3H) bf16 (BN folded), (1, 3H) f32 (b_ih + b_hh_{r,z} + BN shift folded)
    whh_ref, bhhn_ref,               # (H, 3H) f32, (1, H) f32
    fc1w_ref, fc1b_ref,              # (H, 64) bf16, (1, 64) f32
    fc2w_ref, fc2b_ref,              # (64, out) bf16, (1, out) f32
    o_ref,                           # (8, out) f32
    gi_s,                            # scratch (T*8, 3H) f32
):
    Bp = o_ref.shape[0]              # 8 (sublane-padded batch)
    T = patches_ref.shape[0] // Bp
    H = whh_ref.shape[0]

    # ---- Conv1d('same') as one deep im2col matmul + ReLU (BN folded downstream) ----
    y = jnp.dot(patches_ref[...], convw_ref[...],
                preferred_element_type=jnp.float32) + convb_ref[...]
    y_bf = jnp.maximum(y, 0.0).astype(jnp.bfloat16)              # (T*8, C_out)

    # ---- GRU input projection for all gates / timesteps, hoisted out of the loop ----
    gi_s[...] = jnp.dot(y_bf, wih_ref[...],
                        preferred_element_type=jnp.float32) + gib_ref[...]

    whh = whh_ref[...]               # (H, 3H) f32
    bhh_n = bhhn_ref[...]            # (1, H)  f32

    # ---- Recurrence: fully unrolled, one f32 MXU matmul per step ----
    h = jnp.zeros((Bp, H), jnp.float32)
    for t in range(T):                                        # static full unroll
        gi = gi_s[t * Bp:(t + 1) * Bp, :]                     # (8, 3H), tile-aligned
        gh = jnp.dot(h, whh, preferred_element_type=jnp.float32)   # (8, 3H)
        rz = jax.nn.sigmoid(gi[:, :2 * H] + gh[:, :2 * H])    # r,z in one EUP pass
        r = rz[:, :H]
        z = rz[:, H:]
        n = jnp.tanh(gi[:, 2 * H:] + r * (gh[:, 2 * H:] + bhh_n))
        h = n + z * (h - n)                                    # == (1-z)*n + z*h

    # ---- Linear(32->64) -> Dropout(eval: identity) -> Linear(64->out) ----
    h1 = jnp.dot(h.astype(jnp.bfloat16), fc1w_ref[...],
                 preferred_element_type=jnp.float32) + fc1b_ref[...]
    o_ref[...] = jnp.dot(h1.astype(jnp.bfloat16), fc2w_ref[...],
                         preferred_element_type=jnp.float32) + fc2b_ref[...]


# ------------------------------- JAX wrapper -------------------------------- #

def gru_model_forward(x_ncw, prep):
    """x_ncw: (B, mel_dim, T) — same layout as the PyTorch module input.
    `prep` is the output of prepare_params (arrays only; jit-friendly)."""
    B, C_in, T = x_ncw.shape
    K = KSIZE
    kc = K * C_in
    kc_pad = prep["conv_w"].shape[0]
    H = prep["whh_all"].shape[0]
    out_dim = prep["fc2_w"].shape[1]
    Bp = BATCH_PAD
    pad = (K - 1) // 2

    # im2col (tiny at these shapes): time-major, batch padded to the sublane
    # tile, contraction padded to a whole number of MXU K-passes.
    x_btc = jnp.transpose(x_ncw, (0, 2, 1)).astype(jnp.float32)      # (B, T, C)
    x_btc = jnp.pad(x_btc, ((0, Bp - B), (0, 0), (0, 0)))            # (8, T, C)
    x_tp = jnp.pad(x_btc, ((0, 0), (pad, pad), (0, 0)))              # 'same' padding
    taps = jnp.concatenate([x_tp[:, k:k + T, :] for k in range(K)], axis=-1)
    patches = jnp.transpose(taps, (1, 0, 2)).reshape(T * Bp, kc)     # (T*8, 720)
    patches = jnp.pad(patches, ((0, 0), (0, kc_pad - kc)))           # -> 768 lanes
    patches = patches.astype(jnp.bfloat16)

    args = (patches,
            prep["conv_w"], prep["conv_b"],
            prep["wih_all"], prep["gi_bias"],
            prep["whh_all"], prep["bhh_n"],
            prep["fc1_w"], prep["fc1_b"],
            prep["fc2_w"], prep["fc2_b"])

    # Single-TC design kept on purpose: at B=2 the 32-step recurrence is the
    # critical path; a batch grid axis only pays off for B>=8 on v7x.
    out = pl.pallas_call(
        fused_gru_model_kernel,
        out_shape=jax.ShapeDtypeStruct((Bp, out_dim), jnp.float32),
        in_specs=[VMEM_SPEC] * len(args),
        out_specs=VMEM_SPEC,
        scratch_shapes=[pltpu.VMEM((T * Bp, 3 * H), jnp.float32)],   # hoisted gi
    )(*args)
    return out[:B]


# ------------------------------ param prep ---------------------------------- #

def prepare_params(params):
    """One-time offline prep: fold eval-mode BN into W_ih / the gi bias, fold
    b_hh_{r,z} into the hoisted bias, concatenate gates, pad the conv
    contraction to 768, and pre-cast matmul weights to bf16."""
    bf16 = jnp.bfloat16
    scale = params["bn_scale"]          # (1, C_out)
    shift = params["bn_shift"]          # (1, C_out)

    # y_bn @ W = relu(conv) @ (scale.T * W) + shift @ W
    def fold_w(w):                      # (C_out, H)
        return scale.T * w

    wih_all = jnp.concatenate(
        [fold_w(params["wih_r"]), fold_w(params["wih_z"]), fold_w(params["wih_n"])],
        axis=1)                                                      # (C_out, 3H)
    gi_bias = jnp.concatenate(
        [shift @ params["wih_r"] + params["bih_r"] + params["bhh_r"],
         shift @ params["wih_z"] + params["bih_z"] + params["bhh_z"],
         shift @ params["wih_n"] + params["bih_n"]], axis=1)         # (1, 3H)
    whh_all = jnp.concatenate(
        [params["whh_r"], params["whh_z"], params["whh_n"]], axis=1)  # (H, 3H)

    kc, _ = params["conv_w"].shape
    kc_pad = ((kc + 127) // 128) * 128                               # 720 -> 768
    conv_w = jnp.pad(params["conv_w"], ((0, kc_pad - kc), (0, 0)))

    return {
        "conv_w": conv_w.astype(bf16), "conv_b": params["conv_b"],
        "wih_all": wih_all.astype(bf16), "gi_bias": gi_bias,
        "whh_all": whh_all,              # f32 on purpose (accuracy, no per-step cast)
        "bhh_n": params["bhh_n"],
        "fc1_w": params["fc1_w"].astype(bf16), "fc1_b": params["fc1_b"],
        "fc2_w": params["fc2_w"].astype(bf16), "fc2_b": params["fc2_b"],
    }


# ------------------------- params & pure-JAX reference ---------------------- #

def init_params(key, mel_dim=80, conv_out=16, ksize=KSIZE, hidden=32,
                fc_hidden=64, output_size=50):
    ks = jax.random.split(key, 18)

    def u(k, shape, bound):
        return jax.random.uniform(k, shape, jnp.float32, -bound, bound)

    conv_bound = 1.0 / (mel_dim * ksize) ** 0.5
    gru_bound = 1.0 / hidden ** 0.5
    fc1_bound = 1.0 / hidden ** 0.5
    fc2_bound = 1.0 / fc_hidden ** 0.5
    eps = 1e-5
    return {
        # Conv1d(80 -> 16, k=9) weight as im2col matrix, rows ordered (k, c_in)
        "conv_w": u(ks[0], (ksize * mel_dim, conv_out), conv_bound),
        "conv_b": u(ks[1], (1, conv_out), conv_bound),
        # BatchNorm1d(16) eval-mode (gamma=1, beta=0, running_mean=0, running_var=1)
        "bn_scale": jnp.full((1, conv_out), 1.0 / jnp.sqrt(1.0 + eps), jnp.float32),
        "bn_shift": jnp.zeros((1, conv_out), jnp.float32),
        # GRU(16 -> 32): per-gate transposed weights, PyTorch gate order [r, z, n]
        "wih_r": u(ks[2], (conv_out, hidden), gru_bound),
        "wih_z": u(ks[3], (conv_out, hidden), gru_bound),
        "wih_n": u(ks[4], (conv_out, hidden), gru_bound),
        "bih_r": u(ks[5], (1, hidden), gru_bound),
        "bih_z": u(ks[6], (1, hidden), gru_bound),
        "bih_n": u(ks[7], (1, hidden), gru_bound),
        "whh_r": u(ks[8], (hidden, hidden), gru_bound),
        "whh_z": u(ks[9], (hidden, hidden), gru_bound),
        "whh_n": u(ks[10], (hidden, hidden), gru_bound),
        "bhh_r": u(ks[11], (1, hidden), gru_bound),
        "bhh_z": u(ks[12], (1, hidden), gru_bound),
        "bhh_n": u(ks[13], (1, hidden), gru_bound),
        # Linear(32 -> 64), Linear(64 -> 50): stored transposed (in, out)
        "fc1_w": u(ks[14], (hidden, fc_hidden), fc1_bound),
        "fc1_b": u(ks[15], (1, fc_hidden), fc1_bound),
        "fc2_w": u(ks[16], (fc_hidden, output_size), fc2_bound),
        "fc2_b": u(ks[17], (1, output_size), fc2_bound),
    }


def reference_forward(x_ncw, params):
    """Pure-JAX f32 reference with PyTorch GRUModel semantics (un-fused params)."""
    B, C_in, T = x_ncw.shape
    K = params["conv_w"].shape[0] // C_in
    pad = (K - 1) // 2
    x = jnp.transpose(x_ncw, (0, 2, 1)).astype(jnp.float32)
    xp = jnp.pad(x, ((0, 0), (pad, pad), (0, 0)))
    taps = jnp.concatenate([xp[:, k:k + T, :] for k in range(K)], axis=-1)
    y = taps @ params["conv_w"] + params["conv_b"]
    y = jnp.maximum(y, 0.0)
    y = y * params["bn_scale"] + params["bn_shift"]

    H = params["whh_r"].shape[0]

    def step(h, y_t):
        r = jax.nn.sigmoid(y_t @ params["wih_r"] + params["bih_r"]
                           + h @ params["whh_r"] + params["bhh_r"])
        z = jax.nn.sigmoid(y_t @ params["wih_z"] + params["bih_z"]
                           + h @ params["whh_z"] + params["bhh_z"])
        n = jnp.tanh(y_t @ params["wih_n"] + params["bih_n"]
                     + r * (h @ params["whh_n"] + params["bhh_n"]))
        return (1.0 - z) * n + z * h, None

    h0 = jnp.zeros((B, H), jnp.float32)
    hn, _ = lax.scan(step, h0, jnp.transpose(y, (1, 0, 2)))
    h1 = hn @ params["fc1_w"] + params["fc1_b"]
    return h1 @ params["fc2_w"] + params["fc2_b"]


# ----------------------------------- main ----------------------------------- #

if __name__ == "__main__":
    key = jax.random.PRNGKey(0)
    pkey, xkey = jax.random.split(key)
    params = init_params(pkey)
    prep = jax.tree_util.tree_map(jax.block_until_ready, prepare_params(params))

    B, MEL, T = 2, 80, 32                       # small shapes for the demo
    x = jax.random.normal(xkey, (B, MEL, T), jnp.float32)

    fwd = jax.jit(gru_model_forward)
    out = jax.block_until_ready(fwd(x, prep))
    assert out.shape == (B, 50), out.shape

    ref = reference_forward(x, params)
    max_err = float(jnp.max(jnp.abs(out - ref)))
    # bf16 conv/projection inputs with f32 accumulation (recurrence is f32) vs f32 ref.
    assert max_err < 5e-2, f"mismatch vs reference: max_err={max_err}"

    print("KERNEL_OK")
</pallas_src>

<mosaic_0001>
module attributes {stable_mosaic.version = 11 : i64} {
  func.func @fused_gru_model_kernel(%arg0: memref<256x768xbf16, #tpu.memory_space<vmem>>, %arg1: memref<768x16xbf16, #tpu.memory_space<vmem>>, %arg2: memref<1x16xf32, #tpu.memory_space<vmem>>, %arg3: memref<16x96xbf16, #tpu.memory_space<vmem>>, %arg4: memref<1x96xf32, #tpu.memory_space<vmem>>, %arg5: memref<32x96xf32, #tpu.memory_space<vmem>>, %arg6: memref<1x32xf32, #tpu.memory_space<vmem>>, %arg7: memref<32x64xbf16, #tpu.memory_space<vmem>>, %arg8: memref<1x64xf32, #tpu.memory_space<vmem>>, %arg9: memref<64x50xbf16, #tpu.memory_space<vmem>>, %arg10: memref<1x50xf32, #tpu.memory_space<vmem>>, %arg11: memref<8x50xf32, #tpu.memory_space<vmem>>, %arg12: memref<256x96xf32, #tpu.memory_space<vmem>>) attributes {dimension_semantics = [], scalar_prefetch = 0 : i64, scratch_operands = 1 : i64, tpu.core_type = #tpu.core_type<tc>} {
    %c0 = arith.constant 0 : index
    %c0_0 = arith.constant 0 : index
    %0 = vector.load %arg0[%c0, %c0_0] : memref<256x768xbf16, #tpu.memory_space<vmem>>, vector<256x768xbf16>
    %c0_1 = arith.constant 0 : index
    %c0_2 = arith.constant 0 : index
    %1 = vector.load %arg1[%c0_1, %c0_2] : memref<768x16xbf16, #tpu.memory_space<vmem>>, vector<768x16xbf16>
    %cst = arith.constant dense<0.000000e+00> : vector<256x16xf32>
    %2 = tpu.matmul %0, %1, %cst {dimension_numbers = #tpu.dot_dimension_numbers<[1], [0], [0], [1], [0, 0, 1, 1], [], []>} : vector<256x768xbf16>, vector<768x16xbf16>, vector<256x16xf32> -> vector<256x16xf32>
    %c0_3 = arith.constant 0 : index
    %c0_4 = arith.constant 0 : index
    %3 = vector.load %arg2[%c0_3, %c0_4] : memref<1x16xf32, #tpu.memory_space<vmem>>, vector<1x16xf32>
    %4 = vector.broadcast %3 : vector<1x16xf32> to vector<256x16xf32>
    %5 = arith.addf %2, %4 : vector<256x16xf32>
    %cst_5 = arith.constant 0.000000e+00 : f32
    %6 = vector.broadcast %cst_5 : f32 to vector<256x16xf32>
    %7 = arith.maximumf %5, %6 : vector<256x16xf32>
    %8 = arith.truncf %7 : vector<256x16xf32> to vector<256x16xbf16>
    %c0_6 = arith.constant 0 : index
    %c0_7 = arith.constant 0 : index
    %9 = vector.load %arg3[%c0_6, %c0_7] : memref<16x96xbf16, #tpu.memory_space<vmem>>, vector<16x96xbf16>
    %cst_8 = arith.constant dense<0.000000e+00> : vector<256x96xf32>
    %10 = tpu.matmul %8, %9, %cst_8 {dimension_numbers = #tpu.dot_dimension_numbers<[1], [0], [0], [1], [0, 0, 1, 1], [], []>} : vector<256x16xbf16>, vector<16x96xbf16>, vector<256x96xf32> -> vector<256x96xf32>
    %c0_9 = arith.constant 0 : index
    %c0_10 = arith.constant 0 : index
    %11 = vector.load %arg4[%c0_9, %c0_10] : memref<1x96xf32, #tpu.memory_space<vmem>>, vector<1x96xf32>
    %12 = vector.broadcast %11 : vector<1x96xf32> to vector<256x96xf32>
    %13 = arith.addf %10, %12 : vector<256x96xf32>
    %c0_11 = arith.constant 0 : index
    %c0_12 = arith.constant 0 : index
    %14 = vector.load %arg12[%c0_11, %c0_12] : memref<256x96xf32, #tpu.memory_space<vmem>>, vector<256x96xf32>
    tpu.vector_store %arg12[%c0_11, %c0_12], %13 {strides = array<i32>} : memref<256x96xf32, #tpu.memory_space<vmem>>, vector<256x96xf32>,
    %c0_13 = arith.constant 0 : index
    %c0_14 = arith.constant 0 : index
    %15 = vector.load %arg5[%c0_13, %c0_14] : memref<32x96xf32, #tpu.memory_space<vmem>>, vector<32x96xf32>
    %c0_15 = arith.constant 0 : index
    %c0_16 = arith.constant 0 : index
    %16 = vector.load %arg6[%c0_15, %c0_16] : memref<1x32xf32, #tpu.memory_space<vmem>>, vector<1x32xf32>
    %cst_17 = arith.constant 0.000000e+00 : f32
    %17 = vector.broadcast %cst_17 : f32 to vector<8x32xf32>
    %c0_18 = arith.constant 0 : index
    %c0_19 = arith.constant 0 : index
    %18 = vector.load %arg12[%c0_18, %c0_19] : memref<256x96xf32, #tpu.memory_space<vmem>>, vector<8x96xf32>
    %cst_20 = arith.constant dense<0.000000e+00> : vector<8x96xf32>
    %19 = tpu.matmul %17, %15, %cst_20 {dimension_numbers = #tpu.dot_dimension_numbers<[1], [0], [0], [1], [0, 0, 1, 1], [], []>} : vector<8x32xf32>, vector<32x96xf32>, vector<8x96xf32> -> vector<8x96xf32>
    %20 = vector.extract_strided_slice %18 {offsets = [0, 0], sizes = [8, 64], strides = [1, 1]} : vector<8x96xf32> to vector<8x64xf32>
    %21 = vector.extract_strided_slice %19 {offsets = [0, 0], sizes = [8, 64], strides = [1, 1]} : vector<8x96xf32> to vector<8x64xf32>
    %22 = arith.addf %20, %21 : vector<8x64xf32>
    %23 = arith.negf %22 : vector<8x64xf32>
    %24 = math.exp %23 : vector<8x64xf32>
    %cst_21 = arith.constant 1.000000e+00 : f32
    %25 = vector.broadcast %cst_21 : f32 to vector<8x64xf32>
    %26 = arith.addf %25, %24 : vector<8x64xf32>
    %27 = arith.divf %25, %26 : vector<8x64xf32>
    %28 = vector.extract_strided_slice %27 {offsets = [0, 0], sizes = [8, 32], strides = [1, 1]} : vector<8x64xf32> to vector<8x32xf32>
    %29 = vector.extract_strided_slice %27 {offsets = [0, 32], sizes = [8, 32], strides = [1, 1]} : vector<8x64xf32> to vector<8x32xf32>
    %30 = vector.extract_strided_slice %18 {offsets = [0, 64], sizes = [8, 32], strides = [1, 1]} : vector<8x96xf32> to vector<8x32xf32>
    %31 = vector.extract_strided_slice %19 {offsets = [0, 64], sizes = [8, 32], strides = [1, 1]} : vector<8x96xf32> to vector<8x32xf32>
    %32 = vector.broadcast %16 : vector<1x32xf32> to vector<8x32xf32>
    %33 = arith.addf %31, %32 : vector<8x32xf32>
    %34 = arith.mulf %28, %33 : vector<8x32xf32>
    %35 = arith.addf %30, %34 : vector<8x32xf32>
    %36 = math.tanh %35 : vector<8x32xf32>
    %37 = arith.subf %17, %36 : vector<8x32xf32>
    %38 = arith.mulf %29, %37 : vector<8x32xf32>
    %39 = arith.addf %36, %38 : vector<8x32xf32>
    %c8 = arith.constant 8 : index
    %c0_22 = arith.constant 0 : index
    %40 = vector.load %arg12[%c8, %c0_22] : memref<256x96xf32, #tpu.memory_space<vmem>>, vector<8x96xf32>
    %cst_23 = arith.constant dense<0.000000e+00> : vector<8x96xf32>
    %41 = tpu.matmul %39, %15, %cst_23 {dimension_numbers = #tpu.dot_dimension_numbers<[1], [0], [0], [1], [0, 0, 1, 1], [], []>} : vector<8x32xf32>, vector<32x96xf32>, vector<8x96xf32> -> vector<8x96xf32>
    %42 = vector.extract_strided_slice %40 {offsets = [0, 0], sizes = [8, 64], strides = [1, 1]} : vector<8x96xf32> to vector<8x64xf32>
    %43 = vector.extract_strided_slice %41 {offsets = [0, 0], sizes = [8, 64], strides = [1, 1]} : vector<8x96xf32> to vector<8x64xf32>
    %44 = arith.addf %42, %43 : vector<8x64xf32>
    %45 = arith.negf %44 : vector<8x64xf32>
    %46 = math.exp %45 : vector<8x64xf32>
    %cst_24 = arith.constant 1.000000e+00 : f32
    %47 = vector.broadcast %cst_24 : f32 to vector<8x64xf32>
    %48 = arith.addf %47, %46 : vector<8x64xf32>
    %49 = arith.divf %47, %48 : vector<8x64xf32>
    %50 = vector.extract_strided_slice %49 {offsets = [0, 0], sizes = [8, 32], strides = [1, 1]} : vector<8x64xf32> to vector<8x32xf32>
    %51 = vector.extract_strided_slice %49 {offsets = [0, 32], sizes = [8, 32], strides = [1, 1]} : vector<8x64xf32> to vector<8x32xf32>
    %52 = vector.extract_strided_slice %40 {offsets = [0, 64], sizes = [8, 32], strides = [1, 1]} : vector<8x96xf32> to vector<8x32xf32>
    %53 = vector.extract_strided_slice %41 {offsets = [0, 64], sizes = [8, 32], strides = [1, 1]} : vector<8x96xf32> to vector<8x32xf32>
    %54 = vector.broadcast %16 : vector<1x32xf32> to vector<8x32xf32>
    %55 = arith.addf %53, %54 : vector<8x32xf32>
    %56 = arith.mulf %50, %55 : vector<8x32xf32>
    %57 = arith.addf %52, %56 : vector<8x32xf32>
    %58 = math.tanh %57 : vector<8x32xf32>
    %59 = arith.subf %39, %58 : vector<8x32xf32>
    %60 = arith.mulf %51, %59 : vector<8x32xf32>
    %61 = arith.addf %58, %60 : vector<8x32xf32>
    %c16 = arith.constant 16 : index
    %c0_25 = arith.constant 0 : index
    %62 = vector.load %arg12[%c16, %c0_25] : memref<256x96xf32, #tpu.memory_space<vmem>>, vector<8x96xf32>
    %cst_26 = arith.constant dense<0.000000e+00> : vector<8x96xf32>
    %63 = tpu.matmul %61, %15, %cst_26 {dimension_numbers = #tpu.dot_dimension_numbers<[1], [0], [0], [1], [0, 0, 1, 1], [], []>} : vector<8x32xf32>, vector<32x96xf32>, vector<8x96xf32> -> vector<8x96xf32>
    %64 = vector.extract_strided_slice %62 {offsets = [0, 0], sizes = [8, 64], strides = [1, 1]} : vector<8x96xf32> to vector<8x64xf32>
    %65 = vector.extract_strided_slice %63 {offsets = [0, 0], sizes = [8, 64], strides = [1, 1]} : vector<8x96xf32> to vector<8x64xf32>
    %66 = arith.addf %64, %65 : vector<8x64xf32>
    %67 = arith.negf %66 : vector<8x64xf32>
    %68 = math.exp %67 : vector<8x64xf32>
    %cst_27 = arith.constant 1.000000e+00 : f32
    %69 = vector.broadcast %cst_27 : f32 to vector<8x64xf32>
    %70 = arith.addf %69, %68 : vector<8x64xf32>
    %71 = arith.divf %69, %70 : vector<8x64xf32>
    %72 = vector.extract_strided_slice %71 {offsets = [0, 0], sizes = [8, 32], strides = [1, 1]} : vector<8x64xf32> to vector<8x32xf32>
    %73 = vector.extract_strided_slice %71 {offsets = [0, 32], sizes = [8, 32], strides = [1, 1]} : vector<8x64xf32> to vector<8x32xf32>
    %74 = vector.extract_strided_slice %62 {offsets = [0, 64], sizes = [8, 32], strides = [1, 1]} : vector<8x96xf32> to vector<8x32xf32>
    %75 = vector.extract_strided_slice %63 {offsets = [0, 64], sizes = [8, 32], strides = [1, 1]} : vector<8x96xf32> to vector<8x32xf32>
    %76 = vector.broadcast %16 : vector<1x32xf32> to vector<8x32xf32>
    %77 = arith.addf %75, %76 : vector<8x32xf32>
    %78 = arith.mulf %72, %77 : vector<8x32xf32>
    %79 = arith.addf %74, %78 : vector<8x32xf32>
    %80 = math.tanh %79 : vector<8x32xf32>
    %81 = arith.subf %61, %80 : vector<8x32xf32>
    %82 = arith.mulf %73, %81 : vector<8x32xf32>
    %83 = arith.addf %80, %82 : vector<8x32xf32>
    %c24 = arith.constant 24 : index
    %c0_28 = arith.constant 0 : index
    %84 = vector.load %arg12[%c24, %c0_28] : memref<256x96xf32, #tpu.memory_space<vmem>>, vector<8x96xf32>
    %cst_29 = arith.constant dense<0.000000e+00> : vector<8x96xf32>
    %85 = tpu.matmul %83, %15, %cst_29 {dimension_numbers = #tpu.dot_dimension_numbers<[1], [0], [0], [1], [0, 0, 1, 1], [], []>} : vector<8x32xf32>, vector<32x96xf32>, vector<8x96xf32> -> vector<8x96xf32>
    %86 = vector.extract_strided_slice %84 {offsets = [0, 0], sizes = [8, 64], strides = [1, 1]} : vector<8x96xf32> to vector<8x64xf32>
    %87 = vector.extract_strided_slice %85 {offsets = [0, 0], sizes = [8, 64], strides = [1, 1]} : vector<8x96xf32> to vector<8x64xf32>
    %88 = arith.addf %86, %87 : vector<8x64xf32>
    %89 = arith.negf %88 : vector<8x64xf32>
    %90 = math.exp %89 : vector<8x64xf32>
    %cst_30 = arith.constant 1.000000e+00 : f32
    %91 = vector.broadcast %cst_30 : f32 to vector<8x64xf32>
    %92 = arith.addf %91, %90 : vector<8x64xf32>
    %93 = arith.divf %91, %92 : vector<8x64xf32>
    %94 = vector.extract_strided_slice %93 {offsets = [0, 0], sizes = [8, 32], strides = [1, 1]} : vector<8x64xf32> to vector<8x32xf32>
    %95 = vector.extract_strided_slice %93 {offsets = [0, 32], sizes = [8, 32], strides = [1, 1]} : vector<8x64xf32> to vector<8x32xf32>
    %96 = vector.extract_strided_slice %84 {offsets = [0, 64], sizes = [8, 32], strides = [1, 1]} : vector<8x96xf32> to vector<8x32xf32>
    %97 = vector.extract_strided_slice %85 {offsets = [0, 64], sizes = [8, 32], strides = [1, 1]} : vector<8x96xf32> to vector<8x32xf32>
    %98 = vector.broadcast %16 : vector<1x32xf32> to vector<8x32xf32>
    %99 = arith.addf %97, %98 : vector<8x32xf32>
    %100 = arith.mulf %94, %99 : vector<8x32xf32>
    %101 = arith.addf %96, %100 : vector<8x32xf32>
    %102 = math.tanh %101 : vector<8x32xf32>
    %103 = arith.subf %83, %102 : vector<8x32xf32>
    %104 = arith.mulf %95, %103 : vector<8x32xf32>
    %105 = arith.addf %102, %104 : vector<8x32xf32>
    %c32 = arith.constant 32 : index
    %c0_31 = arith.constant 0 : index
    %106 = vector.load %arg12[%c32, %c0_31] : memref<256x96xf32, #tpu.memory_space<vmem>>, vector<8x96xf32>
    %cst_32 = arith.constant dense<0.000000e+00> : vector<8x96xf32>
    %107 = tpu.matmul %105, %15, %cst_32 {dimension_numbers = #tpu.dot_dimension_numbers<[1], [0], [0], [1], [0, 0, 1, 1], [], []>} : vector<8x32xf32>, vector<32x96xf32>, vector<8x96xf32> -> vector<8x96xf32>
    %108 = vector.extract_strided_slice %106 {offsets = [0, 0], sizes = [8, 64], strides = [1, 1]} : vector<8x96xf32> to vector<8x64xf32>
    %109 = vector.extract_strided_slice %107 {offsets = [0, 0], sizes = [8, 64], strides = [1, 1]} : vector<8x96xf32> to vector<8x64xf32>
    %110 = arith.addf %108, %109 : vector<8x64xf32>
    %111 = arith.negf %110 : vector<8x64xf32>
    %112 = math.exp %111 : vector<8x64xf32>
    %cst_33 = arith.constant 1.000000e+00 : f32
    %113 = vector.broadcast %cst_33 : f32 to vector<8x64xf32>
    %114 = arith.addf %113, %112 : vector<8x64xf32>
    %115 = arith.divf %113, %114 : vector<8x64xf32>
    %116 = vector.extract_strided_slice %115 {offsets = [0, 0], sizes = [8, 32], strides = [1, 1]} : vector<8x64xf32> to vector<8x32xf32>
    %117 = vector.extract_strided_slice %115 {offsets = [0, 32], sizes = [8, 32], strides = [1, 1]} : vector<8x64xf32> to vector<8x32xf32>
    %118 = vector.extract_strided_slice %106 {offsets = [0, 64], sizes = [8, 32], strides = [1, 1]} : vector<8x96xf32> to vector<8x32xf32>
    %119 = vector.extract_strided_slice %107 {offsets = [0, 64], sizes = [8, 32], strides = [1, 1]} : vector<8x96xf32> to vector<8x32xf32>
    %120 = vector.broadcast %16 : vector<1x32xf32> to vector<8x32xf32>
    %121 = arith.addf %119, %120 : vector<8x32xf32>
    %122 = arith.mulf %116, %121 : vector<8x32xf32>
    %123 = arith.addf %118, %122 : vector<8x32xf32>
    %124 = math.tanh %123 : vector<8x32xf32>
    %125 = arith.subf %105, %124 : vector<8x32xf32>
    %126 = arith.mulf %117, %125 : vector<8x32xf32>
    %127 = arith.addf %124, %126 : vector<8x32xf32>
    %c40 = arith.constant 40 : index
    %c0_34 = arith.constant 0 : index
    %128 = vector.load %arg12[%c40, %c0_34] : memref<256x96xf32, #tpu.memory_space<vmem>>, vector<8x96xf32>
    %cst_35 = arith.constant dense<0.000000e+00> : vector<8x96xf32>
    %129 = tpu.matmul %127, %15, %cst_35 {dimension_numbers = #tpu.dot_dimension_numbers<[1], [0], [0], [1], [0, 0, 1, 1], [], []>} : vector<8x32xf32>, vector<32x96xf32>, vector<8x96xf32> -> vector<8x96xf32>
    %130 = vector.extract_strided_slice %128 {offsets = [0, 0], sizes = [8, 64], strides = [1, 1]} : vector<8x96xf32> to vector<8x64xf32>
    %131 = vector.extract_strided_slice %129 {offsets = [0, 0], sizes = [8, 64], strides = [1, 1]} : vector<8x96xf32> to vector<8x64xf32>
    %132 = arith.addf %130, %131 : vector<8x64xf32>
    %133 = arith.negf %132 : vector<8x64xf32>
    %134 = math.exp %133 : vector<8x64xf32>
    %cst_36 = arith.constant 1.000000e+00 : f32
    %135 = vector.broadcast %cst_36 : f32 to vector<8x64xf32>
    %136 = arith.addf %135, %134 : vector<8x64xf32>
    %137 = arith.divf %135, %136 : vector<8x64xf32>
    %138 = vector.extract_strided_slice %137 {offsets = [0, 0], sizes = [8, 32], strides = [1, 1]} : vector<8x64xf32> to vector<8x32xf32>
    %139 = vector.extract_strided_slice %137 {offsets = [0, 32], sizes = [8, 32], strides = [1, 1]} : vector<8x64xf32> to vector<8x32xf32>
    %140 = vector.extract_strided_slice %128 {offsets = [0, 64], sizes = [8, 32], strides = [1, 1]} : vector<8x96xf32> to vector<8x32xf32>
    %141 = vector.extract_strided_slice %129 {offsets = [0, 64], sizes = [8, 32], strides = [1, 1]} : vector<8x96xf32> to vector<8x32xf32>
    %142 = vector.broadcast %16 : vector<1x32xf32> to vector<8x32xf32>
    %143 = arith.addf %141, %142 : vector<8x32xf32>
    %144 = arith.mulf %138, %143 : vector<8x32xf32>
    %145 = arith.addf %140, %144 : vector<8x32xf32>
    %146 = math.tanh %145 : vector<8x32xf32>
    %147 = arith.subf %127, %146 : vector<8x32xf32>
    %148 = arith.mulf %139, %147 : vector<8x32xf32>
    %149 = arith.addf %146, %148 : vector<8x32xf32>
    %c48 = arith.constant 48 : index
    %c0_37 = arith.constant 0 : index
    %150 = vector.load %arg12[%c48, %c0_37] : memref<256x96xf32, #tpu.memory_space<vmem>>, vector<8x96xf32>
    %cst_38 = arith.constant dense<0.000000e+00> : vector<8x96xf32>
    %151 = tpu.matmul %149, %15, %cst_38 {dimension_numbers = #tpu.dot_dimension_numbers<[1], [0], [0], [1], [0, 0, 1, 1], [], []>} : vector<8x32xf32>, vector<32x96xf32>, vector<8x96xf32> -> vector<8x96xf32>
    %152 = vector.extract_strided_slice %150 {offsets = [0, 0], sizes = [8, 64], strides = [1, 1]} : vector<8x96xf32> to vector<8x64xf32>
    %153 = vector.extract_strided_slice %151 {offsets = [0, 0], sizes = [8, 64], strides = [1, 1]} : vector<8x96xf32> to vector<8x64xf32>
    %154 = arith.addf %152, %153 : vector<8x64xf32>
    %155 = arith.negf %154 : vector<8x64xf32>
    %156 = math.exp %155 : vector<8x64xf32>
    %cst_39 = arith.constant 1.000000e+00 : f32
    %157 = vector.broadcast %cst_39 : f32 to vector<8x64xf32>
    %158 = arith.addf %157, %156 : vector<8x64xf32>
    %159 = arith.divf %157, %158 : vector<8x64xf32>
    %160 = vector.extract_strided_slice %159 {offsets = [0, 0], sizes = [8, 32], strides = [1, 1]} : vector<8x64xf32> to vector<8x32xf32>
    %161 = vector.extract_strided_slice %159 {offsets = [0, 32], sizes = [8, 32], strides = [1, 1]} : vector<8x64xf32> to vector<8x32xf32>
    %162 = vector.extract_strided_slice %150 {offsets = [0, 64], sizes = [8, 32], strides = [1, 1]} : vector<8x96xf32> to vector<8x32xf32>
    %163 = vector.extract_strided_slice %151 {offsets = [0, 64], sizes = [8, 32], strides = [1, 1]} : vector<8x96xf32> to vector<8x32xf32>
    %164 = vector.broadcast %16 : vector<1x32xf32> to vector<8x32xf32>
    %165 = arith.addf %163, %164 : vector<8x32xf32>
    %166 = arith.mulf %160, %165 : vector<8x32xf32>
    %167 = arith.addf %162, %166 : vector<8x32xf32>
    %168 = math.tanh %167 : vector<8x32xf32>
    %169 = arith.subf %149, %168 : vector<8x32xf32>
    %170 = arith.mulf %161, %169 : vector<8x32xf32>
    %171 = arith.addf %168, %170 : vector<8x32xf32>
    %c56 = arith.constant 56 : index
    %c0_40 = arith.constant 0 : index
    %172 = vector.load %arg12[%c56, %c0_40] : memref<256x96xf32, #tpu.memory_space<vmem>>, vector<8x96xf32>
    %cst_41 = arith.constant dense<0.000000e+00> : vector<8x96xf32>
    %173 = tpu.matmul %171, %15, %cst_41 {dimension_numbers = #tpu.dot_dimension_numbers<[1], [0], [0], [1], [0, 0, 1, 1], [], []>} : vector<8x32xf32>, vector<32x96xf32>, vector<8x96xf32> -> vector<8x96xf32>
    %174 = vector.extract_strided_slice %172 {offsets = [0, 0], sizes = [8, 64], strides = [1, 1]} : vector<8x96xf32> to vector<8x64xf32>
    %175 = vector.extract_strided_slice %173 {offsets = [0, 0], sizes = [8, 64], strides = [1, 1]} : vector<8x96xf32> to vector<8x64xf32>
    %176 = arith.addf %174, %175 : vector<8x64xf32>
    %177 = arith.negf %176 : vector<8x64xf32>
    %178 = math.exp %177 : vector<8x64xf32>
    %cst_42 = arith.constant 1.000000e+00 : f32
    %179 = vector.broadcast %cst_42 : f32 to vector<8x64xf32>
    %180 = arith.addf %179, %178 : vector<8x64xf32>
    %181 = arith.divf %179, %180 : vector<8x64xf32>
    %182 = vector.extract_strided_slice %181 {offsets = [0, 0], sizes = [8, 32], strides = [1, 1]} : vector<8x64xf32> to vector<8x32xf32>
    %183 = vector.extract_strided_slice %181 {offsets = [0, 32], sizes = [8, 32], strides = [1, 1]} : vector<8x64xf32> to vector<8x32xf32>
    %184 = vector.extract_strided_slice %172 {offsets = [0, 64], sizes = [8, 32], strides = [1, 1]} : vector<8x96xf32> to vector<8x32xf32>
    %185 = vector.extract_strided_slice %173 {offsets = [0, 64], sizes = [8, 32], strides = [1, 1]} : vector<8x96xf32> to vector<8x32xf32>
    %186 = vector.broadcast %16 : vector<1x32xf32> to vector<8x32xf32>
    %187 = arith.addf %185, %186 : vector<8x32xf32>
    %188 = arith.mulf %182, %187 : vector<8x32xf32>
    %189 = arith.addf %184, %188 : vector<8x32xf32>
    %190 = math.tanh %189 : vector<8x32xf32>
    %191 = arith.subf %171, %190 : vector<8x32xf32>
    %192 = arith.mulf %183, %191 : vector<8x32xf32>
    %193 = arith.addf %190, %192 : vector<8x32xf32>
    %c64 = arith.constant 64 : index
    %c0_43 = arith.constant 0 : index
    %194 = vector.load %arg12[%c64, %c0_43] : memref<256x96xf32, #tpu.memory_space<vmem>>, vector<8x96xf32>
    %cst_44 = arith.constant dense<0.000000e+00> : vector<8x96xf32>
    %195 = tpu.matmul %193, %15, %cst_44 {dimension_numbers = #tpu.dot_dimension_numbers<[1], [0], [0], [1], [0, 0, 1, 1], [], []>} : vector<8x32xf32>, vector<32x96xf32>, vector<8x96xf32> -> vector<8x96xf32>
    %196 = vector.extract_strided_slice %194 {offsets = [0, 0], sizes = [8, 64], strides = [1, 1]} : vector<8x96xf32> to vector<8x64xf32>
    %197 = vector.extract_strided_slice %195 {offsets = [0, 0], sizes = [8, 64], strides = [1, 1]} : vector<8x96xf32> to vector<8x64xf32>
    %198 = arith.addf %196, %197 : vector<8x64xf32>
    %199 = arith.negf %198 : vector<8x64xf32>
    %200 = math.exp %199 : vector<8x64xf32>
    %cst_45 = arith.constant 1.000000e+00 : f32
    %201 = vector.broadcast %cst_45 : f32 to vector<8x64xf32>
    %202 = arith.addf %201, %200 : vector<8x64xf32>
    %203 = arith.divf %201, %202 : vector<8x64xf32>
    %204 = vector.extract_strided_slice %203 {offsets = [0, 0], sizes = [8, 32], strides = [1, 1]} : vector<8x64xf32> to vector<8x32xf32>
    %205 = vector.extract_strided_slice %203 {offsets = [0, 32], sizes = [8, 32], strides = [1, 1]} : vector<8x64xf32> to vector<8x32xf32>
    %206 = vector.extract_strided_slice %194 {offsets = [0, 64], sizes = [8, 32], strides = [1, 1]} : vector<8x96xf32> to vector<8x32xf32>
    %207 = vector.extract_strided_slice %195 {offsets = [0, 64], sizes = [8, 32], strides = [1, 1]} : vector<8x96xf32> to vector<8x32xf32>
    %208 = vector.broadcast %16 : vector<1x32xf32> to vector<8x32xf32>
    %209 = arith.addf %207, %208 : vector<8x32xf32>
    %210 = arith.mulf %204, %209 : vector<8x32xf32>
    %211 = arith.addf %206, %210 : vector<8x32xf32>
    %212 = math.tanh %211 : vector<8x32xf32>
    %213 = arith.subf %193, %212 : vector<8x32xf32>
    %214 = arith.mulf %205, %213 : vector<8x32xf32>
    %215 = arith.addf %212, %214 : vector<8x32xf32>
    %c72 = arith.constant 72 : index
    %c0_46 = arith.constant 0 : index
    %216 = vector.load %arg12[%c72, %c0_46] : memref<256x96xf32, #tpu.memory_space<vmem>>, vector<8x96xf32>
    %cst_47 = arith.constant dense<0.000000e+00> : vector<8x96xf32>
    %217 = tpu.matmul %215, %15, %cst_47 {dimension_numbers = #tpu.dot_dimension_numbers<[1], [0], [0], [1], [0, 0, 1, 1], [], []>} : vector<8x32xf32>, vector<32x96xf32>, vector<8x96xf32> -> vector<8x96xf32>
    %218 = vector.extract_strided_slice %216 {offsets = [0, 0], sizes = [8, 64], strides = [1, 1]} : vector<8x96xf32> to vector<8x64xf32>
    %219 = vector.extract_strided_slice %217 {offsets = [0, 0], sizes = [8, 64], strides = [1, 1]} : vector<8x96xf32> to vector<8x64xf32>
    %220 = arith.addf %218, %219 : vector<8x64xf32>
    %221 = arith.negf %220 : vector<8x64xf32>
    %222 = math.exp %221 : vector<8x64xf32>
    %cst_48 = arith.constant 1.000000e+00 : f32
    %223 = vector.broadcast %cst_48 : f32 to vector<8x64xf32>
    %224 = arith.addf %223, %222 : vector<8x64xf32>
    %225 = arith.divf %223, %224 : vector<8x64xf32>
    %226 = vector.extract_strided_slice %225 {offsets = [0, 0], sizes = [8, 32], strides = [1, 1]} : vector<8x64xf32> to vector<8x32xf32>
    %227 = vector.extract_strided_slice %225 {offsets = [0, 32], sizes = [8, 32], strides = [1, 1]} : vector<8x64xf32> to vector<8x32xf32>
    %228 = vector.extract_strided_slice %216 {offsets = [0, 64], sizes = [8, 32], strides = [1, 1]} : vector<8x96xf32> to vector<8x32xf32>
    %229 = vector.extract_strided_slice %217 {offsets = [0, 64], sizes = [8, 32], strides = [1, 1]} : vector<8x96xf32> to vector<8x32xf32>
    %230 = vector.broadcast %16 : vector<1x32xf32> to vector<8x32xf32>
    %231 = arith.addf %229, %230 : vector<8x32xf32>
    %232 = arith.mulf %226, %231 : vector<8x32xf32>
    %233 = arith.addf %228, %232 : vector<8x32xf32>
    %234 = math.tanh %233 : vector<8x32xf32>
    %235 = arith.subf %215, %234 : vector<8x32xf32>
    %236 = arith.mulf %227, %235 : vector<8x32xf32>
    %237 = arith.addf %234, %236 : vector<8x32xf32>
    %c80 = arith.constant 80 : index
    %c0_49 = arith.constant 0 : index
    %238 = vector.load %arg12[%c80, %c0_49] : memref<256x96xf32, #tpu.memory_space<vmem>>, vector<8x96xf32>
    %cst_50 = arith.constant dense<0.000000e+00> : vector<8x96xf32>
    %239 = tpu.matmul %237, %15, %cst_50 {dimension_numbers = #tpu.dot_dimension_numbers<[1], [0], [0], [1], [0, 0, 1, 1], [], []>} : vector<8x32xf32>, vector<32x96xf32>, vector<8x96xf32> -> vector<8x96xf32>
    %240 = vector.extract_strided_slice %238 {offsets = [0, 0], sizes = [8, 64], strides = [1, 1]} : vector<8x96xf32> to vector<8x64xf32>
    %241 = vector.extract_strided_slice %239 {offsets = [0, 0], sizes = [8, 64], strides = [1, 1]} : vector<8x96xf32> to vector<8x64xf32>
    %242 = arith.addf %240, %241 : vector<8x64xf32>
    %243 = arith.negf %242 : vector<8x64xf32>
    %244 = math.exp %243 : vector<8x64xf32>
    %cst_51 = arith.constant 1.000000e+00 : f32
    %245 = vector.broadcast %cst_51 : f32 to vector<8x64xf32>
    %246 = arith.addf %245, %244 : vector<8x64xf32>
    %247 = arith.divf %245, %246 : vector<8x64xf32>
    %248 = vector.extract_strided_slice %247 {offsets = [0, 0], sizes = [8, 32], strides = [1, 1]} : vector<8x64xf32> to vector<8x32xf32>
    %249 = vector.extract_strided_slice %247 {offsets = [0, 32], sizes = [8, 32], strides = [1, 1]} : vector<8x64xf32> to vector<8x32xf32>
    %250 = vector.extract_strided_slice %238 {offsets = [0, 64], sizes = [8, 32], strides = [1, 1]} : vector<8x96xf32> to vector<8x32xf32>
    %251 = vector.extract_strided_slice %239 {offsets = [0, 64], sizes = [8, 32], strides = [1, 1]} : vector<8x96xf32> to vector<8x32xf32>
    %252 = vector.broadcast %16 : vector<1x32xf32> to vector<8x32xf32>
    %253 = arith.addf %251, %252 : vector<8x32xf32>
    %254 = arith.mulf %248, %253 : vector<8x32xf32>
    %255 = arith.addf %250, %254 : vector<8x32xf32>
    %256 = math.tanh %255 : vector<8x32xf32>
    %257 = arith.subf %237, %256 : vector<8x32xf32>
    %258 = arith.mulf %249, %257 : vector<8x32xf32>
    %259 = arith.addf %256, %258 : vector<8x32xf32>
    %c88 = arith.constant 88 : index
    %c0_52 = arith.constant 0 : index
    %260 = vector.load %arg12[%c88, %c0_52] : memref<256x96xf32, #tpu.memory_space<vmem>>, vector<8x96xf32>
    %cst_53 = arith.constant dense<0.000000e+00> : vector<8x96xf32>
    %261 = tpu.matmul %259, %15, %cst_53 {dimension_numbers = #tpu.dot_dimension_numbers<[1], [0], [0], [1], [0, 0, 1, 1], [], []>} : vector<8x32xf32>, vector<32x96xf32>, vector<8x96xf32> -> vector<8x96xf32>
    %262 = vector.extract_strided_slice %260 {offsets = [0, 0], sizes = [8, 64], strides = [1, 1]} : vector<8x96xf32> to vector<8x64xf32>
    %263 = vector.extract_strided_slice %261 {offsets = [0, 0], sizes = [8, 64], strides = [1, 1]} : vector<8x96xf32> to vector<8x64xf32>
    %264 = arith.addf %262, %263 : vector<8x64xf32>
    %265 = arith.negf %264 : vector<8x64xf32>
    %266 = math.exp %265 : vector<8x64xf32>
    %cst_54 = arith.constant 1.000000e+00 : f32
    %267 = vector.broadcast %cst_54 : f32 to vector<8x64xf32>
    %268 = arith.addf %267, %266 : vector<8x64xf32>
    %269 = arith.divf %267, %268 : vector<8x64xf32>
    %270 = vector.extract_strided_slice %269 {offsets = [0, 0], sizes = [8, 32], strides = [1, 1]} : vector<8x64xf32> to vector<8x32xf32>
    %271 = vector.extract_strided_slice %269 {offsets = [0, 32], sizes = [8, 32], strides = [1, 1]} : vector<8x64xf32> to vector<8x32xf32>
    %272 = vector.extract_strided_slice %260 {offsets = [0, 64], sizes = [8, 32], strides = [1, 1]} : vector<8x96xf32> to vector<8x32xf32>
    %273 = vector.extract_strided_slice %261 {offsets = [0, 64], sizes = [8, 32], strides = [1, 1]} : vector<8x96xf32> to vector<8x32xf32>
    %274 = vector.broadcast %16 : vector<1x32xf32> to vector<8x32xf32>
    %275 = arith.addf %273, %274 : vector<8x32xf32>
    %276 = arith.mulf %270, %275 : vector<8x32xf32>
    %277 = arith.addf %272, %276 : vector<8x32xf32>
    %278 = math.tanh %277 : vector<8x32xf32>
    %279 = arith.subf %259, %278 : vector<8x32xf32>
    %280 = arith.mulf %271, %279 : vector<8x32xf32>
    %281 = arith.addf %278, %280 : vector<8x32xf32>
    %c96 = arith.constant 96 : index
    %c0_55 = arith.constant 0 : index
    %282 = vector.load %arg12[%c96, %c0_55] : memref<256x96xf32, #tpu.memory_space<vmem>>, vector<8x96xf32>
    %cst_56 = arith.constant dense<0.000000e+00> : vector<8x96xf32>
    %283 = tpu.matmul %281, %15, %cst_56 {dimension_numbers = #tpu.dot_dimension_numbers<[1], [0], [0], [1], [0, 0, 1, 1], [], []>} : vector<8x32xf32>, vector<32x96xf32>, vector<8x96xf32> -> vector<8x96xf32>
    %284 = vector.extract_strided_slice %282 {offsets = [0, 0], sizes = [8, 64], strides = [1, 1]} : vector<8x96xf32> to vector<8x64xf32>
    %285 = vector.extract_strided_slice %283 {offsets = [0, 0], sizes = [8, 64], strides = [1, 1]} : vector<8x96xf32> to vector<8x64xf32>
    %286 = arith.addf %284, %285 : vector<8x64xf32>
    %287 = arith.negf %286 : vector<8x64xf32>
    %288 = math.exp %287 : vector<8x64xf32>
    %cst_57 = arith.constant 1.000000e+00 : f32
    %289 = vector.broadcast %cst_57 : f32 to vector<8x64xf32>
    %290 = arith.addf %289, %288 : vector<8x64xf32>
    %291 = arith.divf %289, %290 : vector<8x64xf32>
    %292 = vector.extract_strided_slice %291 {offsets = [0, 0], sizes = [8, 32], strides = [1, 1]} : vector<8x64xf32> to vector<8x32xf32>
    %293 = vector.extract_strided_slice %291 {offsets = [0, 32], sizes = [8, 32], strides = [1, 1]} : vector<8x64xf32> to vector<8x32xf32>
    %294 = vector.extract_strided_slice %282 {offsets = [0, 64], sizes = [8, 32], strides = [1, 1]} : vector<8x96xf32> to vector<8x32xf32>
    %295 = vector.extract_strided_slice %283 {offsets = [0, 64], sizes = [8, 32], strides = [1, 1]} : vector<8x96xf32> to vector<8x32xf32>
    %296 = vector.broadcast %16 : vector<1x32xf32> to vector<8x32xf32>
    %297 = arith.addf %295, %296 : vector<8x32xf32>
    %298 = arith.mulf %292, %297 : vector<8x32xf32>
    %299 = arith.addf %294, %298 : vector<8x32xf32>
    %300 = math.tanh %299 : vector<8x32xf32>
    %301 = arith.subf %281, %300 : vector<8x32xf32>
    %302 = arith.mulf %293, %301 : vector<8x32xf32>
    %303 = arith.addf %300, %302 : vector<8x32xf32>
    %c104 = arith.constant 104 : index
    %c0_58 = arith.constant 0 : index
    %304 = vector.load %arg12[%c104, %c0_58] : memref<256x96xf32, #tpu.memory_space<vmem>>, vector<8x96xf32>
    %cst_59 = arith.constant dense<0.000000e+00> : vector<8x96xf32>
    %305 = tpu.matmul %303, %15, %cst_59 {dimension_numbers = #tpu.dot_dimension_numbers<[1], [0], [0], [1], [0, 0, 1, 1], [], []>} : vector<8x32xf32>, vector<32x96xf32>, vector<8x96xf32> -> vector<8x96xf32>
    %306 = vector.extract_strided_slice %304 {offsets = [0, 0], sizes = [8, 64], strides = [1, 1]} : vector<8x96xf32> to vector<8x64xf32>
    %307 = vector.extract_strided_slice %305 {offsets = [0, 0], sizes = [8, 64], strides = [1, 1]} : vector<8x96xf32> to vector<8x64xf32>
    %308 = arith.addf %306, %307 : vector<8x64xf32>
    %309 = arith.negf %308 : vector<8x64xf32>
    %310 = math.exp %309 : vector<8x64xf32>
    %cst_60 = arith.constant 1.000000e+00 : f32
    %311 = vector.broadcast %cst_60 : f32 to vector<8x64xf32>
    %312 = arith.addf %311, %310 : vector<8x64xf32>
    %313 = arith.divf %311, %312 : vector<8x64xf32>
    %314 = vector.extract_strided_slice %313 {offsets = [0, 0], sizes = [8, 32], strides = [1, 1]} : vector<8x64xf32> to vector<8x32xf32>
    %315 = vector.extract_strided_slice %313 {offsets = [0, 32], sizes = [8, 32], strides = [1, 1]} : vector<8x64xf32> to vector<8x32xf32>
    %316 = vector.extract_strided_slice %304 {offsets = [0, 64], sizes = [8, 32], strides = [1, 1]} : vector<8x96xf32> to vector<8x32xf32>
    %317 = vector.extract_strided_slice %305 {offsets = [0, 64], sizes = [8, 32], strides = [1, 1]} : vector<8x96xf32> to vector<8x32xf32>
    %318 = vector.broadcast %16 : vector<1x32xf32> to vector<8x32xf32>
    %319 = arith.addf %317, %318 : vector<8x32xf32>
    %320 = arith.mulf %314, %319 : vector<8x32xf32>
    %321 = arith.addf %316, %320 : vector<8x32xf32>
    %322 = math.tanh %321 : vector<8x32xf32>
    %323 = arith.subf %303, %322 : vector<8x32xf32>
    %324 = arith.mulf %315, %323 : vector<8x32xf32>
    %325 = arith.addf %322, %324 : vector<8x32xf32>
    %c112 = arith.constant 112 : index
    %c0_61 = arith.constant 0 : index
    %326 = vector.load %arg12[%c112, %c0_61] : memref<256x96xf32, #tpu.memory_space<vmem>>, vector<8x96xf32>
    %cst_62 = arith.constant dense<0.000000e+00> : vector<8x96xf32>
    %327 = tpu.matmul %325, %15, %cst_62 {dimension_numbers = #tpu.dot_dimension_numbers<[1], [0], [0], [1], [0, 0, 1, 1], [], []>} : vector<8x32xf32>, vector<32x96xf32>, vector<8x96xf32> -> vector<8x96xf32>
    %328 = vector.extract_strided_slice %326 {offsets = [0, 0], sizes = [8, 64], strides = [1, 1]} : vector<8x96xf32> to vector<8x64xf32>
    %329 = vector.extract_strided_slice %327 {offsets = [0, 0], sizes = [8, 64], strides = [1, 1]} : vector<8x96xf32> to vector<8x64xf32>
    %330 = arith.addf %328, %329 : vector<8x64xf32>
    %331 = arith.negf %330 : vector<8x64xf32>
    %332 = math.exp %331 : vector<8x64xf32>
    %cst_63 = arith.constant 1.000000e+00 : f32
    %333 = vector.broadcast %cst_63 : f32 to vector<8x64xf32>
    %334 = arith.addf %333, %332 : vector<8x64xf32>
    %335 = arith.divf %333, %334 : vector<8x64xf32>
    %336 = vector.extract_strided_slice %335 {offsets = [0, 0], sizes = [8, 32], strides = [1, 1]} : vector<8x64xf32> to vector<8x32xf32>
    %337 = vector.extract_strided_slice %335 {offsets = [0, 32], sizes = [8, 32], strides = [1, 1]} : vector<8x64xf32> to vector<8x32xf32>
    %338 = vector.extract_strided_slice %326 {offsets = [0, 64], sizes = [8, 32], strides = [1, 1]} : vector<8x96xf32> to vector<8x32xf32>
    %339 = vector.extract_strided_slice %327 {offsets = [0, 64], sizes = [8, 32], strides = [1, 1]} : vector<8x96xf32> to vector<8x32xf32>
    %340 = vector.broadcast %16 : vector<1x32xf32> to vector<8x32xf32>
    %341 = arith.addf %339, %340 : vector<8x32xf32>
    %342 = arith.mulf %336, %341 : vector<8x32xf32>
    %343 = arith.addf %338, %342 : vector<8x32xf32>
    %344 = math.tanh %343 : vector<8x32xf32>
    %345 = arith.subf %325, %344 : vector<8x32xf32>
    %346 = arith.mulf %337, %345 : vector<8x32xf32>
    %347 = arith.addf %344, %346 : vector<8x32xf32>
    %c120 = arith.constant 120 : index
    %c0_64 = arith.constant 0 : index
    %348 = vector.load %arg12[%c120, %c0_64] : memref<256x96xf32, #tpu.memory_space<vmem>>, vector<8x96xf32>
    %cst_65 = arith.constant dense<0.000000e+00> : vector<8x96xf32>
    %349 = tpu.matmul %347, %15, %cst_65 {dimension_numbers = #tpu.dot_dimension_numbers<[1], [0], [0], [1], [0, 0, 1, 1], [], []>} : vector<8x32xf32>, vector<32x96xf32>, vector<8x96xf32> -> vector<8x96xf32>
    %350 = vector.extract_strided_slice %348 {offsets = [0, 0], sizes = [8, 64], strides = [1, 1]} : vector<8x96xf32> to vector<8x64xf32>
    %351 = vector.extract_strided_slice %349 {offsets = [0, 0], sizes = [8, 64], strides = [1, 1]} : vector<8x96xf32> to vector<8x64xf32>
    %352 = arith.addf %350, %351 : vector<8x64xf32>
    %353 = arith.negf %352 : vector<8x64xf32>
    %354 = math.exp %353 : vector<8x64xf32>
    %cst_66 = arith.constant 1.000000e+00 : f32
    %355 = vector.broadcast %cst_66 : f32 to vector<8x64xf32>
    %356 = arith.addf %355, %354 : vector<8x64xf32>
    %357 = arith.divf %355, %356 : vector<8x64xf32>
    %358 = vector.extract_strided_slice %357 {offsets = [0, 0], sizes = [8, 32], strides = [1, 1]} : vector<8x64xf32> to vector<8x32xf32>
    %359 = vector.extract_strided_slice %357 {offsets = [0, 32], sizes = [8, 32], strides = [1, 1]} : vector<8x64xf32> to vector<8x32xf32>
    %360 = vector.extract_strided_slice %348 {offsets = [0, 64], sizes = [8, 32], strides = [1, 1]} : vector<8x96xf32> to vector<8x32xf32>
    %361 = vector.extract_strided_slice %349 {offsets = [0, 64], sizes = [8, 32], strides = [1, 1]} : vector<8x96xf32> to vector<8x32xf32>
    %362 = vector.broadcast %16 : vector<1x32xf32> to vector<8x32xf32>
    %363 = arith.addf %361, %362 : vector<8x32xf32>
    %364 = arith.mulf %358, %363 : vector<8x32xf32>
    %365 = arith.addf %360, %364 : vector<8x32xf32>
    %366 = math.tanh %365 : vector<8x32xf32>
    %367 = arith.subf %347, %366 : vector<8x32xf32>
    %368 = arith.mulf %359, %367 : vector<8x32xf32>
    %369 = arith.addf %366, %368 : vector<8x32xf32>
    %c128 = arith.constant 128 : index
    %c0_67 = arith.constant 0 : index
    %370 = vector.load %arg12[%c128, %c0_67] : memref<256x96xf32, #tpu.memory_space<vmem>>, vector<8x96xf32>
    %cst_68 = arith.constant dense<0.000000e+00> : vector<8x96xf32>
    %371 = tpu.matmul %369, %15, %cst_68 {dimension_numbers = #tpu.dot_dimension_numbers<[1], [0], [0], [1], [0, 0, 1, 1], [], []>} : vector<8x32xf32>, vector<32x96xf32>, vector<8x96xf32> -> vector<8x96xf32>
    %372 = vector.extract_strided_slice %370 {offsets = [0, 0], sizes = [8, 64], strides = [1, 1]} : vector<8x96xf32> to vector<8x64xf32>
    %373 = vector.extract_strided_slice %371 {offsets = [0, 0], sizes = [8, 64], strides = [1, 1]} : vector<8x96xf32> to vector<8x64xf32>
    %374 = arith.addf %372, %373 : vector<8x64xf32>
    %375 = arith.negf %374 : vector<8x64xf32>
    %376 = math.exp %375 : vector<8x64xf32>
    %cst_69 = arith.constant 1.000000e+00 : f32
    %377 = vector.broadcast %cst_69 : f32 to vector<8x64xf32>
    %378 = arith.addf %377, %376 : vector<8x64xf32>
    %379 = arith.divf %377, %378 : vector<8x64xf32>
    %380 = vector.extract_strided_slice %379 {offsets = [0, 0], sizes = [8, 32], strides = [1, 1]} : vector<8x64xf32> to vector<8x32xf32>
    %381 = vector.extract_strided_slice %379 {offsets = [0, 32], sizes = [8, 32], strides = [1, 1]} : vector<8x64xf32> to vector<8x32xf32>
    %382 = vector.extract_strided_slice %370 {offsets = [0, 64], sizes = [8, 32], strides = [1, 1]} : vector<8x96xf32> to vector<8x32xf32>
    %383 = vector.extract_strided_slice %371 {offsets = [0, 64], sizes = [8, 32], strides = [1, 1]} : vector<8x96xf32> to vector<8x32xf32>
    %384 = vector.broadcast %16 : vector<1x32xf32> to vector<8x32xf32>
    %385 = arith.addf %383, %384 : vector<8x32xf32>
    %386 = arith.mulf %380, %385 : vector<8x32xf32>
    %387 = arith.addf %382, %386 : vector<8x32xf32>
    %388 = math.tanh %387 : vector<8x32xf32>
    %389 = arith.subf %369, %388 : vector<8x32xf32>
    %390 = arith.mulf %381, %389 : vector<8x32xf32>
    %391 = arith.addf %388, %390 : vector<8x32xf32>
    %c136 = arith.constant 136 : index
    %c0_70 = arith.constant 0 : index
    %392 = vector.load %arg12[%c136, %c0_70] : memref<256x96xf32, #tpu.memory_space<vmem>>, vector<8x96xf32>
    %cst_71 = arith.constant dense<0.000000e+00> : vector<8x96xf32>
    %393 = tpu.matmul %391, %15, %cst_71 {dimension_numbers = #tpu.dot_dimension_numbers<[1], [0], [0], [1], [0, 0, 1, 1], [], []>} : vector<8x32xf32>, vector<32x96xf32>, vector<8x96xf32> -> vector<8x96xf32>
    %394 = vector.extract_strided_slice %392 {offsets = [0, 0], sizes = [8, 64], strides = [1, 1]} : vector<8x96xf32> to vector<8x64xf32>
    %395 = vector.extract_strided_slice %393 {offsets = [0, 0], sizes = [8, 64], strides = [1, 1]} : vector<8x96xf32> to vector<8x64xf32>
    %396 = arith.addf %394, %395 : vector<8x64xf32>
    %397 = arith.negf %396 : vector<8x64xf32>
    %398 = math.exp %397 : vector<8x64xf32>
    %cst_72 = arith.constant 1.000000e+00 : f32
    %399 = vector.broadcast %cst_72 : f32 to vector<8x64xf32>
    %400 = arith.addf %399, %398 : vector<8x64xf32>
    %401 = arith.divf %399, %400 : vector<8x64xf32>
    %402 = vector.extract_strided_slice %401 {offsets = [0, 0], sizes = [8, 32], strides = [1, 1]} : vector<8x64xf32> to vector<8x32xf32>
    %403 = vector.extract_strided_slice %401 {offsets = [0, 32], sizes = [8, 32], strides = [1, 1]} : vector<8x64xf32> to vector<8x32xf32>
    %404 = vector.extract_strided_slice %392 {offsets = [0, 64], sizes = [8, 32], strides = [1, 1]} : vector<8x96xf32> to vector<8x32xf32>
    %405 = vector.extract_strided_slice %393 {offsets = [0, 64], sizes = [8, 32], strides = [1, 1]} : vector<8x96xf32> to vector<8x32xf32>
    %406 = vector.broadcast %16 : vector<1x32xf32> to vector<8x32xf32>
    %407 = arith.addf %405, %406 : vector<8x32xf32>
    %408 = arith.mulf %402, %407 : vector<8x32xf32>
    %409 = arith.addf %404, %408 : vector<8x32xf32>
    %410 = math.tanh %409 : vector<8x32xf32>
    %411 = arith.subf %391, %410 : vector<8x32xf32>
    %412 = arith.mulf %403, %411 : vector<8x32xf32>
    %413 = arith.addf %410, %412 : vector<8x32xf32>
    %c144 = arith.constant 144 : index
    %c0_73 = arith.constant 0 : index
    %414 = vector.load %arg12[%c144, %c0_73] : memref<256x96xf32, #tpu.memory_space<vmem>>, vector<8x96xf32>
    %cst_74 = arith.constant dense<0.000000e+00> : vector<8x96xf32>
    %415 = tpu.matmul %413, %15, %cst_74 {dimension_numbers = #tpu.dot_dimension_numbers<[1], [0], [0], [1], [0, 0, 1, 1], [], []>} : vector<8x32xf32>, vector<32x96xf32>, vector<8x96xf32> -> vector<8x96xf32>
    %416 = vector.extract_strided_slice %414 {offsets = [0, 0], sizes = [8, 64], strides = [1, 1]} : vector<8x96xf32> to vector<8x64xf32>
    %417 = vector.extract_strided_slice %415 {offsets = [0, 0], sizes = [8, 64], strides = [1, 1]} : vector<8x96xf32> to vector<8x64xf32>
    %418 = arith.addf %416, %417 : vector<8x64xf32>
    %419 = arith.negf %418 : vector<8x64xf32>
    %420 = math.exp %419 : vector<8x64xf32>
    %cst_75 = arith.constant 1.000000e+00 : f32
    %421 = vector.broadcast %cst_75 : f32 to vector<8x64xf32>
    %422 = arith.addf %421, %420 : vector<8x64xf32>
    %423 = arith.divf %421, %422 : vector<8x64xf32>
    %424 = vector.extract_strided_slice %423 {offsets = [0, 0], sizes = [8, 32], strides = [1, 1]} : vector<8x64xf32> to vector<8x32xf32>
    %425 = vector.extract_strided_slice %423 {offsets = [0, 32], sizes = [8, 32], strides = [1, 1]} : vector<8x64xf32> to vector<8x32xf32>
    %426 = vector.extract_strided_slice %414 {offsets = [0, 64], sizes = [8, 32], strides = [1, 1]} : vector<8x96xf32> to vector<8x32xf32>
    %427 = vector.extract_strided_slice %415 {offsets = [0, 64], sizes = [8, 32], strides = [1, 1]} : vector<8x96xf32> to vector<8x32xf32>
    %428 = vector.broadcast %16 : vector<1x32xf32> to vector<8x32xf32>
    %429 = arith.addf %427, %428 : vector<8x32xf32>
    %430 = arith.mulf %424, %429 : vector<8x32xf32>
    %431 = arith.addf %426, %430 : vector<8x32xf32>
    %432 = math.tanh %431 : vector<8x32xf32>
    %433 = arith.subf %413, %432 : vector<8x32xf32>
    %434 = arith.mulf %425, %433 : vector<8x32xf32>
    %435 = arith.addf %432, %434 : vector<8x32xf32>
    %c152 = arith.constant 152 : index
    %c0_76 = arith.constant 0 : index
    %436 = vector.load %arg12[%c152, %c0_76] : memref<256x96xf32, #tpu.memory_space<vmem>>, vector<8x96xf32>
    %cst_77 = arith.constant dense<0.000000e+00> : vector<8x96xf32>
    %437 = tpu.matmul %435, %15, %cst_77 {dimension_numbers = #tpu.dot_dimension_numbers<[1], [0], [0], [1], [0, 0, 1, 1], [], []>} : vector<8x32xf32>, vector<32x96xf32>, vector<8x96xf32> -> vector<8x96xf32>
    %438 = vector.extract_strided_slice %436 {offsets = [0, 0], sizes = [8, 64], strides = [1, 1]} : vector<8x96xf32> to vector<8x64xf32>
    %439 = vector.extract_strided_slice %437 {offsets = [0, 0], sizes = [8, 64], strides = [1, 1]} : vector<8x96xf32> to vector<8x64xf32>
    %440 = arith.addf %438, %439 : vector<8x64xf32>
    %441 = arith.negf %440 : vector<8x64xf32>
    %442 = math.exp %441 : vector<8x64xf32>
    %cst_78 = arith.constant 1.000000e+00 : f32
    %443 = vector.broadcast %cst_78 : f32 to vector<8x64xf32>
    %444 = arith.addf %443, %442 : vector<8x64xf32>
    %445 = arith.divf %443, %444 : vector<8x64xf32>
    %446 = vector.extract_strided_slice %445 {offsets = [0, 0], sizes = [8, 32], strides = [1, 1]} : vector<8x64xf32> to vector<8x32xf32>
    %447 = vector.extract_strided_slice %445 {offsets = [0, 32], sizes = [8, 32], strides = [1, 1]} : vector<8x64xf32> to vector<8x32xf32>
    %448 = vector.extract_strided_slice %436 {offsets = [0, 64], sizes = [8, 32], strides = [1, 1]} : vector<8x96xf32> to vector<8x32xf32>
    %449 = vector.extract_strided_slice %437 {offsets = [0, 64], sizes = [8, 32], strides = [1, 1]} : vector<8x96xf32> to vector<8x32xf32>
    %450 = vector.broadcast %16 : vector<1x32xf32> to vector<8x32xf32>
    %451 = arith.addf %449, %450 : vector<8x32xf32>
    %452 = arith.mulf %446, %451 : vector<8x32xf32>
    %453 = arith.addf %448, %452 : vector<8x32xf32>
    %454 = math.tanh %453 : vector<8x32xf32>
    %455 = arith.subf %435, %454 : vector<8x32xf32>
    %456 = arith.mulf %447, %455 : vector<8x32xf32>
    %457 = arith.addf %454, %456 : vector<8x32xf32>
    %c160 = arith.constant 160 : index
    %c0_79 = arith.constant 0 : index
    %458 = vector.load %arg12[%c160, %c0_79] : memref<256x96xf32, #tpu.memory_space<vmem>>, vector<8x96xf32>
    %cst_80 = arith.constant dense<0.000000e+00> : vector<8x96xf32>
    %459 = tpu.matmul %457, %15, %cst_80 {dimension_numbers = #tpu.dot_dimension_numbers<[1], [0], [0], [1], [0, 0, 1, 1], [], []>} : vector<8x32xf32>, vector<32x96xf32>, vector<8x96xf32> -> vector<8x96xf32>
    %460 = vector.extract_strided_slice %458 {offsets = [0, 0], sizes = [8, 64], strides = [1, 1]} : vector<8x96xf32> to vector<8x64xf32>
    %461 = vector.extract_strided_slice %459 {offsets = [0, 0], sizes = [8, 64], strides = [1, 1]} : vector<8x96xf32> to vector<8x64xf32>
    %462 = arith.addf %460, %461 : vector<8x64xf32>
    %463 = arith.negf %462 : vector<8x64xf32>
    %464 = math.exp %463 : vector<8x64xf32>
    %cst_81 = arith.constant 1.000000e+00 : f32
    %465 = vector.broadcast %cst_81 : f32 to vector<8x64xf32>
    %466 = arith.addf %465, %464 : vector<8x64xf32>
    %467 = arith.divf %465, %466 : vector<8x64xf32>
    %468 = vector.extract_strided_slice %467 {offsets = [0, 0], sizes = [8, 32], strides = [1, 1]} : vector<8x64xf32> to vector<8x32xf32>
    %469 = vector.extract_strided_slice %467 {offsets = [0, 32], sizes = [8, 32], strides = [1, 1]} : vector<8x64xf32> to vector<8x32xf32>
    %470 = vector.extract_strided_slice %458 {offsets = [0, 64], sizes = [8, 32], strides = [1, 1]} : vector<8x96xf32> to vector<8x32xf32>
    %471 = vector.extract_strided_slice %459 {offsets = [0, 64], sizes = [8, 32], strides = [1, 1]} : vector<8x96xf32> to vector<8x32xf32>
    %472 = vector.broadcast %16 : vector<1x32xf32> to vector<8x32xf32>
    %473 = arith.addf %471, %472 : vector<8x32xf32>
    %474 = arith.mulf %468, %473 : vector<8x32xf32>
    %475 = arith.addf %470, %474 : vector<8x32xf32>
    %476 = math.tanh %475 : vector<8x32xf32>
    %477 = arith.subf %457, %476 : vector<8x32xf32>
    %478 = arith.mulf %469, %477 : vector<8x32xf32>
    %479 = arith.addf %476, %478 : vector<8x32xf32>
    %c168 = arith.constant 168 : index
    %c0_82 = arith.constant 0 : index
    %480 = vector.load %arg12[%c168, %c0_82] : memref<256x96xf32, #tpu.memory_space<vmem>>, vector<8x96xf32>
    %cst_83 = arith.constant dense<0.000000e+00> : vector<8x96xf32>
    %481 = tpu.matmul %479, %15, %cst_83 {dimension_numbers = #tpu.dot_dimension_numbers<[1], [0], [0], [1], [0, 0, 1, 1], [], []>} : vector<8x32xf32>, vector<32x96xf32>, vector<8x96xf32> -> vector<8x96xf32>
    %482 = vector.extract_strided_slice %480 {offsets = [0, 0], sizes = [8, 64], strides = [1, 1]} : vector<8x96xf32> to vector<8x64xf32>
    %483 = vector.extract_strided_slice %481 {offsets = [0, 0], sizes = [8, 64], strides = [1, 1]} : vector<8x96xf32> to vector<8x64xf32>
    %484 = arith.addf %482, %483 : vector<8x64xf32>
    %485 = arith.negf %484 : vector<8x64xf32>
    %486 = math.exp %485 : vector<8x64xf32>
    %cst_84 = arith.constant 1.000000e+00 : f32
    %487 = vector.broadcast %cst_84 : f32 to vector<8x64xf32>
    %488 = arith.addf %487, %486 : vector<8x64xf32>
    %489 = arith.divf %487, %488 : vector<8x64xf32>
    %490 = vector.extract_strided_slice %489 {offsets = [0, 0], sizes = [8, 32], strides = [1, 1]} : vector<8x64xf32> to vector<8x32xf32>
    %491 = vector.extract_strided_slice %489 {offsets = [0, 32], sizes = [8, 32], strides = [1, 1]} : vector<8x64xf32> to vector<8x32xf32>
    %492 = vector.extract_strided_slice %480 {offsets = [0, 64], sizes = [8, 32], strides = [1, 1]} : vector<8x96xf32> to vector<8x32xf32>
    %493 = vector.extract_strided_slice %481 {offsets = [0, 64], sizes = [8, 32], strides = [1, 1]} : vector<8x96xf32> to vector<8x32xf32>
    %494 = vector.broadcast %16 : vector<1x32xf32> to vector<8x32xf32>
    %495 = arith.addf %493, %494 : vector<8x32xf32>
    %496 = arith.mulf %490, %495 : vector<8x32xf32>
    %497 = arith.addf %492, %496 : vector<8x32xf32>
    %498 = math.tanh %497 : vector<8x32xf32>
    %499 = arith.subf %479, %498 : vector<8x32xf32>
    %500 = arith.mulf %491, %499 : vector<8x32xf32>
    %501 = arith.addf %498, %500 : vector<8x32xf32>
    %c176 = arith.constant 176 : index
    %c0_85 = arith.constant 0 : index
    %502 = vector.load %arg12[%c176, %c0_85] : memref<256x96xf32, #tpu.memory_space<vmem>>, vector<8x96xf32>
    %cst_86 = arith.constant dense<0.000000e+00> : vector<8x96xf32>
    %503 = tpu.matmul %501, %15, %cst_86 {dimension_numbers = #tpu.dot_dimension_numbers<[1], [0], [0], [1], [0, 0, 1, 1], [], []>} : vector<8x32xf32>, vector<32x96xf32>, vector<8x96xf32> -> vector<8x96xf32>
    %504 = vector.extract_strided_slice %502 {offsets = [0, 0], sizes = [8, 64], strides = [1, 1]} : vector<8x96xf32> to vector<8x64xf32>
    %505 = vector.extract_strided_slice %503 {offsets = [0, 0], sizes = [8, 64], strides = [1, 1]} : vector<8x96xf32> to vector<8x64xf32>
    %506 = arith.addf %504, %505 : vector<8x64xf32>
    %507 = arith.negf %506 : vector<8x64xf32>
    %508 = math.exp %507 : vector<8x64xf32>
    %cst_87 = arith.constant 1.000000e+00 : f32
    %509 = vector.broadcast %cst_87 : f32 to vector<8x64xf32>
    %510 = arith.addf %509, %508 : vector<8x64xf32>
    %511 = arith.divf %509, %510 : vector<8x64xf32>
    %512 = vector.extract_strided_slice %511 {offsets = [0, 0], sizes = [8, 32], strides = [1, 1]} : vector<8x64xf32> to vector<8x32xf32>
    %513 = vector.extract_strided_slice %511 {offsets = [0, 32], sizes = [8, 32], strides = [1, 1]} : vector<8x64xf32> to vector<8x32xf32>
    %514 = vector.extract_strided_slice %502 {offsets = [0, 64], sizes = [8, 32], strides = [1, 1]} : vector<8x96xf32> to vector<8x32xf32>
    %515 = vector.extract_strided_slice %503 {offsets = [0, 64], sizes = [8, 32], strides = [1, 1]} : vector<8x96xf32> to vector<8x32xf32>
    %516 = vector.broadcast %16 : vector<1x32xf32> to vector<8x32xf32>
    %517 = arith.addf %515, %516 : vector<8x32xf32>
    %518 = arith.mulf %512, %517 : vector<8x32xf32>
    %519 = arith.addf %514, %518 : vector<8x32xf32>
    %520 = math.tanh %519 : vector<8x32xf32>
    %521 = arith.subf %501, %520 : vector<8x32xf32>
    %522 = arith.mulf %513, %521 : vector<8x32xf32>
    %523 = arith.addf %520, %522 : vector<8x32xf32>
    %c184 = arith.constant 184 : index
    %c0_88 = arith.constant 0 : index
    %524 = vector.load %arg12[%c184, %c0_88] : memref<256x96xf32, #tpu.memory_space<vmem>>, vector<8x96xf32>
    %cst_89 = arith.constant dense<0.000000e+00> : vector<8x96xf32>
    %525 = tpu.matmul %523, %15, %cst_89 {dimension_numbers = #tpu.dot_dimension_numbers<[1], [0], [0], [1], [0, 0, 1, 1], [], []>} : vector<8x32xf32>, vector<32x96xf32>, vector<8x96xf32> -> vector<8x96xf32>
    %526 = vector.extract_strided_slice %524 {offsets = [0, 0], sizes = [8, 64], strides = [1, 1]} : vector<8x96xf32> to vector<8x64xf32>
    %527 = vector.extract_strided_slice %525 {offsets = [0, 0], sizes = [8, 64], strides = [1, 1]} : vector<8x96xf32> to vector<8x64xf32>
    %528 = arith.addf %526, %527 : vector<8x64xf32>
    %529 = arith.negf %528 : vector<8x64xf32>
    %530 = math.exp %529 : vector<8x64xf32>
    %cst_90 = arith.constant 1.000000e+00 : f32
    %531 = vector.broadcast %cst_90 : f32 to vector<8x64xf32>
    %532 = arith.addf %531, %530 : vector<8x64xf32>
    %533 = arith.divf %531, %532 : vector<8x64xf32>
    %534 = vector.extract_strided_slice %533 {offsets = [0, 0], sizes = [8, 32], strides = [1, 1]} : vector<8x64xf32> to vector<8x32xf32>
    %535 = vector.extract_strided_slice %533 {offsets = [0, 32], sizes = [8, 32], strides = [1, 1]} : vector<8x64xf32> to vector<8x32xf32>
    %536 = vector.extract_strided_slice %524 {offsets = [0, 64], sizes = [8, 32], strides = [1, 1]} : vector<8x96xf32> to vector<8x32xf32>
    %537 = vector.extract_strided_slice %525 {offsets = [0, 64], sizes = [8, 32], strides = [1, 1]} : vector<8x96xf32> to vector<8x32xf32>
    %538 = vector.broadcast %16 : vector<1x32xf32> to vector<8x32xf32>
    %539 = arith.addf %537, %538 : vector<8x32xf32>
    %540 = arith.mulf %534, %539 : vector<8x32xf32>
    %541 = arith.addf %536, %540 : vector<8x32xf32>
    %542 = math.tanh %541 : vector<8x32xf32>
    %543 = arith.subf %523, %542 : vector<8x32xf32>
    %544 = arith.mulf %535, %543 : vector<8x32xf32>
    %545 = arith.addf %542, %544 : vector<8x32xf32>
    %c192 = arith.constant 192 : index
    %c0_91 = arith.constant 0 : index
    %546 = vector.load %arg12[%c192, %c0_91] : memref<256x96xf32, #tpu.memory_space<vmem>>, vector<8x96xf32>
    %cst_92 = arith.constant dense<0.000000e+00> : vector<8x96xf32>
    %547 = tpu.matmul %545, %15, %cst_92 {dimension_numbers = #tpu.dot_dimension_numbers<[1], [0], [0], [1], [0, 0, 1, 1], [], []>} : vector<8x32xf32>, vector<32x96xf32>, vector<8x96xf32> -> vector<8x96xf32>
    %548 = vector.extract_strided_slice %546 {offsets = [0, 0], sizes = [8, 64], strides = [1, 1]} : vector<8x96xf32> to vector<8x64xf32>
    %549 = vector.extract_strided_slice %547 {offsets = [0, 0], sizes = [8, 64], strides = [1, 1]} : vector<8x96xf32> to vector<8x64xf32>
    %550 = arith.addf %548, %549 : vector<8x64xf32>
    %551 = arith.negf %550 : vector<8x64xf32>
    %552 = math.exp %551 : vector<8x64xf32>
    %cst_93 = arith.constant 1.000000e+00 : f32
    %553 = vector.broadcast %cst_93 : f32 to vector<8x64xf32>
    %554 = arith.addf %553, %552 : vector<8x64xf32>
    %555 = arith.divf %553, %554 : vector<8x64xf32>
    %556 = vector.extract_strided_slice %555 {offsets = [0, 0], sizes = [8, 32], strides = [1, 1]} : vector<8x64xf32> to vector<8x32xf32>
    %557 = vector.extract_strided_slice %555 {offsets = [0, 32], sizes = [8, 32], strides = [1, 1]} : vector<8x64xf32> to vector<8x32xf32>
    %558 = vector.extract_strided_slice %546 {offsets = [0, 64], sizes = [8, 32], strides = [1, 1]} : vector<8x96xf32> to vector<8x32xf32>
    %559 = vector.extract_strided_slice %547 {offsets = [0, 64], sizes = [8, 32], strides = [1, 1]} : vector<8x96xf32> to vector<8x32xf32>
    %560 = vector.broadcast %16 : vector<1x32xf32> to vector<8x32xf32>
    %561 = arith.addf %559, %560 : vector<8x32xf32>
    %562 = arith.mulf %556, %561 : vector<8x32xf32>
    %563 = arith.addf %558, %562 : vector<8x32xf32>
    %564 = math.tanh %563 : vector<8x32xf32>
    %565 = arith.subf %545, %564 : vector<8x32xf32>
    %566 = arith.mulf %557, %565 : vector<8x32xf32>
    %567 = arith.addf %564, %566 : vector<8x32xf32>
    %c200 = arith.constant 200 : index
    %c0_94 = arith.constant 0 : index
    %568 = vector.load %arg12[%c200, %c0_94] : memref<256x96xf32, #tpu.memory_space<vmem>>, vector<8x96xf32>
    %cst_95 = arith.constant dense<0.000000e+00> : vector<8x96xf32>
    %569 = tpu.matmul %567, %15, %cst_95 {dimension_numbers = #tpu.dot_dimension_numbers<[1], [0], [0], [1], [0, 0, 1, 1], [], []>} : vector<8x32xf32>, vector<32x96xf32>, vector<8x96xf32> -> vector<8x96xf32>
    %570 = vector.extract_strided_slice %568 {offsets = [0, 0], sizes = [8, 64], strides = [1, 1]} : vector<8x96xf32> to vector<8x64xf32>
    %571 = vector.extract_strided_slice %569 {offsets = [0, 0], sizes = [8, 64], strides = [1, 1]} : vector<8x96xf32> to vector<8x64xf32>
    %572 = arith.addf %570, %571 : vector<8x64xf32>
    %573 = arith.negf %572 : vector<8x64xf32>
    %574 = math.exp %573 : vector<8x64xf32>
    %cst_96 = arith.constant 1.000000e+00 : f32
    %575 = vector.broadcast %cst_96 : f32 to vector<8x64xf32>
    %576 = arith.addf %575, %574 : vector<8x64xf32>
    %577 = arith.divf %575, %576 : vector<8x64xf32>
    %578 = vector.extract_strided_slice %577 {offsets = [0, 0], sizes = [8, 32], strides = [1, 1]} : vector<8x64xf32> to vector<8x32xf32>
    %579 = vector.extract_strided_slice %577 {offsets = [0, 32], sizes = [8, 32], strides = [1, 1]} : vector<8x64xf32> to vector<8x32xf32>
    %580 = vector.extract_strided_slice %568 {offsets = [0, 64], sizes = [8, 32], strides = [1, 1]} : vector<8x96xf32> to vector<8x32xf32>
    %581 = vector.extract_strided_slice %569 {offsets = [0, 64], sizes = [8, 32], strides = [1, 1]} : vector<8x96xf32> to vector<8x32xf32>
    %582 = vector.broadcast %16 : vector<1x32xf32> to vector<8x32xf32>
    %583 = arith.addf %581, %582 : vector<8x32xf32>
    %584 = arith.mulf %578, %583 : vector<8x32xf32>
    %585 = arith.addf %580, %584 : vector<8x32xf32>
    %586 = math.tanh %585 : vector<8x32xf32>
    %587 = arith.subf %567, %586 : vector<8x32xf32>
    %588 = arith.mulf %579, %587 : vector<8x32xf32>
    %589 = arith.addf %586, %588 : vector<8x32xf32>
    %c208 = arith.constant 208 : index
    %c0_97 = arith.constant 0 : index
    %590 = vector.load %arg12[%c208, %c0_97] : memref<256x96xf32, #tpu.memory_space<vmem>>, vector<8x96xf32>
    %cst_98 = arith.constant dense<0.000000e+00> : vector<8x96xf32>
    %591 = tpu.matmul %589, %15, %cst_98 {dimension_numbers = #tpu.dot_dimension_numbers<[1], [0], [0], [1], [0, 0, 1, 1], [], []>} : vector<8x32xf32>, vector<32x96xf32>, vector<8x96xf32> -> vector<8x96xf32>
    %592 = vector.extract_strided_slice %590 {offsets = [0, 0], sizes = [8, 64], strides = [1, 1]} : vector<8x96xf32> to vector<8x64xf32>
    %593 = vector.extract_strided_slice %591 {offsets = [0, 0], sizes = [8, 64], strides = [1, 1]} : vector<8x96xf32> to vector<8x64xf32>
    %594 = arith.addf %592, %593 : vector<8x64xf32>
    %595 = arith.negf %594 : vector<8x64xf32>
    %596 = math.exp %595 : vector<8x64xf32>
    %cst_99 = arith.constant 1.000000e+00 : f32
    %597 = vector.broadcast %cst_99 : f32 to vector<8x64xf32>
    %598 = arith.addf %597, %596 : vector<8x64xf32>
    %599 = arith.divf %597, %598 : vector<8x64xf32>
    %600 = vector.extract_strided_slice %599 {offsets = [0, 0], sizes = [8, 32], strides = [1, 1]} : vector<8x64xf32> to vector<8x32xf32>
    %601 = vector.extract_strided_slice %599 {offsets = [0, 32], sizes = [8, 32], strides = [1, 1]} : vector<8x64xf32> to vector<8x32xf32>
    %602 = vector.extract_strided_slice %590 {offsets = [0, 64], sizes = [8, 32], strides = [1, 1]} : vector<8x96xf32> to vector<8x32xf32>
    %603 = vector.extract_strided_slice %591 {offsets = [0, 64], sizes = [8, 32], strides = [1, 1]} : vector<8x96xf32> to vector<8x32xf32>
    %604 = vector.broadcast %16 : vector<1x32xf32> to vector<8x32xf32>
    %605 = arith.addf %603, %604 : vector<8x32xf32>
    %606 = arith.mulf %600, %605 : vector<8x32xf32>
    %607 = arith.addf %602, %606 : vector<8x32xf32>
    %608 = math.tanh %607 : vector<8x32xf32>
    %609 = arith.subf %589, %608 : vector<8x32xf32>
    %610 = arith.mulf %601, %609 : vector<8x32xf32>
    %611 = arith.addf %608, %610 : vector<8x32xf32>
    %c216 = arith.constant 216 : index
    %c0_100 = arith.constant 0 : index
    %612 = vector.load %arg12[%c216, %c0_100] : memref<256x96xf32, #tpu.memory_space<vmem>>, vector<8x96xf32>
    %cst_101 = arith.constant dense<0.000000e+00> : vector<8x96xf32>
    %613 = tpu.matmul %611, %15, %cst_101 {dimension_numbers = #tpu.dot_dimension_numbers<[1], [0], [0], [1], [0, 0, 1, 1], [], []>} : vector<8x32xf32>, vector<32x96xf32>, vector<8x96xf32> -> vector<8x96xf32>
    %614 = vector.extract_strided_slice %612 {offsets = [0, 0], sizes = [8, 64], strides = [1, 1]} : vector<8x96xf32> to vector<8x64xf32>
    %615 = vector.extract_strided_slice %613 {offsets = [0, 0], sizes = [8, 64], strides = [1, 1]} : vector<8x96xf32> to vector<8x64xf32>
    %616 = arith.addf %614, %615 : vector<8x64xf32>
    %617 = arith.negf %616 : vector<8x64xf32>
    %618 = math.exp %617 : vector<8x64xf32>
    %cst_102 = arith.constant 1.000000e+00 : f32
    %619 = vector.broadcast %cst_102 : f32 to vector<8x64xf32>
    %620 = arith.addf %619, %618 : vector<8x64xf32>
    %621 = arith.divf %619, %620 : vector<8x64xf32>
    %622 = vector.extract_strided_slice %621 {offsets = [0, 0], sizes = [8, 32], strides = [1, 1]} : vector<8x64xf32> to vector<8x32xf32>
    %623 = vector.extract_strided_slice %621 {offsets = [0, 32], sizes = [8, 32], strides = [1, 1]} : vector<8x64xf32> to vector<8x32xf32>
    %624 = vector.extract_strided_slice %612 {offsets = [0, 64], sizes = [8, 32], strides = [1, 1]} : vector<8x96xf32> to vector<8x32xf32>
    %625 = vector.extract_strided_slice %613 {offsets = [0, 64], sizes = [8, 32], strides = [1, 1]} : vector<8x96xf32> to vector<8x32xf32>
    %626 = vector.broadcast %16 : vector<1x32xf32> to vector<8x32xf32>
    %627 = arith.addf %625, %626 : vector<8x32xf32>
    %628 = arith.mulf %622, %627 : vector<8x32xf32>
    %629 = arith.addf %624, %628 : vector<8x32xf32>
    %630 = math.tanh %629 : vector<8x32xf32>
    %631 = arith.subf %611, %630 : vector<8x32xf32>
    %632 = arith.mulf %623, %631 : vector<8x32xf32>
    %633 = arith.addf %630, %632 : vector<8x32xf32>
    %c224 = arith.constant 224 : index
    %c0_103 = arith.constant 0 : index
    %634 = vector.load %arg12[%c224, %c0_103] : memref<256x96xf32, #tpu.memory_space<vmem>>, vector<8x96xf32>
    %cst_104 = arith.constant dense<0.000000e+00> : vector<8x96xf32>
    %635 = tpu.matmul %633, %15, %cst_104 {dimension_numbers = #tpu.dot_dimension_numbers<[1], [0], [0], [1], [0, 0, 1, 1], [], []>} : vector<8x32xf32>, vector<32x96xf32>, vector<8x96xf32> -> vector<8x96xf32>
    %636 = vector.extract_strided_slice %634 {offsets = [0, 0], sizes = [8, 64], strides = [1, 1]} : vector<8x96xf32> to vector<8x64xf32>
    %637 = vector.extract_strided_slice %635 {offsets = [0, 0], sizes = [8, 64], strides = [1, 1]} : vector<8x96xf32> to vector<8x64xf32>
    %638 = arith.addf %636, %637 : vector<8x64xf32>
    %639 = arith.negf %638 : vector<8x64xf32>
    %640 = math.exp %639 : vector<8x64xf32>
    %cst_105 = arith.constant 1.000000e+00 : f32
    %641 = vector.broadcast %cst_105 : f32 to vector<8x64xf32>
    %642 = arith.addf %641, %640 : vector<8x64xf32>
    %643 = arith.divf %641, %642 : vector<8x64xf32>
    %644 = vector.extract_strided_slice %643 {offsets = [0, 0], sizes = [8, 32], strides = [1, 1]} : vector<8x64xf32> to vector<8x32xf32>
    %645 = vector.extract_strided_slice %643 {offsets = [0, 32], sizes = [8, 32], strides = [1, 1]} : vector<8x64xf32> to vector<8x32xf32>
    %646 = vector.extract_strided_slice %634 {offsets = [0, 64], sizes = [8, 32], strides = [1, 1]} : vector<8x96xf32> to vector<8x32xf32>
    %647 = vector.extract_strided_slice %635 {offsets = [0, 64], sizes = [8, 32], strides = [1, 1]} : vector<8x96xf32> to vector<8x32xf32>
    %648 = vector.broadcast %16 : vector<1x32xf32> to vector<8x32xf32>
    %649 = arith.addf %647, %648 : vector<8x32xf32>
    %650 = arith.mulf %644, %649 : vector<8x32xf32>
    %651 = arith.addf %646, %650 : vector<8x32xf32>
    %652 = math.tanh %651 : vector<8x32xf32>
    %653 = arith.subf %633, %652 : vector<8x32xf32>
    %654 = arith.mulf %645, %653 : vector<8x32xf32>
    %655 = arith.addf %652, %654 : vector<8x32xf32>
    %c232 = arith.constant 232 : index
    %c0_106 = arith.constant 0 : index
    %656 = vector.load %arg12[%c232, %c0_106] : memref<256x96xf32, #tpu.memory_space<vmem>>, vector<8x96xf32>
    %cst_107 = arith.constant dense<0.000000e+00> : vector<8x96xf32>
    %657 = tpu.matmul %655, %15, %cst_107 {dimension_numbers = #tpu.dot_dimension_numbers<[1], [0], [0], [1], [0, 0, 1, 1], [], []>} : vector<8x32xf32>, vector<32x96xf32>, vector<8x96xf32> -> vector<8x96xf32>
    %658 = vector.extract_strided_slice %656 {offsets = [0, 0], sizes = [8, 64], strides = [1, 1]} : vector<8x96xf32> to vector<8x64xf32>
    %659 = vector.extract_strided_slice %657 {offsets = [0, 0], sizes = [8, 64], strides = [1, 1]} : vector<8x96xf32> to vector<8x64xf32>
    %660 = arith.addf %658, %659 : vector<8x64xf32>
    %661 = arith.negf %660 : vector<8x64xf32>
    %662 = math.exp %661 : vector<8x64xf32>
    %cst_108 = arith.constant 1.000000e+00 : f32
    %663 = vector.broadcast %cst_108 : f32 to vector<8x64xf32>
    %664 = arith.addf %663, %662 : vector<8x64xf32>
    %665 = arith.divf %663, %664 : vector<8x64xf32>
    %666 = vector.extract_strided_slice %665 {offsets = [0, 0], sizes = [8, 32], strides = [1, 1]} : vector<8x64xf32> to vector<8x32xf32>
    %667 = vector.extract_strided_slice %665 {offsets = [0, 32], sizes = [8, 32], strides = [1, 1]} : vector<8x64xf32> to vector<8x32xf32>
    %668 = vector.extract_strided_slice %656 {offsets = [0, 64], sizes = [8, 32], strides = [1, 1]} : vector<8x96xf32> to vector<8x32xf32>
    %669 = vector.extract_strided_slice %657 {offsets = [0, 64], sizes = [8, 32], strides = [1, 1]} : vector<8x96xf32> to vector<8x32xf32>
    %670 = vector.broadcast %16 : vector<1x32xf32> to vector<8x32xf32>
    %671 = arith.addf %669, %670 : vector<8x32xf32>
    %672 = arith.mulf %666, %671 : vector<8x32xf32>
    %673 = arith.addf %668, %672 : vector<8x32xf32>
    %674 = math.tanh %673 : vector<8x32xf32>
    %675 = arith.subf %655, %674 : vector<8x32xf32>
    %676 = arith.mulf %667, %675 : vector<8x32xf32>
    %677 = arith.addf %674, %676 : vector<8x32xf32>
    %c240 = arith.constant 240 : index
    %c0_109 = arith.constant 0 : index
    %678 = vector.load %arg12[%c240, %c0_109] : memref<256x96xf32, #tpu.memory_space<vmem>>, vector<8x96xf32>
    %cst_110 = arith.constant dense<0.000000e+00> : vector<8x96xf32>
    %679 = tpu.matmul %677, %15, %cst_110 {dimension_numbers = #tpu.dot_dimension_numbers<[1], [0], [0], [1], [0, 0, 1, 1], [], []>} : vector<8x32xf32>, vector<32x96xf32>, vector<8x96xf32> -> vector<8x96xf32>
    %680 = vector.extract_strided_slice %678 {offsets = [0, 0], sizes = [8, 64], strides = [1, 1]} : vector<8x96xf32> to vector<8x64xf32>
    %681 = vector.extract_strided_slice %679 {offsets = [0, 0], sizes = [8, 64], strides = [1, 1]} : vector<8x96xf32> to vector<8x64xf32>
    %682 = arith.addf %680, %681 : vector<8x64xf32>
    %683 = arith.negf %682 : vector<8x64xf32>
    %684 = math.exp %683 : vector<8x64xf32>
    %cst_111 = arith.constant 1.000000e+00 : f32
    %685 = vector.broadcast %cst_111 : f32 to vector<8x64xf32>
    %686 = arith.addf %685, %684 : vector<8x64xf32>
    %687 = arith.divf %685, %686 : vector<8x64xf32>
    %688 = vector.extract_strided_slice %687 {offsets = [0, 0], sizes = [8, 32], strides = [1, 1]} : vector<8x64xf32> to vector<8x32xf32>
    %689 = vector.extract_strided_slice %687 {offsets = [0, 32], sizes = [8, 32], strides = [1, 1]} : vector<8x64xf32> to vector<8x32xf32>
    %690 = vector.extract_strided_slice %678 {offsets = [0, 64], sizes = [8, 32], strides = [1, 1]} : vector<8x96xf32> to vector<8x32xf32>
    %691 = vector.extract_strided_slice %679 {offsets = [0, 64], sizes = [8, 32], strides = [1, 1]} : vector<8x96xf32> to vector<8x32xf32>
    %692 = vector.broadcast %16 : vector<1x32xf32> to vector<8x32xf32>
    %693 = arith.addf %691, %692 : vector<8x32xf32>
    %694 = arith.mulf %688, %693 : vector<8x32xf32>
    %695 = arith.addf %690, %694 : vector<8x32xf32>
    %696 = math.tanh %695 : vector<8x32xf32>
    %697 = arith.subf %677, %696 : vector<8x32xf32>
    %698 = arith.mulf %689, %697 : vector<8x32xf32>
    %699 = arith.addf %696, %698 : vector<8x32xf32>
    %c248 = arith.constant 248 : index
    %c0_112 = arith.constant 0 : index
    %700 = vector.load %arg12[%c248, %c0_112] : memref<256x96xf32, #tpu.memory_space<vmem>>, vector<8x96xf32>
    %cst_113 = arith.constant dense<0.000000e+00> : vector<8x96xf32>
    %701 = tpu.matmul %699, %15, %cst_113 {dimension_numbers = #tpu.dot_dimension_numbers<[1], [0], [0], [1], [0, 0, 1, 1], [], []>} : vector<8x32xf32>, vector<32x96xf32>, vector<8x96xf32> -> vector<8x96xf32>
    %702 = vector.extract_strided_slice %700 {offsets = [0, 0], sizes = [8, 64], strides = [1, 1]} : vector<8x96xf32> to vector<8x64xf32>
    %703 = vector.extract_strided_slice %701 {offsets = [0, 0], sizes = [8, 64], strides = [1, 1]} : vector<8x96xf32> to vector<8x64xf32>
    %704 = arith.addf %702, %703 : vector<8x64xf32>
    %705 = arith.negf %704 : vector<8x64xf32>
    %706 = math.exp %705 : vector<8x64xf32>
    %cst_114 = arith.constant 1.000000e+00 : f32
    %707 = vector.broadcast %cst_114 : f32 to vector<8x64xf32>
    %708 = arith.addf %707, %706 : vector<8x64xf32>
    %709 = arith.divf %707, %708 : vector<8x64xf32>
    %710 = vector.extract_strided_slice %709 {offsets = [0, 0], sizes = [8, 32], strides = [1, 1]} : vector<8x64xf32> to vector<8x32xf32>
    %711 = vector.extract_strided_slice %709 {offsets = [0, 32], sizes = [8, 32], strides = [1, 1]} : vector<8x64xf32> to vector<8x32xf32>
    %712 = vector.extract_strided_slice %700 {offsets = [0, 64], sizes = [8, 32], strides = [1, 1]} : vector<8x96xf32> to vector<8x32xf32>
    %713 = vector.extract_strided_slice %701 {offsets = [0, 64], sizes = [8, 32], strides = [1, 1]} : vector<8x96xf32> to vector<8x32xf32>
    %714 = vector.broadcast %16 : vector<1x32xf32> to vector<8x32xf32>
    %715 = arith.addf %713, %714 : vector<8x32xf32>
    %716 = arith.mulf %710, %715 : vector<8x32xf32>
    %717 = arith.addf %712, %716 : vector<8x32xf32>
    %718 = math.tanh %717 : vector<8x32xf32>
    %719 = arith.subf %699, %718 : vector<8x32xf32>
    %720 = arith.mulf %711, %719 : vector<8x32xf32>
    %721 = arith.addf %718, %720 : vector<8x32xf32>
    %722 = arith.truncf %721 : vector<8x32xf32> to vector<8x32xbf16>
    %c0_115 = arith.constant 0 : index
    %c0_116 = arith.constant 0 : index
    %723 = vector.load %arg7[%c0_115, %c0_116] : memref<32x64xbf16, #tpu.memory_space<vmem>>, vector<32x64xbf16>
    %cst_117 = arith.constant dense<0.000000e+00> : vector<8x64xf32>
    %724 = tpu.matmul %722, %723, %cst_117 {dimension_numbers = #tpu.dot_dimension_numbers<[1], [0], [0], [1], [0, 0, 1, 1], [], []>} : vector<8x32xbf16>, vector<32x64xbf16>, vector<8x64xf32> -> vector<8x64xf32>
    %c0_118 = arith.constant 0 : index
    %c0_119 = arith.constant 0 : index
    %725 = vector.load %arg8[%c0_118, %c0_119] : memref<1x64xf32, #tpu.memory_space<vmem>>, vector<1x64xf32>
    %726 = vector.broadcast %725 : vector<1x64xf32> to vector<8x64xf32>
    %727 = arith.addf %724, %726 : vector<8x64xf32>
    %728 = arith.truncf %727 : vector<8x64xf32> to vector<8x64xbf16>
    %c0_120 = arith.constant 0 : index
    %c0_121 = arith.constant 0 : index
    %729 = vector.load %arg9[%c0_120, %c0_121] : memref<64x50xbf16, #tpu.memory_space<vmem>>, vector<64x50xbf16>
    %cst_122 = arith.constant dense<0.000000e+00> : vector<8x50xf32>
    %730 = tpu.matmul %728, %729, %cst_122 {dimension_numbers = #tpu.dot_dimension_numbers<[1], [0], [0], [1], [0, 0, 1, 1], [], []>} : vector<8x64xbf16>, vector<64x50xbf16>, vector<8x50xf32> -> vector<8x50xf32>
    %c0_123 = arith.constant 0 : index
    %c0_124 = arith.constant 0 : index
    %731 = vector.load %arg10[%c0_123, %c0_124] : memref<1x50xf32, #tpu.memory_space<vmem>>, vector<1x50xf32>
    %732 = vector.broadcast %731 : vector<1x50xf32> to vector<8x50xf32>
    %733 = arith.addf %730, %732 : vector<8x50xf32>
    %c0_125 = arith.constant 0 : index
    %c0_126 = arith.constant 0 : index
    %734 = vector.load %arg11[%c0_125, %c0_126] : memref<8x50xf32, #tpu.memory_space<vmem>>, vector<8x50xf32>
    tpu.vector_store %arg11[%c0_125, %c0_126], %733 {strides = array<i32>} : memref<8x50xf32, #tpu.memory_space<vmem>>, vector<8x50xf32>,
    return
  }
}

</mosaic_0001>

<bundles_post_ra>
// kernel: gru_model_forward.1
= control target key start
LH: loop header
LB: loop body
LE: loop exit
PB: predicated region body
PF: predicated region fallthrough
CT: control target
= control target key end

     0   :  { %vm1597_vm0 = vcmask 130048   ;;  %vm1735_vm1 = vcmask 785408   ;;  %s5137_s21 = smov 32   ;;  %vm1774_vm6 = vcmask 261120   ;;  %s6724_s1 = inlined_call_operand.vmem [shape: bf16[768,16], index: 1, kind: input, shape index: {}]   ;;  %s6725_s2 = inlined_call_operand.vmem [shape: f32[1,16], index: 2, kind: input, shape index: {}]   ;;  %s6726_s0 = inlined_call_operand.vmem [shape: bf16[256,768], index: 0, kind: input, shape index: {}]   ;;  %s6727_s5 = inlined_call_operand.vmem [shape: f32[32,96], index: 5, kind: input, shape index: {}]   ;;  %s6728_s3 = inlined_call_operand.vmem [shape: bf16[16,96], index: 3, kind: input, shape index: {}]   ;;  %s6729_s6 = inlined_call_operand.vmem [shape: f32[1,32], index: 6, kind: input, shape index: {}]   ;;  %s6730_s4 = inlined_call_operand.vmem [shape: f32[1,96], index: 4, kind: input, shape index: {}]   ;;  %s6731_s7 = inlined_call_operand.vmem [shape: bf16[32,64], index: 7, kind: input, shape index: {}]   ;;  %s6732_s9 = inlined_call_operand.vmem [shape: bf16[64,50], index: 9, kind: input, shape index: {}]   ;;  %s6733_s8 = inlined_call_operand.vmem [shape: f32[1,64], index: 8, kind: input, shape index: {}]   ;;  %s6734_s10 = inlined_call_operand.vmem [shape: f32[1,50], index: 10, kind: input, shape index: {}]   ;;  %s6735_s11 = inlined_call_operand.vmem [shape: f32[8,50], index: 11, kind: output, shape index: {}]  }
   0x1   :  { %v4873_v0 = vld [vmem:[%s6724_s1 + $0x38] sm:$0xff]  ;;  %v4872_v4 = vld [vmem:[%s6724_s1 + $0x30] sm:$0xff]  ;;  %v4871_v8 = vld [vmem:[%s6724_s1 + $0x28] sm:$0xff] }
   0x2   :  { %v4881_v1 = vld [vmem:[%s6724_s1 + $0x78] sm:$0xff]  ;;  %1003 = vmatpush.bf16.msra.mxu0 %v4873_v0  ;;  %v4880_v5 = vld [vmem:[%s6724_s1 + $0x70] sm:$0xff]  ;;  %v4879_v9 = vld [vmem:[%s6724_s1 + $0x68] sm:$0xff] }
   0x3   :  { %v4889_v2 = vld [vmem:[%s6724_s1 + $0xb8] sm:$0xff]  ;;  %1092 = vmatpush.bf16.msra.mxu1 %v4881_v1  ;;  %v4888_v6 = vld [vmem:[%s6724_s1 + $0xb0] sm:$0xff]  ;;  %v4887_v10 = vld [vmem:[%s6724_s1 + $0xa8] sm:$0xff] }
   0x4   :  { %v4897_v3 = vld [vmem:[%s6724_s1 + $0xf8] sm:$0xff]  ;;  %1181 = vmatpush.bf16.msra.mxu2 %v4889_v2  ;;  %v4896_v7 = vld [vmem:[%s6724_s1 + $0xf0] sm:$0xff]  ;;  %v4895_v11 = vld [vmem:[%s6724_s1 + $0xe8] sm:$0xff] }
   0x5   :  { %1270 = vmatpush.bf16.msra.mxu3 %v4897_v3  ;;  %v4870_v12 = vld [vmem:[%s6724_s1 + $0x20] sm:$0xff]  ;;  %v4869_v16 = vld [vmem:[%s6724_s1 + $0x18] sm:$0xff]  ;;  %v4868_v20 = vld [vmem:[%s6724_s1 + $0x10] sm:$0xff] }
   0x6   :  { %1004 = vmatpush.bf16.msra.mxu0 %v4872_v4  ;;  %v4878_v13 = vld [vmem:[%s6724_s1 + $0x60] sm:$0xff]  ;;  %v4877_v17 = vld [vmem:[%s6724_s1 + $0x58] sm:$0xff]  ;;  %v4876_v21 = vld [vmem:[%s6724_s1 + $0x50] sm:$0xff] }
   0x7   :  { %1093 = vmatpush.bf16.msra.mxu1 %v4880_v5  ;;  %v4886_v14 = vld [vmem:[%s6724_s1 + $0xa0] sm:$0xff]  ;;  %v4885_v18 = vld [vmem:[%s6724_s1 + $0x98] sm:$0xff]  ;;  %v4884_v22 = vld [vmem:[%s6724_s1 + $0x90] sm:$0xff] }
   0x8   :  { %1182 = vmatpush.bf16.msra.mxu2 %v4888_v6  ;;  %v4894_v15 = vld [vmem:[%s6724_s1 + $0xe0] sm:$0xff]  ;;  %v4893_v19 = vld [vmem:[%s6724_s1 + $0xd8] sm:$0xff]  ;;  %v4892_v23 = vld [vmem:[%s6724_s1 + $0xd0] sm:$0xff] }
   0x9   :  { %1271 = vmatpush.bf16.msra.mxu3 %v4896_v7  ;;  %v4867_v24 = vld [vmem:[%s6724_s1 + $0x8] sm:$0xff]  ;;  %v4866_v28 = vld [vmem:[%s6724_s1] sm:$0xff]  ;;  %v4773_v33 = vld [vmem:[%s6726_s0 + $0x14] sm:$0xf0] }
   0xa   :  { %1005 = vmatpush.bf16.msra.mxu0 %v4871_v8  ;;  %v4875_v25 = vld [vmem:[%s6724_s1 + $0x48] sm:$0xff]  ;;  %v4874_v29 = vld [vmem:[%s6724_s1 + $0x40] sm:$0xff]  ;;  %v4089_v35 = vld [vmem:[%s6726_s0 + $0x18] sm:$0xf0] }
   0xb   :  { %1094 = vmatpush.bf16.msra.mxu1 %v4879_v9  ;;  %v4883_v26 = vld [vmem:[%s6724_s1 + $0x88] sm:$0xff]  ;;  %v4882_v30 = vld [vmem:[%s6724_s1 + $0x80] sm:$0xff]  ;;  %v4905_v40 = vld [vmem:[%s6724_s1 + $0x138] sm:$0xff] }
   0xc   :  { %1183 = vmatpush.bf16.msra.mxu2 %v4887_v10  ;;  %v4891_v27 = vld [vmem:[%s6724_s1 + $0xc8] sm:$0xff]  ;;  %v4890_v31 = vld [vmem:[%s6724_s1 + $0xc0] sm:$0xff]  ;;  %v4913_v41 = vld [vmem:[%s6724_s1 + $0x178] sm:$0xff] }
   0xd   :  { %1272 = vmatpush.bf16.msra.mxu3 %v4895_v11  ;;  %v4087_v32 = vld [vmem:[%s6726_s0] sm:$0xf]  ;;  %v4770_v34 = vld [vmem:[%s6726_s0 + $0x4] sm:$0xf]  ;;  %v4095_v36 = vld [vmem:[%s6726_s0 + $0x8] sm:$0xf] }
   0xe   :  { %1006 = vmatpush.bf16.msra.mxu0 %v4870_v12  ;;  %v4774_v37 = vld [vmem:[%s6726_s0 + $0x1c] sm:$0xf0]  ;;  %v4771_v38 = vld [vmem:[%s6726_s0 + $0xc] sm:$0xf]  ;;  %v4097_v39 = vld [vmem:[%s6726_s0 + $0x20] sm:$0xf0]  ;;  %v4088_v42 = vor.u32 %v4773_v33, %v4087_v32  ;;  %v4092_v43 = vor.u32 %v4770_v34, %v4089_v35 }
   0xf   :  { %1095 = vmatpush.bf16.msra.mxu1 %v4878_v13  ;;  %v4096_v44 = vor.u32 %v4774_v37, %v4095_v36  ;;  %v4100_v45 = vor.u32 %v4771_v38, %v4097_v39  ;;  %v4904_v46 = vld [vmem:[%s6724_s1 + $0x130] sm:$0xff]  ;;  %v4779_v49 = vld [vmem:[%s6726_s0 + $0x44] sm:$0xf0]  ;;  %v4113_v51 = vld [vmem:[%s6726_s0 + $0x48] sm:$0xf0] }
  0x10   :  { %1184 = vmatpush.bf16.msra.mxu2 %v4886_v14  ;;  %v4912_v47 = vld [vmem:[%s6724_s1 + $0x170] sm:$0xff]  ;;  %v4119_v52 = vld [vmem:[%s6726_s0 + $0x38] sm:$0xf]  ;;  %v4777_v54 = vld [vmem:[%s6726_s0 + $0x3c] sm:$0xf] }
  0x11   :  { %1273 = vmatpush.bf16.msra.mxu3 %v4894_v15  ;;  %v4111_v48 = vld [vmem:[%s6726_s0 + $0x30] sm:$0xf]  ;;  %v4776_v50 = vld [vmem:[%s6726_s0 + $0x34] sm:$0xf]  ;;  %v4135_v60 = vld [vmem:[%s6726_s0 + $0x60] sm:$0xf] }
  0x12   :  { %1007 = vmatpush.bf16.msra.mxu0 %v4869_v16  ;;  %v4780_v53 = vld [vmem:[%s6726_s0 + $0x4c] sm:$0xf0]  ;;  %v4121_v55 = vld [vmem:[%s6726_s0 + $0x50] sm:$0xf0]  ;;  %v4112_v56 = vor.u32 %v4779_v49, %v4111_v48  ;;  %v4116_v57 = vor.u32 %v4776_v50, %v4113_v51  ;;  %v4785_v61 = vld [vmem:[%s6726_s0 + $0x74] sm:$0xf0] }
  0x13   :  { %1096 = vmatpush.bf16.msra.mxu1 %v4877_v17  ;;  %v4120_v58 = vor.u32 %v4780_v53, %v4119_v52  ;;  %v4124_v59 = vor.u32 %v4777_v54, %v4121_v55  ;;  %v4782_v62 = vld [vmem:[%s6726_s0 + $0x64] sm:$0xf]  ;;  %v4137_v63 = vld [vmem:[%s6726_s0 + $0x78] sm:$0xf0]  ;;  %v4143_v0 = vld [vmem:[%s6726_s0 + $0x68] sm:$0xf]  ;;  %v4136_v4 = vor.u32 %v4785_v61, %v4135_v60 }
  0x14   :  { %1185 = vmatpush.bf16.msra.mxu2 %v4885_v18  ;;  %v4786_v1 = vld [vmem:[%s6726_s0 + $0x7c] sm:$0xf0]  ;;  %v4783_v2 = vld [vmem:[%s6726_s0 + $0x6c] sm:$0xf]  ;;  %v4145_v3 = vld [vmem:[%s6726_s0 + $0x80] sm:$0xf0]  ;;  %v4140_v5 = vor.u32 %v4782_v62, %v4137_v63 }
  0x15   :  { %1274 = vmatpush.bf16.msra.mxu3 %v4893_v19  ;;  %v4144_v6 = vor.u32 %v4786_v1, %v4143_v0  ;;  %v4148_v7 = vor.u32 %v4783_v2, %v4145_v3  ;;  %v4903_v8 = vld [vmem:[%s6724_s1 + $0x128] sm:$0xff]  ;;  %v5384_v9 = vld [vmem:[%s6727_s5 + $0x18] sm:$0xff]  ;;  %v4159_v11 = vld [vmem:[%s6726_s0 + $0x90] sm:$0xf] }
  0x16   :  { %1008 = vmatpush.bf16.msra.mxu0 %v4868_v20  ;;  %v4911_v10 = vld [vmem:[%s6724_s1 + $0x168] sm:$0xff]  ;;  %v4788_v13 = vld [vmem:[%s6726_s0 + $0x94] sm:$0xf]  ;;  %v4167_v15 = vld [vmem:[%s6726_s0 + $0x98] sm:$0xf] }
  0x17   :  { %1097 = vmatpush.bf16.msra.mxu1 %v4876_v21  ;;  %v4791_v12 = vld [vmem:[%s6726_s0 + $0xa4] sm:$0xf0]  ;;  %v4161_v14 = vld [vmem:[%s6726_s0 + $0xa8] sm:$0xf0]  ;;  %v4792_v16 = vld [vmem:[%s6726_s0 + $0xac] sm:$0xf0] }
  0x18   :  { %1186 = vmatpush.bf16.msra.mxu2 %v4884_v22  ;;  %v4789_v17 = vld [vmem:[%s6726_s0 + $0x9c] sm:$0xf]  ;;  %v4169_v18 = vld [vmem:[%s6726_s0 + $0xb0] sm:$0xf0]  ;;  %v4160_v19 = vor.u32 %v4791_v12, %v4159_v11  ;;  %v4164_v20 = vor.u32 %v4788_v13, %v4161_v14  ;;  %v4168_v21 = vor.u32 %v4792_v16, %v4167_v15  ;;  %v4902_v35 = vld [vmem:[%s6724_s1 + $0x120] sm:$0xff] }
  0x19   :  { %1275 = vmatpush.bf16.msra.mxu3 %v4892_v23  ;;  %v4172_v22 = vor.u32 %v4789_v17, %v4169_v18  ;;  %v4183_v23 = vld [vmem:[%s6726_s0 + $0xc0] sm:$0xf]  ;;  %v4207_v37 = vld [vmem:[%s6726_s0 + $0xf0] sm:$0xf]  ;;  %v4803_v38 = vld [vmem:[%s6726_s0 + $0x104] sm:$0xf0] }
  0x1a   :  { %1009 = vmatpush.bf16.msra.mxu0 %v4867_v24  ;;  %v4797_v24 = vld [vmem:[%s6726_s0 + $0xd4] sm:$0xf0]  ;;  %v4910_v36 = vld [vmem:[%s6724_s1 + $0x160] sm:$0xff]  ;;  %v4800_v39 = vld [vmem:[%s6726_s0 + $0xf4] sm:$0xf] }
  0x1b   :  { %1098 = vmatpush.bf16.msra.mxu1 %v4875_v25  ;;  %v4794_v25 = vld [vmem:[%s6726_s0 + $0xc4] sm:$0xf]  ;;  %v4231_v49 = vld [vmem:[%s6726_s0 + $0x120] sm:$0xf]  ;;  %v4809_v50 = vld [vmem:[%s6726_s0 + $0x134] sm:$0xf0] }
  0x1c   :  { %1187 = vmatpush.bf16.msra.mxu2 %v4883_v26  ;;  %v4185_v26 = vld [vmem:[%s6726_s0 + $0xd8] sm:$0xf0]  ;;  %v4806_v51 = vld [vmem:[%s6726_s0 + $0x124] sm:$0xf]  ;;  %v4239_v53 = vld [vmem:[%s6726_s0 + $0x128] sm:$0xf] }
  0x1d   :  { %1276 = vmatpush.bf16.msra.mxu3 %v4891_v27  ;;  %v4191_v27 = vld [vmem:[%s6726_s0 + $0xc8] sm:$0xf]  ;;  %v4188_v32 = vor.u32 %v4794_v25, %v4185_v26  ;;  %v4233_v52 = vld [vmem:[%s6726_s0 + $0x138] sm:$0xf0]  ;;  %v4810_v54 = vld [vmem:[%s6726_s0 + $0x13c] sm:$0xf0] }
  0x1e   :  { %1010 = vmatpush.bf16.msra.mxu0 %v4866_v28  ;;  %v4798_v28 = vld [vmem:[%s6726_s0 + $0xdc] sm:$0xf0]  ;;  %v4807_v55 = vld [vmem:[%s6726_s0 + $0x12c] sm:$0xf]  ;;  %v4901_v61 = vld [vmem:[%s6724_s1 + $0x118] sm:$0xff] }
  0x1f   :  { %1099 = vmatpush.bf16.msra.mxu1 %v4874_v29  ;;  %v4795_v29 = vld [vmem:[%s6726_s0 + $0xcc] sm:$0xf]  ;;  %v4192_v33 = vor.u32 %v4798_v28, %v4191_v27  ;;  %v5498_v62 = vld [vmem:[%s6727_s5 + $0x10] sm:$0xff]  ;;  %v4909_v63 = vld [vmem:[%s6724_s1 + $0x158] sm:$0xff] }
  0x20   :  { %1188 = vmatpush.bf16.msra.mxu2 %v4882_v30  ;;  %v4193_v30 = vld [vmem:[%s6726_s0 + $0xe0] sm:$0xf0]  ;;  %v4255_v0 = vld [vmem:[%s6726_s0 + $0x150] sm:$0xf]  ;;  %v4815_v1 = vld [vmem:[%s6726_s0 + $0x164] sm:$0xf0] }
  0x21   :  { %1277 = vmatpush.bf16.msra.mxu3 %v4890_v31  ;;  %1011 = vmatmul.bf16.vlgmr.msra.gmra.mxu0 %v4088_v42  ;;  %v4184_v31 = vor.u32 %v4797_v24, %v4183_v23  ;;  %v4196_v34 = vor.u32 %v4795_v29, %v4193_v30  ;;  %v4804_v42 = vld [vmem:[%s6726_s0 + $0x10c] sm:$0xf0]  ;;  %v4812_v2 = vld [vmem:[%s6726_s0 + $0x154] sm:$0xf]  ;;  %v4257_v3 = vld [vmem:[%s6726_s0 + $0x168] sm:$0xf0] }
  0x22   :  { %1359 = vmatpush.bf16.msrb.mxu0 %v4905_v40  ;;  %1100 = vmatmul.bf16.vlgmr.msra.gmra.mxu1 %v4092_v43  ;;  %v4209_v40 = vld [vmem:[%s6726_s0 + $0x108] sm:$0xf0]  ;;  %v4801_v43 = vld [vmem:[%s6726_s0 + $0xfc] sm:$0xf]  ;;  %v4914_v13 = vld [vmem:[%s6728_s3] sm:$0xff]  ;;  %s5135_s3 = smov 64  }
  0x23   :  { %1448 = vmatpush.bf16.msrb.mxu1 %v4913_v41  ;;  %1189 = vmatmul.bf16.vlgmr.msra.gmra.mxu2 %v4096_v44  ;;  %v4215_v41 = vld [vmem:[%s6726_s0 + $0xf8] sm:$0xf]  ;;  %v4217_v44 = vld [vmem:[%s6726_s0 + $0x110] sm:$0xf0]  ;;  %v5534_v14 = vld [vmem:[%s6725_s2] ss:$0 sm:$0xff] }
  0x24   :  { %1278 = vmatmul.bf16.vlgmr.msra.gmra.mxu3 %v4100_v45  ;;  %v4208_v45 = vor.u32 %v4803_v38, %v4207_v37  ;;  %v4220_v48 = vor.u32 %v4801_v43, %v4217_v44  ;;  %1653 = vmatpush.bf16.msrb.mxu2 %v4914_v13  ;;  %v4279_v15 = vld [vmem:[%s6726_s0 + $0x180] sm:$0xf]  ;;  %v4821_v16 = vld [vmem:[%s6726_s0 + $0x194] sm:$0xf0]  ;;  %v4818_v17 = vld [vmem:[%s6726_s0 + $0x184] sm:$0xf] }
  0x25   :  { %1790 = vmatpush.msrb.mxu3 %v5384_v9  ;;  %v4281_v18 = vld [vmem:[%s6726_s0 + $0x198] sm:$0xf0]  ;;  %v4280_v23 = vor.u32 %v4821_v16, %v4279_v15  ;;  %v4824_v43 = vld [vmem:[%s6726_s0 + $0x1b4] sm:$0xf]  ;;  %v4305_v44 = vld [vmem:[%s6726_s0 + $0x1c8] sm:$0xf0] }
  0x26   :  { %1360 = vmatpush.bf16.msrb.mxu0 %v4904_v46  ;;  %v4212_v46 = vor.u32 %v4800_v39, %v4209_v40  ;;  %v4284_v24 = vor.u32 %v4818_v17, %v4281_v18  ;;  %v4831_v13 = vld [vmem:[%s6726_s0 + $0x1ec] sm:$0xf]  ;;  %v4337_v15 = vld [vmem:[%s6726_s0 + $0x200] sm:$0xf0] }
  0x27   :  { %1449 = vmatpush.bf16.msrb.mxu1 %v4912_v47  ;;  %v4216_v47 = vor.u32 %v4804_v42, %v4215_v41  ;;  %1791 = vmatpush.msrb.mxu3 %v5498_v62  ;;  %v4303_v41 = vld [vmem:[%s6726_s0 + $0x1b0] sm:$0xf]  ;;  %v4827_v42 = vld [vmem:[%s6726_s0 + $0x1c4] sm:$0xf0] }
  0x2a   :  { %1361 = vmatpush.bf16.msrb.mxu0 %v4903_v8  ;;  %v4256_v8 = vor.u32 %v4815_v1, %v4255_v0 }
  0x2b   :  { %1450 = vmatpush.bf16.msrb.mxu1 %v4911_v10  ;;  %v4260_v10 = vor.u32 %v4812_v2, %v4257_v3 }
  0x2e   :  { %1362 = vmatpush.bf16.msrb.mxu0 %v4902_v35 }
  0x2f   :  { %1451 = vmatpush.bf16.msrb.mxu1 %v4910_v36 }
  0x31   :  { %1016 = vmatmul.bf16.gmra.mxu0 %v4112_v56  ;;  %v4241_v56 = vld [vmem:[%s6726_s0 + $0x140] sm:$0xf0] }
  0x32   :  { %1105 = vmatmul.bf16.gmra.mxu1 %v4116_v57  ;;  %v4232_v57 = vor.u32 %v4809_v50, %v4231_v49  ;;  %v4244_v60 = vor.u32 %v4807_v55, %v4241_v56  ;;  %1363 = vmatpush.bf16.msrb.mxu0 %v4901_v61 }
  0x33   :  { %1194 = vmatmul.bf16.gmra.mxu2 %v4120_v58  ;;  %v4236_v58 = vor.u32 %v4806_v51, %v4233_v52  ;;  %1452 = vmatpush.bf16.msrb.mxu1 %v4909_v63  ;;  %v4304_v51 = vor.u32 %v4827_v42, %v4303_v41  ;;  %v4308_v52 = vor.u32 %v4824_v43, %v4305_v44  ;;  %v4839_v41 = vld [vmem:[%s6726_s0 + $0x224] sm:$0xf0]  ;;  %v4836_v42 = vld [vmem:[%s6726_s0 + $0x214] sm:$0xf]  ;;  %v4353_v43 = vld [vmem:[%s6726_s0 + $0x228] sm:$0xf0] }
  0x34   :  { %1283 = vmatmul.bf16.gmra.mxu3 %v4124_v59  ;;  %v4240_v59 = vor.u32 %v4810_v54, %v4239_v53  ;;  %v4359_v44 = vld [vmem:[%s6726_s0 + $0x218] sm:$0xf] }
  0x41   :  { %1021 = vmatmul.bf16.gmra.mxu0 %v4136_v4  ;;  %v4263_v4 = vld [vmem:[%s6726_s0 + $0x158] sm:$0xf] }
  0x42   :  { %1110 = vmatmul.bf16.gmra.mxu1 %v4140_v5  ;;  %v4816_v5 = vld [vmem:[%s6726_s0 + $0x16c] sm:$0xf0] }
  0x43   :  { %1199 = vmatmul.bf16.gmra.mxu2 %v4144_v6  ;;  %v4813_v6 = vld [vmem:[%s6726_s0 + $0x15c] sm:$0xf]  ;;  %v4264_v11 = vor.u32 %v4816_v5, %v4263_v4 }
  0x44   :  { %1288 = vmatmul.bf16.gmra.mxu3 %v4148_v7  ;;  %v4265_v7 = vld [vmem:[%s6726_s0 + $0x170] sm:$0xf0] }
  0x45   :  { %v4268_v12 = vor.u32 %v4813_v6, %v4265_v7  ;;  %v4327_v6 = vld [vmem:[%s6726_s0 + $0x1e0] sm:$0xf]  ;;  %v4833_v7 = vld [vmem:[%s6726_s0 + $0x1f4] sm:$0xf0] }
  0x46   :  { %v4328_v18 = vor.u32 %v4833_v7, %v4327_v6  ;;  %v4375_v7 = vld [vmem:[%s6726_s0 + $0x240] sm:$0xf] }
  0x51   :  { %1026 = vmatmul.bf16.gmra.mxu0 %v4160_v19  ;;  %v4287_v19 = vld [vmem:[%s6726_s0 + $0x188] sm:$0xf] }
  0x52   :  { %1115 = vmatmul.bf16.gmra.mxu1 %v4164_v20  ;;  %v4822_v20 = vld [vmem:[%s6726_s0 + $0x19c] sm:$0xf0] }
  0x53   :  { %1204 = vmatmul.bf16.gmra.mxu2 %v4168_v21  ;;  %v4819_v21 = vld [vmem:[%s6726_s0 + $0x18c] sm:$0xf]  ;;  %v4288_v27 = vor.u32 %v4822_v20, %v4287_v19 }
  0x54   :  { %1293 = vmatmul.bf16.gmra.mxu3 %v4172_v22  ;;  %v4289_v22 = vld [vmem:[%s6726_s0 + $0x1a0] sm:$0xf0] }
  0x55   :  { %v4292_v28 = vor.u32 %v4819_v21, %v4289_v22 }
  0x61   :  { %1031 = vmatmul.bf16.gmra.mxu0 %v4184_v31  ;;  %v4900_v31 = vld [vmem:[%s6724_s1 + $0x110] sm:$0xff] }
  0x62   :  { %1120 = vmatmul.bf16.gmra.mxu1 %v4188_v32  ;;  %v4908_v32 = vld [vmem:[%s6724_s1 + $0x150] sm:$0xff]  ;;  %1364 = vmatpush.bf16.msrb.mxu0 %v4900_v31 }
  0x63   :  { %1209 = vmatmul.bf16.gmra.mxu2 %v4192_v33  ;;  %1453 = vmatpush.bf16.msrb.mxu1 %v4908_v32 }
  0x64   :  { %1298 = vmatmul.bf16.gmra.mxu3 %v4196_v34 }
  0x71   :  { %1036 = vmatmul.bf16.gmra.mxu0 %v4208_v45  ;;  %v4311_v45 = vld [vmem:[%s6726_s0 + $0x1b8] sm:$0xf] }
  0x72   :  { %1125 = vmatmul.bf16.gmra.mxu1 %v4212_v46  ;;  %v4828_v46 = vld [vmem:[%s6726_s0 + $0x1cc] sm:$0xf0] }
  0x73   :  { %1214 = vmatmul.bf16.gmra.mxu2 %v4216_v47  ;;  %v4825_v47 = vld [vmem:[%s6726_s0 + $0x1bc] sm:$0xf]  ;;  %v4312_v56 = vor.u32 %v4828_v46, %v4311_v45  ;;  %v4840_v45 = vld [vmem:[%s6726_s0 + $0x22c] sm:$0xf0] }
  0x74   :  { %1303 = vmatmul.bf16.gmra.mxu3 %v4220_v48  ;;  %v4313_v48 = vld [vmem:[%s6726_s0 + $0x1d0] sm:$0xf0]  ;;  %v4837_v46 = vld [vmem:[%s6726_s0 + $0x21c] sm:$0xf] }
  0x81   :  { %1041 = vmatmul.bf16.gmra.mxu0 %v4232_v57  ;;  %v4316_v57 = vor.u32 %v4825_v47, %v4313_v48  ;;  %v4361_v47 = vld [vmem:[%s6726_s0 + $0x230] sm:$0xf0] }
  0x82   :  { %1130 = vmatmul.bf16.gmra.mxu1 %v4236_v58 }
  0x83   :  { %1219 = vmatmul.bf16.gmra.mxu2 %v4240_v59 }
  0x84   :  { %1308 = vmatmul.bf16.gmra.mxu3 %v4244_v60 }
  0x91   :  { %1046 = vmatmul.bf16.gmra.mxu0 %v4256_v8  ;;  %v4830_v8 = vld [vmem:[%s6726_s0 + $0x1e4] sm:$0xf] }
  0x92   :  { %1135 = vmatmul.bf16.gmra.mxu1 %v4260_v10  ;;  %v4329_v10 = vld [vmem:[%s6726_s0 + $0x1f8] sm:$0xf0] }
  0x93   :  { %1224 = vmatmul.bf16.gmra.mxu2 %v4264_v11  ;;  %v4335_v11 = vld [vmem:[%s6726_s0 + $0x1e8] sm:$0xf]  ;;  %v4332_v19 = vor.u32 %v4830_v8, %v4329_v10  ;;  %v4845_v8 = vld [vmem:[%s6726_s0 + $0x254] sm:$0xf0]  ;;  %v4842_v10 = vld [vmem:[%s6726_s0 + $0x244] sm:$0xf] }
  0x94   :  { %1313 = vmatmul.bf16.gmra.mxu3 %v4268_v12  ;;  %v4834_v12 = vld [vmem:[%s6726_s0 + $0x1fc] sm:$0xf0] }
  0x9e   :  { %v1012_v25 = vpop.f32.mrf.mxu0 }
  0x9f   :  { %v1101_v26 = vpop.f32.mrf.mxu1  ;;  %v1013_v29 = vadd.f32 %v5534_v14, %v1012_v25 }
  0xa1   :  { %v1102_v30 = vadd.f32 %v1101_v26, %v1013_v29  ;;  %1051 = vmatmul.bf16.gmra.mxu0 %v4280_v23  ;;  %v4336_v23 = vor.u32 %v4834_v12, %v4335_v11  ;;  %v5633_v29 = vld [vmem:[%s6727_s5 + $0x8] sm:$0xff]  ;;  %v4377_v11 = vld [vmem:[%s6726_s0 + $0x258] sm:$0xf0] }
  0xa2   :  { %1140 = vmatmul.bf16.gmra.mxu1 %v4284_v24  ;;  %v4340_v24 = vor.u32 %v4831_v13, %v4337_v15  ;;  %1792 = vmatpush.msrb.mxu3 %v5633_v29  ;;  %v4383_v12 = vld [vmem:[%s6726_s0 + $0x248] sm:$0xf]  ;;  %v4846_v13 = vld [vmem:[%s6726_s0 + $0x25c] sm:$0xf0]  ;;  %v4843_v15 = vld [vmem:[%s6726_s0 + $0x24c] sm:$0xf] }
  0xa3   :  { %1229 = vmatmul.bf16.gmra.mxu2 %v4288_v27 }
  0xa4   :  { %1318 = vmatmul.bf16.gmra.mxu3 %v4292_v28  ;;  %v4899_v28 = vld [vmem:[%s6724_s1 + $0x108] sm:$0xff] }
  0xa5   :  { %1365 = vmatpush.bf16.msrb.mxu0 %v4899_v28 }
  0xa6   :  { %v1190_v33 = vpop.f32.mrf.mxu2  ;;  %v1014_v36 = vpop.f32.mrf.mxu0 }
  0xa7   :  { %v1279_v34 = vpop.f32.mrf.mxu3  ;;  %v1191_v35 = vadd.f32 %v1190_v33, %v1102_v30  ;;  %v1103_v37 = vpop.f32.mrf.mxu1  ;;  %v1015_v38 = vadd.f32 %v5534_v14, %v1014_v36  ;;  %v4907_v30 = vld [vmem:[%s6724_s1 + $0x148] sm:$0xff] }
  0xa8   :  { %1454 = vmatpush.bf16.msrb.mxu1 %v4907_v30 }
  0xa9   :  { %v5568_v39 = vadd.f32 %v1279_v34, %v1191_v35  ;;  %v1104_v40 = vadd.f32 %v1103_v37, %v1015_v38 }
  0xae   :  { %v1192_v49 = vpop.f32.mrf.mxu2  ;;  %v1017_v54 = vpop.f32.mrf.mxu0 }
  0xaf   :  { %v1281_v50 = vpop.f32.mrf.mxu3  ;;  %v1193_v53 = vadd.f32 %v1192_v49, %v1104_v40  ;;  %v1106_v55 = vpop.f32.mrf.mxu1  ;;  %v1018_v58 = vadd.f32 %v5534_v14, %v1017_v54  ;;  %v4351_v40 = vld [vmem:[%s6726_s0 + $0x210] sm:$0xf] }
  0xb1   :  { %v5595_v59 = vadd.f32 %v1281_v50, %v1193_v53  ;;  %v1107_v60 = vadd.f32 %v1106_v55, %v1018_v58  ;;  %1056 = vmatmul.bf16.gmra.mxu0 %v4304_v51  ;;  %v4352_v50 = vor.u32 %v4839_v41, %v4351_v40  ;;  %v4356_v51 = vor.u32 %v4836_v42, %v4353_v43  ;;  %v4399_v42 = vld [vmem:[%s6726_s0 + $0x270] sm:$0xf]  ;;  %v4851_v43 = vld [vmem:[%s6726_s0 + $0x284] sm:$0xf0] }
  0xb2   :  { %1145 = vmatmul.bf16.gmra.mxu1 %v4308_v52  ;;  %v4360_v55 = vor.u32 %v4840_v45, %v4359_v44  ;;  %v4848_v44 = vld [vmem:[%s6726_s0 + $0x274] sm:$0xf]  ;;  %v4401_v45 = vld [vmem:[%s6726_s0 + $0x288] sm:$0xf0] }
  0xb3   :  { %1234 = vmatmul.bf16.gmra.mxu2 %v4312_v56  ;;  %v4364_v56 = vor.u32 %v4837_v46, %v4361_v47  ;;  %v4407_v46 = vld [vmem:[%s6726_s0 + $0x278] sm:$0xf]  ;;  %v4852_v47 = vld [vmem:[%s6726_s0 + $0x28c] sm:$0xf0] }
  0xb4   :  { %1323 = vmatmul.bf16.gmra.mxu3 %v4316_v57 }
  0xb6   :  { %v1195_v61 = vpop.f32.mrf.mxu2  ;;  %v1019_v1 = vpop.f32.mrf.mxu0 }
  0xb7   :  { %v1284_v63 = vpop.f32.mrf.mxu3  ;;  %v1196_v0 = vadd.f32 %v1195_v61, %v1107_v60  ;;  %v1108_v2 = vpop.f32.mrf.mxu1  ;;  %v1020_v3 = vadd.f32 %v5534_v14, %v1019_v1 }
  0xb9   :  { %v5598_v4 = vadd.f32 %v1284_v63, %v1196_v0  ;;  %v1109_v5 = vadd.f32 %v1108_v2, %v1020_v3 }
  0xbe   :  { %v1197_v16 = vpop.f32.mrf.mxu2  ;;  %v1022_v21 = vpop.f32.mrf.mxu0 }
  0xbf   :  { %v1286_v17 = vpop.f32.mrf.mxu3  ;;  %v1198_v20 = vadd.f32 %v1197_v16, %v1109_v5  ;;  %v1111_v22 = vpop.f32.mrf.mxu1  ;;  %v1023_v25 = vadd.f32 %v5534_v14, %v1022_v21  ;;  %v4385_v16 = vld [vmem:[%s6726_s0 + $0x260] sm:$0xf0] }
  0xc1   :  { %v5625_v26 = vadd.f32 %v1286_v17, %v1198_v20  ;;  %v1112_v27 = vadd.f32 %v1111_v22, %v1023_v25  ;;  %1061 = vmatmul.bf16.gmra.mxu0 %v4328_v18  ;;  %v4380_v20 = vor.u32 %v4842_v10, %v4377_v11  ;;  %v4388_v25 = vor.u32 %v4843_v15, %v4385_v16  ;;  %v4857_v10 = vld [vmem:[%s6726_s0 + $0x2b4] sm:$0xf0]  ;;  %v4854_v11 = vld [vmem:[%s6726_s0 + $0x2a4] sm:$0xf]  ;;  %v4858_v15 = vld [vmem:[%s6726_s0 + $0x2bc] sm:$0xf0] }
  0xc2   :  { %1150 = vmatmul.bf16.gmra.mxu1 %v4332_v19  ;;  %v4376_v19 = vor.u32 %v4845_v8, %v4375_v7  ;;  %v4423_v8 = vld [vmem:[%s6726_s0 + $0x2a0] sm:$0xf]  ;;  %v4855_v16 = vld [vmem:[%s6726_s0 + $0x2ac] sm:$0xf] }
  0xc3   :  { %1239 = vmatmul.bf16.gmra.mxu2 %v4336_v23 }
  0xc4   :  { %1328 = vmatmul.bf16.gmra.mxu3 %v4340_v24  ;;  %v4384_v24 = vor.u32 %v4846_v13, %v4383_v12  ;;  %v4425_v12 = vld [vmem:[%s6726_s0 + $0x2b8] sm:$0xf0]  ;;  %v4431_v13 = vld [vmem:[%s6726_s0 + $0x2a8] sm:$0xf] }
  0xc6   :  { %v1200_v31 = vpop.f32.mrf.mxu2  ;;  %v1024_v34 = vpop.f32.mrf.mxu0 }
  0xc7   :  { %v1289_v32 = vpop.f32.mrf.mxu3  ;;  %v1201_v33 = vadd.f32 %v1200_v31, %v1112_v27  ;;  %v1113_v35 = vpop.f32.mrf.mxu1  ;;  %v1025_v36 = vadd.f32 %v5534_v14, %v1024_v34  ;;  %v4898_v31 = vld [vmem:[%s6724_s1 + $0x100] sm:$0xff] }
  0xc8   :  { %1366 = vmatpush.bf16.msrb.mxu0 %v4898_v31  ;;  %v5780_v31 = vld [vmem:[%s6727_s5] sm:$0xff] }
  0xc9   :  { %v5640_v37 = vadd.f32 %v1289_v32, %v1201_v33  ;;  %v1114_v38 = vadd.f32 %v1113_v35, %v1025_v36  ;;  %v4906_v32 = vld [vmem:[%s6724_s1 + $0x140] sm:$0xff]  ;;  %1793 = vmatpush.msrb.mxu3 %v5780_v31 }
  0xca   :  { %1455 = vmatpush.bf16.msrb.mxu1 %v4906_v32 }
  0xcb   :  { %1864 = vmatpush.msra.mxu3 %v5384_v9 }
  0xcd   :  { %1865 = vmatpush.msra.mxu3 %v5498_v62 }
  0xce   :  { %v1202_v48 = vpop.f32.mrf.mxu2  ;;  %v1027_v53 = vpop.f32.mrf.mxu0 }
  0xcf   :  { %v1291_v49 = vpop.f32.mrf.mxu3  ;;  %v1203_v52 = vadd.f32 %v1202_v48, %v1114_v38  ;;  %v1116_v54 = vpop.f32.mrf.mxu1  ;;  %v1028_v57 = vadd.f32 %v5534_v14, %v1027_v53  ;;  %v4849_v48 = vld [vmem:[%s6726_s0 + $0x27c] sm:$0xf]  ;;  %v4404_v53 = vor.u32 %v4848_v44, %v4401_v45  ;;  %1866 = vmatpush.msra.mxu3 %v5633_v29  ;;  %v4447_v44 = vld [vmem:[%s6726_s0 + $0x2d0] sm:$0xf]  ;;  %v4863_v45 = vld [vmem:[%s6726_s0 + $0x2e4] sm:$0xf0] }
  0xd1   :  { %v5667_v58 = vadd.f32 %v1291_v49, %v1203_v52  ;;  %v1117_v60 = vadd.f32 %v1116_v54, %v1028_v57  ;;  %1066 = vmatmul.bf16.gmra.mxu0 %v4352_v50  ;;  %v4409_v49 = vld [vmem:[%s6726_s0 + $0x290] sm:$0xf0]  ;;  %v4400_v52 = vor.u32 %v4851_v43, %v4399_v42  ;;  %1867 = vmatpush.msra.mxu3 %v5780_v31 }
  0xd2   :  { %1155 = vmatmul.bf16.gmra.mxu1 %v4356_v51  ;;  %v4412_v57 = vor.u32 %v4849_v48, %v4409_v49  ;;  %v4455_v48 = vld [vmem:[%s6726_s0 + $0x2d8] sm:$0xf]  ;;  %v4864_v49 = vld [vmem:[%s6726_s0 + $0x2ec] sm:$0xf0] }
  0xd3   :  { %1244 = vmatmul.bf16.gmra.mxu2 %v4360_v55 }
  0xd4   :  { %1333 = vmatmul.bf16.gmra.mxu3 %v4364_v56  ;;  %v4408_v56 = vor.u32 %v4852_v47, %v4407_v46  ;;  %v4860_v46 = vld [vmem:[%s6726_s0 + $0x2d4] sm:$0xf]  ;;  %v4449_v47 = vld [vmem:[%s6726_s0 + $0x2e8] sm:$0xf0] }
  0xd6   :  { %v1205_v61 = vpop.f32.mrf.mxu2  ;;  %v1029_v1 = vpop.f32.mrf.mxu0 }
  0xd7   :  { %v1294_v63 = vpop.f32.mrf.mxu3  ;;  %v1206_v0 = vadd.f32 %v1205_v61, %v1117_v60  ;;  %v1118_v2 = vpop.f32.mrf.mxu1  ;;  %v1030_v3 = vadd.f32 %v5534_v14, %v1029_v1 }
  0xd9   :  { %v5670_v5 = vadd.f32 %v1294_v63, %v1206_v0  ;;  %v1119_v6 = vadd.f32 %v1118_v2, %v1030_v3 }
  0xde   :  { %v1207_v17 = vpop.f32.mrf.mxu2  ;;  %v1032_v22 = vpop.f32.mrf.mxu0 }
  0xdf   :  { %v1296_v18 = vpop.f32.mrf.mxu3  ;;  %v1208_v21 = vadd.f32 %v1207_v17, %v1119_v6  ;;  %v1121_v23 = vpop.f32.mrf.mxu1  ;;  %v1033_v27 = vadd.f32 %v5534_v14, %v1032_v22  ;;  %v4433_v17 = vld [vmem:[%s6726_s0 + $0x2c0] sm:$0xf0] }
  0xe1   :  { %v5697_v28 = vadd.f32 %v1296_v18, %v1208_v21  ;;  %v1122_v30 = vadd.f32 %v1121_v23, %v1033_v27  ;;  %1071 = vmatmul.bf16.gmra.mxu0 %v4376_v19  ;;  %v4428_v21 = vor.u32 %v4854_v11, %v4425_v12 }
  0xe2   :  { %1160 = vmatmul.bf16.gmra.mxu1 %v4380_v20  ;;  %v4424_v20 = vor.u32 %v4857_v10, %v4423_v8 }
  0xe3   :  { %1249 = vmatmul.bf16.gmra.mxu2 %v4384_v24  ;;  %v4432_v24 = vor.u32 %v4858_v15, %v4431_v13 }
  0xe4   :  { %1338 = vmatmul.bf16.gmra.mxu3 %v4388_v25  ;;  %v4436_v25 = vor.u32 %v4855_v16, %v4433_v17  ;;  %v4103_v17 = vld [vmem:[%s6726_s0 + $0x10] sm:$0xf] }
  0xe6   :  { %v1210_v33 = vpop.f32.mrf.mxu2  ;;  %v1034_v36 = vpop.f32.mrf.mxu0 }
  0xe7   :  { %v5705_v34 = vpop.f32.mrf.mxu3  ;;  %v5707_v35 = vadd.f32 %v1210_v33, %v1122_v30  ;;  %v1123_v38 = vpop.f32.mrf.mxu1  ;;  %v1035_v40 = vadd.f32 %v5534_v14, %v1034_v36 }
  0xe9   :  { %v5710_v41 = vadd.f32 %v1123_v38, %v1035_v40 }
  0xee   :  { %v5736_v50 = vpop.f32.mrf.mxu2  ;;  %v1037_v54 = vpop.f32.mrf.mxu0 }
  0xef   :  { %v5738_v51 = vpop.f32.mrf.mxu3  ;;  %v1126_v55 = vpop.f32.mrf.mxu1  ;;  %v1038_v60 = vadd.f32 %v5534_v14, %v1037_v54 }
  0xf1   :  { %v1127_v61 = vadd.f32 %v1126_v55, %v1038_v60  ;;  %1076 = vmatmul.bf16.gmra.mxu0 %v4400_v52  ;;  %v4861_v52 = vld [vmem:[%s6726_s0 + $0x2dc] sm:$0xf] }
  0xf2   :  { %1165 = vmatmul.bf16.gmra.mxu1 %v4404_v53  ;;  %v4457_v53 = vld [vmem:[%s6726_s0 + $0x2f0] sm:$0xf0] }
  0xf3   :  { %1254 = vmatmul.bf16.gmra.mxu2 %v4408_v56  ;;  %v4448_v56 = vor.u32 %v4863_v45, %v4447_v44 }
  0xf4   :  { %1343 = vmatmul.bf16.gmra.mxu3 %v4412_v57  ;;  %v4452_v57 = vor.u32 %v4860_v46, %v4449_v47 }
  0xf6   :  { %v1215_v63 = vpop.f32.mrf.mxu2  ;;  %v1039_v2 = vpop.f32.mrf.mxu0 }
  0xf7   :  { %v5741_v0 = vpop.f32.mrf.mxu3  ;;  %v5743_v1 = vadd.f32 %v1215_v63, %v1127_v61  ;;  %v1128_v3 = vpop.f32.mrf.mxu1  ;;  %v1040_v6 = vadd.f32 %v5534_v14, %v1039_v2  ;;  %v4456_v63 = vor.u32 %v4864_v49, %v4455_v48  ;;  %v4460_v2 = vor.u32 %v4861_v52, %v4457_v53  ;;  %v4127_v52 = vld [vmem:[%s6726_s0 + $0x40] sm:$0xf]  ;;  %v4781_v53 = vld [vmem:[%s6726_s0 + $0x54] sm:$0xf0] }
  0xf9   :  { %v5746_v7 = vadd.f32 %v1128_v3, %v1040_v6 }
  0xfe   :  { %v5772_v18 = vpop.f32.mrf.mxu2  ;;  %v1042_v22 = vpop.f32.mrf.mxu0 }
  0xff   :  { %v5774_v19 = vpop.f32.mrf.mxu3  ;;  %v1131_v23 = vpop.f32.mrf.mxu1  ;;  %v1043_v27 = vadd.f32 %v5534_v14, %v1042_v22  ;;  %v4105_v22 = vld [vmem:[%s6726_s0 + $0x28] sm:$0xf0] }
 0x101   :  { %v1132_v30 = vadd.f32 %v1131_v23, %v1043_v27  ;;  %1081 = vmatmul.bf16.gmra.mxu0 %v4424_v20  ;;  %v4775_v20 = vld [vmem:[%s6726_s0 + $0x24] sm:$0xf0] }
 0x102   :  { %1170 = vmatmul.bf16.gmra.mxu1 %v4428_v21  ;;  %v4772_v21 = vld [vmem:[%s6726_s0 + $0x14] sm:$0xf] }
 0x103   :  { %1259 = vmatmul.bf16.gmra.mxu2 %v4432_v24  ;;  %v4108_v27 = vor.u32 %v4772_v21, %v4105_v22 }
 0x104   :  { %1348 = vmatmul.bf16.gmra.mxu3 %v4436_v25  ;;  %v4104_v25 = vor.u32 %v4775_v20, %v4103_v17 }
 0x106   :  { %v1220_v32 = vpop.f32.mrf.mxu2  ;;  %v1044_v38 = vpop.f32.mrf.mxu0 }
 0x107   :  { %v5784_v33 = vpop.f32.mrf.mxu3  ;;  %v5786_v36 = vadd.f32 %v1220_v32, %v1132_v30  ;;  %v1133_v40 = vpop.f32.mrf.mxu1  ;;  %v1045_v42 = vadd.f32 %v5534_v14, %v1044_v38 }
 0x109   :  { %v5791_v43 = vadd.f32 %v1133_v40, %v1045_v42 }
 0x10e   :  { %v5818_v54 = vpop.f32.mrf.mxu2  ;;  %v1047_v60 = vpop.f32.mrf.mxu0 }
 0x10f   :  { %v5820_v55 = vpop.f32.mrf.mxu3  ;;  %v1136_v61 = vpop.f32.mrf.mxu1  ;;  %v1048_v3 = vadd.f32 %v5534_v14, %v1047_v60 }
 0x111   :  { %v1137_v6 = vadd.f32 %v1136_v61, %v1048_v3  ;;  %1086 = vmatmul.bf16.gmra.mxu0 %v4448_v56  ;;  %v4778_v56 = vld [vmem:[%s6726_s0 + $0x44] sm:$0xf]  ;;  %v4128_v61 = vor.u32 %v4781_v53, %v4127_v52 }
 0x112   :  { %1175 = vmatmul.bf16.gmra.mxu1 %v4452_v57  ;;  %v4129_v57 = vld [vmem:[%s6726_s0 + $0x58] sm:$0xf0] }
 0x113   :  { %1264 = vmatmul.bf16.gmra.mxu2 %v4456_v63  ;;  %v4132_v63 = vor.u32 %v4778_v56, %v4129_v57  ;;  %v5134_v56 = vmov 0.0  }
 0x114   :  { %1353 = vmatmul.bf16.gmra.mxu3 %v4460_v2 }
 0x116   :  { %v1225_v8 = vpop.f32.mrf.mxu2  ;;  %v1049_v12 = vpop.f32.mrf.mxu0 }
 0x117   :  { %v5823_v10 = vpop.f32.mrf.mxu3  ;;  %v5825_v11 = vadd.f32 %v1225_v8, %v1137_v6  ;;  %v1138_v13 = vpop.f32.mrf.mxu1  ;;  %v1050_v15 = vadd.f32 %v5534_v14, %v1049_v12 }
 0x119   :  { %v5828_v16 = vadd.f32 %v1138_v13, %v1050_v15 }
 0x11e   :  { %v5842_v23 = vpop.f32.mrf.mxu2  ;;  %v1052_v30 = vpop.f32.mrf.mxu0 }
 0x11f   :  { %v5844_v24 = vpop.f32.mrf.mxu3  ;;  %v1141_v32 = vpop.f32.mrf.mxu1  ;;  %v1053_v38 = vadd.f32 %v5534_v14, %v1052_v30  ;;  %v4784_v30 = vld [vmem:[%s6726_s0 + $0x74] sm:$0xf] }
 0x121   :  { %v1142_v40 = vadd.f32 %v1141_v32, %v1053_v38  ;;  %1367 = vmatmul.bf16.vlgmr.msrb.gmra.mxu0 %v4104_v25  ;;  %v4151_v25 = vld [vmem:[%s6726_s0 + $0x70] sm:$0xf]  ;;  %v4153_v32 = vld [vmem:[%s6726_s0 + $0x88] sm:$0xf0] }
 0x122   :  { %1456 = vmatmul.bf16.vlgmr.msrb.gmra.mxu1 %v4108_v27  ;;  %v4787_v27 = vld [vmem:[%s6726_s0 + $0x84] sm:$0xf0] }
 0x124   :  { %1794 = vmatmul.f32.vlgmr.msrb.gmra.mxu3 %v5134_v56 }
 0x125   :  { %1933 = vmatpush.msrb.mxu3 %v5384_v9  ;;  %v4793_v9 = vld [vmem:[%s6726_s0 + $0xb4] sm:$0xf0] }
 0x126   :  { %v1230_v42 = vpop.f32.mrf.mxu2  ;;  %v1054_v45 = vpop.f32.mrf.mxu0 }
 0x127   :  { %v5847_v44 = vadd.f32 %v1230_v42, %v1142_v40  ;;  %v1143_v46 = vpop.f32.mrf.mxu1  ;;  %v1055_v47 = vadd.f32 %v5534_v14, %v1054_v45  ;;  %v5850_v48 = vpop.f32.mrf.mxu3  ;;  %v4152_v42 = vor.u32 %v4787_v27, %v4151_v25  ;;  %v4156_v45 = vor.u32 %v4784_v30, %v4153_v32  ;;  %1934 = vmatpush.msrb.mxu3 %v5498_v62  ;;  %v4790_v62 = vld [vmem:[%s6726_s0 + $0xa4] sm:$0xf] }
 0x129   :  { %v5852_v49 = vadd.f32 %v1143_v46, %v1055_v47  ;;  %1935 = vmatpush.msrb.mxu3 %v5633_v29  ;;  %v4177_v29 = vld [vmem:[%s6726_s0 + $0xb8] sm:$0xf0] }
 0x12b   :  { %1936 = vmatpush.msrb.mxu3 %v5780_v31 }
 0x12e   :  { %v5866_v60 = vpop.f32.mrf.mxu2  ;;  %v1057_v2 = vpop.f32.mrf.mxu0 }
 0x12f   :  { %v1146_v3 = vpop.f32.mrf.mxu1  ;;  %v1058_v6 = vadd.f32 %v5534_v14, %v1057_v2  ;;  %v5869_v12 = vpop.f32.mrf.mxu3 }
 0x131   :  { %v1147_v8 = vadd.f32 %v1146_v3, %v1058_v6  ;;  %1372 = vmatmul.bf16.gmra.mxu0 %v4128_v61 }
 0x132   :  { %1461 = vmatmul.bf16.gmra.mxu1 %v4132_v63 }
 0x136   :  { %v1235_v13 = vpop.f32.mrf.mxu2  ;;  %v1059_v17 = vpop.f32.mrf.mxu0 }
 0x137   :  { %v5871_v15 = vadd.f32 %v1235_v13, %v1147_v8  ;;  %v1148_v20 = vpop.f32.mrf.mxu1  ;;  %v1060_v21 = vadd.f32 %v5534_v14, %v1059_v17  ;;  %v5888_v38 = vpop.f32.mrf.mxu3  ;;  %v4175_v13 = vld [vmem:[%s6726_s0 + $0xa0] sm:$0xf] }
 0x139   :  { %v5874_v22 = vadd.f32 %v1148_v20, %v1060_v21  ;;  %v4176_v20 = vor.u32 %v4793_v9, %v4175_v13  ;;  %v4180_v21 = vor.u32 %v4790_v62, %v4177_v29  ;;  %v4201_v13 = vld [vmem:[%s6726_s0 + $0xe8] sm:$0xf0] }
 0x13e   :  { %v5890_v40 = vpop.f32.mrf.mxu2  ;;  %v1062_v46 = vpop.f32.mrf.mxu0 }
 0x13f   :  { %v1151_v47 = vpop.f32.mrf.mxu1  ;;  %v1063_v52 = vadd.f32 %v5534_v14, %v1062_v46  ;;  %v5894_v57 = vpop.f32.mrf.mxu3 }
 0x141   :  { %v1152_v53 = vadd.f32 %v1151_v47, %v1063_v52  ;;  %1377 = vmatmul.bf16.gmra.mxu0 %v4152_v42  ;;  %v4926_v42 = vld [vmem:[%s6729_s6] ss:$0 sm:$0xff] }
 0x142   :  { %1466 = vmatmul.bf16.gmra.mxu1 %v4156_v45  ;;  %1820 = vrot.lane.b32.xlu0 %v4926_v42, %s5135_s3 }
 0x146   :  { %v1240_v61 = vpop.f32.mrf.mxu2  ;;  %v1064_v2 = vpop.f32.mrf.mxu0 }
 0x147   :  { %v5897_v63 = vadd.f32 %v1240_v61, %v1152_v53  ;;  %v1153_v3 = vpop.f32.mrf.mxu1  ;;  %v1065_v6 = vadd.f32 %v5534_v14, %v1064_v2  ;;  %v5918_v30 = vpop.f32.mrf.mxu3  ;;  %v4199_v2 = vld [vmem:[%s6726_s0 + $0xd0] sm:$0xf] }
 0x149   :  { %v5901_v8 = vadd.f32 %v1153_v3, %v1065_v6  ;;  %v4799_v3 = vld [vmem:[%s6726_s0 + $0xe4] sm:$0xf0]  ;;  %v4796_v6 = vld [vmem:[%s6726_s0 + $0xd4] sm:$0xf] }
 0x14a   :  { %v4200_v62 = vor.u32 %v4799_v3, %v4199_v2  ;;  %v4204_v29 = vor.u32 %v4796_v6, %v4201_v13  ;;  %v4223_v2 = vld [vmem:[%s6726_s0 + $0x100] sm:$0xf]  ;;  %v4805_v3 = vld [vmem:[%s6726_s0 + $0x114] sm:$0xf0]  ;;  %v4802_v6 = vld [vmem:[%s6726_s0 + $0x104] sm:$0xf] }
 0x14b   :  { %v4225_v13 = vld [vmem:[%s6726_s0 + $0x118] sm:$0xf0] }
 0x14e   :  { %v5916_v17 = vpop.f32.mrf.mxu2  ;;  %v1067_v25 = vpop.f32.mrf.mxu0 }
 0x14f   :  { %v1156_v27 = vpop.f32.mrf.mxu1  ;;  %v1068_v31 = vadd.f32 %v5534_v14, %v1067_v25  ;;  %v5928_v56 = vpop.f32.mrf.mxu3 }
 0x151   :  { %v1157_v32 = vadd.f32 %v1156_v27, %v1068_v31  ;;  %1382 = vmatmul.bf16.gmra.mxu0 %v4176_v20 }
 0x152   :  { %1471 = vmatmul.bf16.gmra.mxu1 %v4180_v21 }
 0x156   :  { %v1245_v45 = vpop.f32.mrf.mxu2  ;;  %v1069_v47 = vpop.f32.mrf.mxu0 }
 0x157   :  { %v5925_v46 = vadd.f32 %v1245_v45, %v1157_v32  ;;  %v1158_v52 = vpop.f32.mrf.mxu1  ;;  %v1070_v53 = vadd.f32 %v5534_v14, %v1069_v47  ;;  %v5947_v31 = vpop.f32.mrf.mxu3 }
 0x159   :  { %v5930_v61 = vadd.f32 %v1158_v52, %v1070_v53 }
 0x15b   :  { %6738 = vst [vmem:[#allocation3_spill] sm:$0xff] %v5930_v61 }
 0x15e   :  { %v5944_v9 = vpop.f32.mrf.mxu2  ;;  %v1072_v20 = vpop.f32.mrf.mxu0 }
 0x15f   :  { %6739 = vst [vmem:[#allocation4_spill] sm:$0xff] %v5944_v9  ;;  %v1161_v21 = vpop.f32.mrf.mxu1  ;;  %v1073_v25 = vadd.f32 %v5534_v14, %v1072_v20  ;;  %v4224_v20 = vor.u32 %v4805_v3, %v4223_v2  ;;  %v4247_v2 = vld [vmem:[%s6726_s0 + $0x130] sm:$0xf]  ;;  %v4811_v3 = vld [vmem:[%s6726_s0 + $0x144] sm:$0xf0] }
 0x161   :  { %v1162_v27 = vadd.f32 %v1161_v21, %v1073_v25  ;;  %1387 = vmatmul.bf16.gmra.mxu0 %v4200_v62  ;;  %v5966_v62 = vpop.f32.mrf.mxu3  ;;  %v4228_v21 = vor.u32 %v4802_v6, %v4225_v13  ;;  %v4808_v6 = vld [vmem:[%s6726_s0 + $0x134] sm:$0xf]  ;;  %v4249_v13 = vld [vmem:[%s6726_s0 + $0x148] sm:$0xf0] }
 0x162   :  { %1476 = vmatmul.bf16.gmra.mxu1 %v4204_v29  ;;  %6742 = vst [vmem:[#allocation7_spill] sm:$0xff] %v5966_v62 }
 0x166   :  { %v1250_v32 = vpop.f32.mrf.mxu2  ;;  %v1074_v45 = vpop.f32.mrf.mxu0 }
 0x167   :  { %v5949_v42 = vadd.f32 %v1250_v32, %v1162_v27  ;;  %v1163_v47 = vpop.f32.mrf.mxu1  ;;  %v1075_v52 = vadd.f32 %v5534_v14, %v1074_v45 }
 0x169   :  { %6740 = vst [vmem:[#allocation5_spill] sm:$0xff] %v5949_v42  ;;  %v5952_v53 = vadd.f32 %v1163_v47, %v1075_v52  ;;  %v5973_v9 = vpop.f32.mrf.mxu3 }
 0x16a   :  { %6745 = vst [vmem:[#allocation10_spill] sm:$0xff] %v5973_v9 }
 0x16b   :  { %6741 = vst [vmem:[#allocation6_spill] sm:$0xff] %v5952_v53 }
 0x16e   :  { %v5968_v29 = vpop.f32.mrf.mxu2  ;;  %v1077_v25 = vpop.f32.mrf.mxu0 }
 0x16f   :  { %6743 = vst [vmem:[#allocation8_spill] sm:$0xff] %v5968_v29  ;;  %v1166_v27 = vpop.f32.mrf.mxu1  ;;  %v1078_v32 = vadd.f32 %v5534_v14, %v1077_v25 }
 0x171   :  { %v1167_v45 = vadd.f32 %v1166_v27, %v1078_v32  ;;  %1392 = vmatmul.bf16.gmra.mxu0 %v4224_v20  ;;  %v5993_v27 = vpop.f32.mrf.mxu3 }
 0x172   :  { %1481 = vmatmul.bf16.gmra.mxu1 %v4228_v21  ;;  %6748 = vst [vmem:[#allocation13_spill] sm:$0xff] %v5993_v27 }
 0x176   :  { %v1255_v47 = vpop.f32.mrf.mxu2  ;;  %v1079_v53 = vpop.f32.mrf.mxu0 }
 0x177   :  { %v5971_v52 = vadd.f32 %v1255_v47, %v1167_v45  ;;  %v1168_v42 = vpop.f32.mrf.mxu1  ;;  %v1080_v62 = vadd.f32 %v5534_v14, %v1079_v53  ;;  %v4252_v53 = vor.u32 %v4808_v6, %v4249_v13  ;;  %v4814_v6 = vld [vmem:[%s6726_s0 + $0x164] sm:$0xf]  ;;  %v4273_v13 = vld [vmem:[%s6726_s0 + $0x178] sm:$0xf0] }
 0x179   :  { %6744 = vst [vmem:[#allocation9_spill] sm:$0xff] %v5971_v52  ;;  %v5976_v61 = vadd.f32 %v1168_v42, %v1080_v62  ;;  %v4248_v42 = vor.u32 %v4811_v3, %v4247_v2  ;;  %v4271_v2 = vld [vmem:[%s6726_s0 + $0x160] sm:$0xf]  ;;  %v4817_v3 = vld [vmem:[%s6726_s0 + $0x174] sm:$0xf0] }
 0x17b   :  { %6746 = vst [vmem:[#allocation11_spill] sm:$0xff] %v5976_v61 }
 0x17e   :  { %v5990_v20 = vpop.f32.mrf.mxu2  ;;  %v1082_v62 = vpop.f32.mrf.mxu0 }
 0x17f   :  { %6747 = vst [vmem:[#allocation12_spill] sm:$0xff] %v5990_v20  ;;  %v1171_v21 = vpop.f32.mrf.mxu1  ;;  %v1083_v25 = vadd.f32 %v5534_v14, %v1082_v62 }
 0x181   :  { %v1172_v32 = vadd.f32 %v1171_v21, %v1083_v25  ;;  %1397 = vmatmul.bf16.gmra.mxu0 %v4248_v42  ;;  %v6012_v42 = vpop.f32.mrf.mxu3 }
 0x182   :  { %1486 = vmatmul.bf16.gmra.mxu1 %v4252_v53  ;;  %6751 = vst [vmem:[#allocation16_spill] sm:$0xff] %v6012_v42 }
 0x186   :  { %v1260_v45 = vpop.f32.mrf.mxu2  ;;  %v1084_v61 = vpop.f32.mrf.mxu0 }
 0x187   :  { %v5995_v47 = vadd.f32 %v1260_v45, %v1172_v32  ;;  %v1173_v52 = vpop.f32.mrf.mxu1  ;;  %v1085_v29 = vadd.f32 %v5534_v14, %v1084_v61 }
 0x189   :  { %6749 = vst [vmem:[#allocation14_spill] sm:$0xff] %v5995_v47  ;;  %v5998_v9 = vadd.f32 %v1173_v52, %v1085_v29  ;;  %v4272_v29 = vor.u32 %v4817_v3, %v4271_v2  ;;  %v4276_v52 = vor.u32 %v4814_v6, %v4273_v13  ;;  %v6017_v32 = vpop.f32.mrf.mxu3  ;;  %v4295_v2 = vld [vmem:[%s6726_s0 + $0x190] sm:$0xf]  ;;  %v4823_v3 = vld [vmem:[%s6726_s0 + $0x1a4] sm:$0xf0] }
 0x18a   :  { %v4820_v6 = vld [vmem:[%s6726_s0 + $0x194] sm:$0xf]  ;;  %v4297_v13 = vld [vmem:[%s6726_s0 + $0x1a8] sm:$0xf0] }
 0x18b   :  { %6750 = vst [vmem:[#allocation15_spill] sm:$0xff] %v5998_v9 }
 0x18e   :  { %v6014_v61 = vpop.f32.mrf.mxu2  ;;  %v1087_v53 = vpop.f32.mrf.mxu0 }
 0x18f   :  { %v1176_v62 = vpop.f32.mrf.mxu1  ;;  %v1088_v21 = vadd.f32 %v5534_v14, %v1087_v53 }
 0x191   :  { %v1177_v25 = vadd.f32 %v1176_v62, %v1088_v21  ;;  %1402 = vmatmul.bf16.gmra.mxu0 %v4272_v29  ;;  %v4296_v29 = vor.u32 %v4823_v3, %v4295_v2  ;;  %v4319_v2 = vld [vmem:[%s6726_s0 + $0x1c0] sm:$0xf]  ;;  %v4829_v3 = vld [vmem:[%s6726_s0 + $0x1d4] sm:$0xf0] }
 0x192   :  { %1491 = vmatmul.bf16.gmra.mxu1 %v4276_v52 }
 0x196   :  { %v1265_v45 = vpop.f32.mrf.mxu2  ;;  %v1089_v47 = vpop.f32.mrf.mxu0 }
 0x197   :  { %v6019_v9 = vadd.f32 %v1265_v45, %v1177_v25  ;;  %v1178_v20 = vpop.f32.mrf.mxu1  ;;  %v1090_v42 = vadd.f32 %v5534_v14, %v1089_v47  ;;  %v4300_v14 = vor.u32 %v4820_v6, %v4297_v13  ;;  %v4321_v6 = vld [vmem:[%s6726_s0 + $0x1d8] sm:$0xf0] }
 0x199   :  { %6752 = vst [vmem:[#allocation17_spill] sm:$0xff] %v6019_v9  ;;  %v6022_v27 = vadd.f32 %v1178_v20, %v1090_v42  ;;  %v6036_v42 = vpop.f32.mrf.mxu3 }
 0x19b   :  { %6753 = vst [vmem:[#allocation18_spill] sm:$0xff] %v6022_v27 }
 0x19e   :  { %v1368_v20 = vpop.f32.mrf.mxu0 }
 0x19f   :  { %v1457_v47 = vpop.f32.mrf.mxu1  ;;  %v1369_v52 = vadd.f32 %v1368_v20, %v5568_v39  ;;  %v4826_v39 = vld [vmem:[%s6726_s0 + $0x1c4] sm:$0xf] }
 0x1a0   :  { %v4324_v20 = vor.u32 %v4826_v39, %v4321_v6  ;;  %v4832_v39 = vld [vmem:[%s6726_s0 + $0x1f4] sm:$0xf] }
 0x1a1   :  { %1407 = vmatmul.bf16.gmra.mxu0 %v4296_v29  ;;  %v1458_v21 = vadd.f32 %v1457_v47, %v1369_v52  ;;  %v6040_v45 = vpop.f32.mrf.mxu3 }
 0x1a2   :  { %1496 = vmatmul.bf16.gmra.mxu1 %v4300_v14  ;;  %6754 = vst [vmem:[#allocation19_spill] sm:$0xff] %v6040_v45  ;;  %v4320_v14 = vor.u32 %v4829_v3, %v4319_v2  ;;  %v4343_v2 = vld [vmem:[%s6726_s0 + $0x1f0] sm:$0xf]  ;;  %v4835_v3 = vld [vmem:[%s6726_s0 + $0x204] sm:$0xf0] }
 0x1a6   :  { %v1370_v53 = vpop.f32.mrf.mxu0 }
 0x1a7   :  { %v1459_v62 = vpop.f32.mrf.mxu1  ;;  %v1371_v25 = vadd.f32 %v1370_v53, %v5595_v59  ;;  %v1537_v59 = vmax.f32 %v1458_v21, 0.0 }
 0x1a9   :  { %v1460_v27 = vadd.f32 %v1459_v62, %v1371_v25  ;;  %v6055_v53 = vpop.f32.mrf.mxu3 }
 0x1ab   :  { %v1538_v13 = vmax.f32 %v1460_v27, 0.0 }
 0x1ad   :  { %v1569_v29 = vpack.c.bf16 %v1538_v13, %v1537_v59  ;;  %v4344_v13 = vor.u32 %v4835_v3, %v4343_v2 }
 0x1ae   :  { %v1373_v47 = vpop.f32.mrf.mxu0 }
 0x1af   :  { %v1462_v52 = vpop.f32.mrf.mxu1  ;;  %4665 = vmatmul.msk.bf16.vlgmr.msrb.gmra.mxu2 %vm1597_vm0, %v1569_v29  ;;  %v1374_v62 = vadd.f32 %v1373_v47, %v5598_v4  ;;  %v4345_v4 = vld [vmem:[%s6726_s0 + $0x208] sm:$0xf0] }
 0x1b0   :  { %v4348_v29 = vor.u32 %v4832_v39, %v4345_v4  ;;  %v4367_v39 = vld [vmem:[%s6726_s0 + $0x220] sm:$0xf]  ;;  %v4838_v4 = vld [vmem:[%s6726_s0 + $0x224] sm:$0xf] }
 0x1b1   :  { %1412 = vmatmul.bf16.gmra.mxu0 %v4320_v14  ;;  %v1463_v45 = vadd.f32 %v1462_v52, %v1374_v62 }
 0x1b2   :  { %1501 = vmatmul.bf16.gmra.mxu1 %v4324_v20 }
 0x1b3   :  { %v1539_v6 = vmax.f32 %v1463_v45, 0.0 }
 0x1b4   :  { %v6075_v52 = vpop.permute.xlu0 %1820 }
 0x1b5   :  { %6755 = vst [vmem:[#allocation20_spill] sm:$0xff] %v6075_v52 }
 0x1b6   :  { %v1375_v25 = vpop.f32.mrf.mxu0 }
 0x1b7   :  { %v1464_v9 = vpop.f32.mrf.mxu1  ;;  %v1376_v21 = vadd.f32 %v1375_v25, %v5625_v26  ;;  %v6071_v26 = vpop.f32.mrf.mxu3 }
 0x1b9   :  { %v1465_v27 = vadd.f32 %v1464_v9, %v1376_v21 }
 0x1bb   :  { %v1540_v59 = vmax.f32 %v1465_v27, 0.0 }
 0x1bd   :  { %v1570_v9 = vpack.c.bf16 %v1540_v59, %v1539_v6  ;;  %v4369_v6 = vld [vmem:[%s6726_s0 + $0x238] sm:$0xf0] }
 0x1be   :  { %v1378_v14 = vpop.f32.mrf.mxu0 }
 0x1bf   :  { %v1467_v20 = vpop.f32.mrf.mxu1  ;;  %4666 = vmatmul.msk.bf16.gmra.mxu2 %vm1597_vm0, %v1570_v9  ;;  %v1379_v47 = vadd.f32 %v1378_v14, %v5640_v37  ;;  %v6077_v62 = vpop.f32.mrf.mxu3  ;;  %v4841_v37 = vld [vmem:[%s6726_s0 + $0x234] sm:$0xf0] }
 0x1c0   :  { %v1823_v21 = vadd.f32 %v6075_v52, %v6077_v62 }
 0x1c1   :  { %1417 = vmatmul.bf16.gmra.mxu0 %v4344_v13  ;;  %v1468_v27 = vadd.f32 %v1467_v20, %v1379_v47  ;;  %v4368_v13 = vor.u32 %v4841_v37, %v4367_v39  ;;  %v4844_v39 = vld [vmem:[%s6726_s0 + $0x254] sm:$0xf] }
 0x1c2   :  { %1506 = vmatmul.bf16.gmra.mxu1 %v4348_v29  ;;  %1825 = vrot.lane.b32.xlu0 %v1823_v21, %s5135_s3  ;;  %v4372_v29 = vor.u32 %v4838_v4, %v4369_v6 }
 0x1c6   :  { %v1380_v25 = vpop.f32.mrf.mxu0 }
 0x1c7   :  { %v1469_v45 = vpop.f32.mrf.mxu1  ;;  %v1381_v2 = vadd.f32 %v1380_v25, %v5667_v58  ;;  %v1541_v58 = vmax.f32 %v1468_v27, 0.0  ;;  %v4391_v27 = vld [vmem:[%s6726_s0 + $0x250] sm:$0xf] }
 0x1c9   :  { %v1470_v3 = vadd.f32 %v1469_v45, %v1381_v2 }
 0x1cb   :  { %v1542_v59 = vmax.f32 %v1470_v3, 0.0  ;;  %v4847_v3 = vld [vmem:[%s6726_s0 + $0x264] sm:$0xf0] }
 0x1cc   :  { %v4392_v6 = vor.u32 %v4847_v3, %v4391_v27 }
 0x1cd   :  { %v1571_v9 = vpack.c.bf16 %v1542_v59, %v1541_v58 }
 0x1ce   :  { %v1383_v14 = vpop.f32.mrf.mxu0 }
 0x1cf   :  { %v1472_v20 = vpop.f32.mrf.mxu1  ;;  %4667 = vmatmul.msk.bf16.gmra.mxu2 %vm1597_vm0, %v1571_v9  ;;  %v1384_v47 = vadd.f32 %v1383_v14, %v5670_v5  ;;  %v4393_v5 = vld [vmem:[%s6726_s0 + $0x268] sm:$0xf0] }
 0x1d0   :  { %v4396_v58 = vor.u32 %v4844_v39, %v4393_v5 }
 0x1d1   :  { %1422 = vmatmul.bf16.gmra.mxu0 %v4368_v13  ;;  %v1473_v21 = vadd.f32 %v1472_v20, %v1384_v47  ;;  %v1300_v13 = vadd.f32 %v5705_v34, %v5707_v35  ;;  %v4853_v34 = vld [vmem:[%s6726_s0 + $0x294] sm:$0xf0]  ;;  %v4850_v35 = vld [vmem:[%s6726_s0 + $0x284] sm:$0xf] }
 0x1d2   :  { %1511 = vmatmul.bf16.gmra.mxu1 %v4372_v29  ;;  %v1213_v29 = vadd.f32 %v5736_v50, %v5710_v41  ;;  %v4417_v41 = vld [vmem:[%s6726_s0 + $0x298] sm:$0xf0] }
 0x1d3   :  { %v1543_v37 = vmax.f32 %v1473_v21, 0.0  ;;  %v4420_v39 = vor.u32 %v4850_v35, %v4417_v41 }
 0x1d4   :  { %v1302_v20 = vadd.f32 %v5738_v51, %v1213_v29 }
 0x1d6   :  { %v1385_v25 = vpop.f32.mrf.mxu0 }
 0x1d7   :  { %v1474_v45 = vpop.f32.mrf.mxu1  ;;  %v1386_v2 = vadd.f32 %v1385_v25, %v5697_v28 }
 0x1d9   :  { %v1475_v52 = vadd.f32 %v1474_v45, %v1386_v2  ;;  %v4415_v2 = vld [vmem:[%s6726_s0 + $0x280] sm:$0xf] }
 0x1da   :  { %v4416_v3 = vor.u32 %v4853_v34, %v4415_v2  ;;  %v1310_v2 = vadd.f32 %v5784_v33, %v5786_v36  ;;  %v1223_v34 = vadd.f32 %v5818_v54, %v5791_v43  ;;  %v4865_v33 = vld [vmem:[%s6726_s0 + $0x2f4] sm:$0xf0]  ;;  %v4862_v36 = vld [vmem:[%s6726_s0 + $0x2e4] sm:$0xf]  ;;  %v4465_v43 = vld [vmem:[%s6726_s0 + $0x2f8] sm:$0xf0] }
 0x1db   :  { %v1544_v4 = vmax.f32 %v1475_v52, 0.0 }
 0x1dc   :  { %v1312_v41 = vadd.f32 %v5820_v55, %v1223_v34 }
 0x1dd   :  { %v1572_v28 = vpack.c.bf16 %v1544_v4, %v1543_v37  ;;  %v1305_v4 = vadd.f32 %v5741_v0, %v5743_v1  ;;  %v4859_v0 = vld [vmem:[%s6726_s0 + $0x2c4] sm:$0xf0]  ;;  %v4856_v1 = vld [vmem:[%s6726_s0 + $0x2b4] sm:$0xf] }
 0x1de   :  { %v1388_v59 = vpop.f32.mrf.mxu0 }
 0x1df   :  { %v1477_v9 = vpop.f32.mrf.mxu1  ;;  %4668 = vmatmul.msk.bf16.gmra.mxu2 %vm1597_vm0, %v1572_v28  ;;  %v1389_v14 = vadd.f32 %v1388_v59, %v1300_v13  ;;  %v1218_v28 = vadd.f32 %v5772_v18, %v5746_v7  ;;  %v4441_v7 = vld [vmem:[%s6726_s0 + $0x2c8] sm:$0xf0] }
 0x1e1   :  { %1427 = vmatmul.bf16.gmra.mxu0 %v4392_v6  ;;  %v1478_v25 = vadd.f32 %v1477_v9, %v1389_v14 }
 0x1e2   :  { %1516 = vmatmul.bf16.gmra.mxu1 %v4396_v58  ;;  %v1307_v58 = vadd.f32 %v5774_v19, %v1218_v28  ;;  %v4468_v28 = vor.u32 %v4862_v36, %v4465_v43 }
 0x1e3   :  { %v1545_v50 = vmax.f32 %v1478_v25, 0.0  ;;  %v4444_v25 = vor.u32 %v4856_v1, %v4441_v7 }
 0x1e6   :  { %v1390_v47 = vpop.f32.mrf.mxu0 }
 0x1e7   :  { %v1479_v52 = vpop.f32.mrf.mxu1  ;;  %v1391_v45 = vadd.f32 %v1390_v47, %v1302_v20  ;;  %v4439_v20 = vld [vmem:[%s6726_s0 + $0x2b0] sm:$0xf] }
 0x1e9   :  { %v1480_v21 = vadd.f32 %v1479_v52, %v1391_v45  ;;  %v4440_v52 = vor.u32 %v4859_v0, %v4439_v20 }
 0x1eb   :  { %v1546_v51 = vmax.f32 %v1480_v21, 0.0 }
 0x1ed   :  { %v1573_v27 = vpack.c.bf16 %v1546_v51, %v1545_v50 }
 0x1ee   :  { %v1393_v5 = vpop.f32.mrf.mxu0 }
 0x1ef   :  { %v1482_v37 = vpop.f32.mrf.mxu1  ;;  %4669 = vmatmul.msk.bf16.gmra.mxu2 %vm1597_vm0, %v1573_v27  ;;  %v1394_v6 = vadd.f32 %v1393_v5, %v1305_v4  ;;  %v4463_v5 = vld [vmem:[%s6726_s0 + $0x2e0] sm:$0xf] }
 0x1f0   :  { %v4464_v4 = vor.u32 %v4865_v33, %v4463_v5 }
 0x1f1   :  { %1432 = vmatmul.bf16.gmra.mxu0 %v4416_v3  ;;  %v1483_v13 = vadd.f32 %v1482_v37, %v1394_v6 }
 0x1f2   :  { %1521 = vmatmul.bf16.gmra.mxu1 %v4420_v39 }
 0x1f3   :  { %v1547_v18 = vmax.f32 %v1483_v13, 0.0 }
 0x1f6   :  { %v1395_v59 = vpop.f32.mrf.mxu0 }
 0x1f7   :  { %v1484_v9 = vpop.f32.mrf.mxu1  ;;  %v1396_v29 = vadd.f32 %v1395_v59, %v1307_v58  ;;  %v1315_v59 = vadd.f32 %v5823_v10, %v5825_v11  ;;  %v1320_v10 = vadd.f32 %v5850_v48, %v5847_v44  ;;  %v1233_v11 = vadd.f32 %v5866_v60, %v5852_v49  ;;  %v6182_v44 = vld [vmem:[%s6730_s4] ss:$0 sm:$0xff]  ;;  %s5136_s4 = smov 96  }
 0x1f8   :  { %v1325_v48 = vadd.f32 %v5888_v38, %v5871_v15  ;;  %v1238_v49 = vadd.f32 %v5890_v40, %v5874_v22 }
 0x1f9   :  { %v1485_v14 = vadd.f32 %v1484_v9, %v1396_v29  ;;  %v1228_v9 = vadd.f32 %v5842_v23, %v5828_v16  ;;  %v1322_v23 = vadd.f32 %v5869_v12, %v1233_v11  ;;  %v1335_v11 = vadd.f32 %v5947_v31, %v5925_v46 }
 0x1fa   :  { %v1327_v5 = vadd.f32 %v5894_v57, %v1238_v49 }
 0x1fb   :  { %v1548_v19 = vmax.f32 %v1485_v14, 0.0  ;;  %v1317_v29 = vadd.f32 %v5844_v24, %v1228_v9  ;;  %v1243_v9 = vadd.f32 %v5916_v17, %v5901_v8 }
 0x1fd   :  { %v1574_v47 = vpack.c.bf16 %v1548_v19, %v1547_v18 }
 0x1fe   :  { %v1398_v45 = vpop.f32.mrf.mxu0 }
 0x1ff   :  { %v1487_v21 = vpop.f32.mrf.mxu1  ;;  %4670 = vmatmul.msk.bf16.gmra.mxu2 %vm1597_vm0, %v1574_v47  ;;  %v1399_v35 = vadd.f32 %v1398_v45, %v1310_v2 }
 0x201   :  { %1437 = vmatmul.bf16.gmra.mxu0 %v4440_v52  ;;  %v1488_v27 = vadd.f32 %v1487_v21, %v1399_v35  ;;  %v6176_v35 = vpop.f32.mrf.mxu2 }
 0x202   :  { %1526 = vmatmul.bf16.gmra.mxu1 %v4444_v25 }
 0x203   :  { %v1549_v54 = vmax.f32 %v1488_v27, 0.0 }
 0x206   :  { %v1400_v50 = vpop.f32.mrf.mxu0 }
 0x207   :  { %v1489_v51 = vpop.f32.mrf.mxu1  ;;  %v1401_v3 = vadd.f32 %v1400_v50, %v1312_v41 }
 0x209   :  { %v1490_v39 = vadd.f32 %v1489_v51, %v1401_v3 }
 0x20b   :  { %v1550_v55 = vmax.f32 %v1490_v39, 0.0 }
 0x20d   :  { %v1575_v37 = vpack.c.bf16 %v1550_v55, %v1549_v54 }
 0x20e   :  { %v1403_v6 = vpop.f32.mrf.mxu0 }
 0x20f   :  { %v1492_v58 = vpop.f32.mrf.mxu1  ;;  %4671 = vmatmul.msk.bf16.gmra.mxu2 %vm1597_vm0, %v1575_v37  ;;  %v1404_v13 = vadd.f32 %v1403_v6, %v1315_v59  ;;  %v1330_v59 = vadd.f32 %v5918_v30, %v5897_v63 }
 0x211   :  { %1442 = vmatmul.bf16.gmra.mxu0 %v4464_v4  ;;  %v1493_v0 = vadd.f32 %v1492_v58, %v1404_v13 }
 0x212   :  { %1531 = vmatmul.bf16.gmra.mxu1 %v4468_v28 }
 0x213   :  { %v1551_v18 = vmax.f32 %v1493_v0, 0.0 }
 0x216   :  { %v1405_v14 = vpop.f32.mrf.mxu0 }
 0x217   :  { %v1494_v20 = vpop.f32.mrf.mxu1  ;;  %v1406_v1 = vadd.f32 %v1405_v14, %v1317_v29 }
 0x219   :  { %v1495_v7 = vadd.f32 %v1494_v20, %v1406_v1  ;;  %v1332_v20 = vadd.f32 %v5928_v56, %v1243_v9  ;;  %v6762_v9 = vld [vmem:[#allocation8_spill] sm:$0xff] }
 0x21b   :  { %v1552_v19 = vmax.f32 %v1495_v7, 0.0 }
 0x21d   :  { %v1576_v47 = vpack.c.bf16 %v1552_v19, %v1551_v18 }
 0x21e   :  { %v1408_v52 = vpop.f32.mrf.mxu0 }
 0x21f   :  { %v1497_v25 = vpop.f32.mrf.mxu1  ;;  %4672 = vmatmul.msk.bf16.gmra.mxu2 %vm1597_vm0, %v1576_v47  ;;  %v1409_v16 = vadd.f32 %v1408_v52, %v1320_v10 }
 0x221   :  { %v1498_v21 = vadd.f32 %v1497_v25, %v1409_v16  ;;  %v6756_v16 = vld [vmem:[#allocation3_spill] sm:$0xff] }
 0x223   :  { %v1553_v41 = vmax.f32 %v1498_v21, 0.0 }
 0x226   :  { %v1410_v24 = vpop.f32.mrf.mxu0 }
 0x227   :  { %v1499_v45 = vpop.f32.mrf.mxu1  ;;  %v1411_v2 = vadd.f32 %v1410_v24, %v1322_v23  ;;  %v6757_v23 = vld [vmem:[#allocation4_spill] sm:$0xff] }
 0x228   :  { %v1248_v24 = vadd.f32 %v6757_v23, %v6756_v16  ;;  %v6766_v23 = vld [vmem:[#allocation11_spill] sm:$0xff] }
 0x229   :  { %v1500_v34 = vadd.f32 %v1499_v45, %v1411_v2 }
 0x22b   :  { %v1554_v50 = vmax.f32 %v1500_v34, 0.0 }
 0x22d   :  { %v1577_v51 = vpack.c.bf16 %v1554_v50, %v1553_v41 }
 0x22e   :  { %v1413_v27 = vpop.f32.mrf.mxu0 }
 0x22f   :  { %v1502_v3 = vpop.f32.mrf.mxu1  ;;  %4673 = vmatmul.msk.bf16.gmra.mxu2 %vm1597_vm0, %v1577_v51  ;;  %v1414_v12 = vadd.f32 %v1413_v27, %v1325_v48  ;;  %v6758_v51 = vld [vmem:[#allocation7_spill] sm:$0xff] }
 0x230   :  { %v1337_v27 = vadd.f32 %v6758_v51, %v1248_v24  ;;  %v6767_v24 = vld [vmem:[#allocation12_spill] sm:$0xff] }
 0x231   :  { %v1503_v43 = vadd.f32 %v1502_v3, %v1414_v12 }
 0x232   :  { %v1655_v60 = vpop.f32.mrf.mxu2 }
 0x233   :  { %v1656_v39 = vadd.f32 %v6182_v44, %v1655_v60  ;;  %v1555_v4 = vmax.f32 %v1503_v43, 0.0 }
 0x235   :  { %1736 = vst.msk [vmem:[#allocation2] sm:$0xff] %vm1735_vm1, %v1656_v39  ;;  %v1826_v39 = vpop.permute.xlu0 %1825 }
 0x236   :  { %v1415_v33 = vpop.f32.mrf.mxu0 }
 0x237   :  { %v1504_v36 = vpop.f32.mrf.mxu1  ;;  %v1416_v54 = vadd.f32 %v1415_v33, %v1327_v5 }
 0x239   :  { %v1505_v55 = vadd.f32 %v1504_v36, %v1416_v54 }
 0x23a   :  { %v1657_v37 = vpop.f32.mrf.mxu2 }
 0x23b   :  { %v1556_v15 = vmax.f32 %v1505_v55, 0.0  ;;  %v1658_v38 = vadd.f32 %v6182_v44, %v1657_v37 }
 0x23c   :  { %v6192_v22 = vld [vmem:[#allocation2] sm:$0xff] }
 0x23d   :  { %v1578_v40 = vpack.c.bf16 %v1556_v15, %v1555_v4  ;;  %1737 = vst.msk [vmem:[#allocation2 + $0x8] sm:$0xff] %vm1735_vm1, %v1658_v38  ;;  %v1798_v57 = vadd.f32 %v6077_v62, %v6192_v22 }
 0x23e   :  { %v1418_v28 = vpop.f32.mrf.mxu0 }
 0x23f   :  { %v1507_v6 = vpop.f32.mrf.mxu1  ;;  %4674 = vmatmul.msk.bf16.gmra.mxu2 %vm1597_vm0, %v1578_v40  ;;  %v4681_v58 = vmul.f32 -1.442695, %v1798_v57  ;;  %v1419_v29 = vadd.f32 %v1418_v28, %v1330_v59  ;;  %v6759_v28 = vld [vmem:[#allocation5_spill] sm:$0xff]  ;;  %v6761_v59 = vld [vmem:[#allocation6_spill] sm:$0xff] }
 0x241   :  { %4930 = vpow2.f32 %v4681_v58  ;;  %v1508_v7 = vadd.f32 %v1507_v6, %v1419_v29  ;;  %v6760_v6 = vld [vmem:[#allocation10_spill] sm:$0xff] }
 0x242   :  { %v1660_v13 = vpop.f32.mrf.mxu2  ;;  %v1340_v58 = vadd.f32 %v6760_v6, %v6759_v28 }
 0x243   :  { %v1661_v14 = vadd.f32 %v6182_v44, %v1660_v13  ;;  %v1557_v30 = vmax.f32 %v1508_v7, 0.0  ;;  %v1253_v13 = vadd.f32 %v6762_v9, %v6761_v59 }
 0x245   :  { %1738 = vst.msk [vmem:[#allocation2 + $0x10] sm:$0xff] %vm1735_vm1, %v1661_v14 }
 0x246   :  { %v1420_v62 = vpop.f32.mrf.mxu0 }
 0x247   :  { %v1509_v0 = vpop.f32.mrf.mxu1  ;;  %v4931_v1 = vpop.eup %4930  ;;  %v1421_v18 = vadd.f32 %v1420_v62, %v1332_v20  ;;  %v6763_v62 = vld [vmem:[#allocation13_spill] sm:$0xff] }
 0x248   :  { %v1802_v19 = vadd.f32 1.0, %v4931_v1 }
 0x249   :  { %v1510_v47 = vadd.f32 %v1509_v0, %v1421_v18  ;;  %v1342_v0 = vadd.f32 %v6763_v62, %v1253_v13 }
 0x24a   :  { %v1662_v63 = vpop.f32.mrf.mxu2  ;;  %4932 = vrcp.f32 %v1802_v19  ;;  %v1814_v50 = vand.u32 2147483648, %v1802_v19  ;;  %v1812_v48 = vand.u32 2147483647, %v1802_v19  ;;  %vm1808_vm3 = vweird.f32 %v1802_v19 }
 0x24b   :  { %v1558_v8 = vmax.f32 %v1510_v47, 0.0  ;;  %v1663_v17 = vadd.f32 %v6182_v44, %v1662_v63 }
 0x24c   :  { %v1815_v5 = vor.u32 1.1754944e-38, %v1814_v50  ;;  %vm1813_vm5 = vcmp.eq.f32.partialorder %v1812_v48, 8.507059e+37 }
 0x24d   :  { %v1579_v52 = vpack.c.bf16 %v1558_v8, %v1557_v30  ;;  %1739 = vst.msk [vmem:[#allocation2 + $0x18] sm:$0xff] %vm1735_vm1, %v1663_v17 }
 0x24e   :  { %v1423_v25 = vpop.f32.mrf.mxu0 }
 0x24f   :  { %v1512_v56 = vpop.f32.mrf.mxu1  ;;  %4675 = vmatmul.msk.bf16.gmra.mxu2 %vm1597_vm0, %v1579_v52  ;;  %v1424_v2 = vadd.f32 %v1423_v25, %v1335_v11  ;;  %v6765_v11 = vld [vmem:[#allocation16_spill] sm:$0xff] }
 0x250   :  { %v4933_v10 = vpop.eup %4932 }
 0x251   :  { %v1804_v45 = vmul.f32 %v4933_v10, %v1802_v19  ;;  %vm1809_vm2 = vweird.f32 %v4933_v10  ;;  %v1513_v46 = vadd.f32 %v1512_v56, %v1424_v2 }
 0x252   :  { %v1665_v21 = vpop.f32.mrf.mxu2  ;;  %vm1810_vm4 = vmor %vm1808_vm3, %vm1809_vm2 }
 0x253   :  { %v1666_v34 = vadd.f32 %v6182_v44, %v1665_v21  ;;  %v1805_v41 = vsub.f32 1.0, %v1804_v45  ;;  %v1559_v55 = vmax.f32 %v1513_v46, 0.0  ;;  %v1258_v45 = vadd.f32 %v6767_v24, %v6766_v23 }
 0x255   :  { %1740 = vst.msk [vmem:[#allocation2 + $0x20] sm:$0xff] %vm1735_vm1, %v1666_v34  ;;  %v1806_v3 = vmul.f32 %v4933_v10, %v1805_v41  ;;  %v1347_v41 = vadd.f32 %v6017_v32, %v1258_v45  ;;  %v6768_v32 = vld [vmem:[#allocation14_spill] sm:$0xff] }
 0x256   :  { %v1425_v49 = vpop.f32.mrf.mxu0 }
 0x257   :  { %v1514_v60 = vpop.f32.mrf.mxu1  ;;  %v1426_v31 = vadd.f32 %v1425_v49, %v1337_v27  ;;  %v1807_v12 = vadd.f32 %v4933_v10, %v1806_v3 }
 0x259   :  { %v1515_v33 = vadd.f32 %v1514_v60, %v1426_v31  ;;  %v1811_v36 = vsel %vm1810_vm4, %v4933_v10, %v1807_v12  ;;  %v6764_v10 = vld [vmem:[#allocation9_spill] sm:$0xff] }
 0x25a   :  { %v1667_v43 = vpop.f32.mrf.mxu2  ;;  %v6215_v54 = vsel %vm1813_vm5, %v1815_v5, %v1811_v36  ;;  %v1345_v16 = vadd.f32 %v6765_v11, %v6764_v10  ;;  %v6769_v36 = vld [vmem:[#allocation15_spill] sm:$0xff] }
 0x25b   :  { %v1560_v37 = vmax.f32 %v1515_v33, 0.0  ;;  %v1668_v4 = vadd.f32 %v6182_v44, %v1667_v43  ;;  %v1828_v15 = vmul.f32 %v1826_v39, %v6215_v54  ;;  %v1350_v33 = vadd.f32 %v6036_v42, %v6768_v32 }
 0x25c   :  { %v1263_v43 = vadd.f32 %v6014_v61, %v6769_v36 }
 0x25d   :  { %v1580_v38 = vpack.c.bf16 %v1560_v37, %v1559_v55  ;;  %1741 = vst.msk [vmem:[#allocation2 + $0x28] sm:$0xff] %vm1735_vm1, %v1668_v4  ;;  %1830 = vrot.lane.b32.xlu1 %v1828_v15, %s5135_s3  ;;  %v6770_v15 = vld [vmem:[#allocation19_spill] sm:$0xff] }
 0x25e   :  { %v1428_v40 = vpop.f32.mrf.mxu0 }
 0x25f   :  { %v1517_v57 = vpop.f32.mrf.mxu1  ;;  %4676 = vmatmul.msk.bf16.gmra.mxu2 %vm1597_vm0, %v1580_v38  ;;  %v1429_v14 = vadd.f32 %v1428_v40, %v1340_v58  ;;  %v1352_v38 = vadd.f32 %v6770_v15, %v1263_v43 }
 0x261   :  { %v1518_v18 = vadd.f32 %v1517_v57, %v1429_v14 }
 0x262   :  { %v1670_v29 = vpop.f32.mrf.mxu2 }
 0x263   :  { %v1671_v20 = vadd.f32 %v6182_v44, %v1670_v29  ;;  %v1561_v30 = vmax.f32 %v1518_v18, 0.0 }
 0x265   :  { %1742 = vst.msk [vmem:[#allocation2 + $0x30] sm:$0xff] %vm1735_vm1, %v1671_v20  ;;  %v6771_v20 = vld [vmem:[#allocation17_spill] sm:$0xff] }
 0x266   :  { %v1430_v1 = vpop.f32.mrf.mxu0  ;;  %v1355_v62 = vadd.f32 %v6055_v53, %v6771_v20 }
 0x267   :  { %v1519_v7 = vpop.f32.mrf.mxu1  ;;  %v1431_v19 = vadd.f32 %v1430_v1, %v1342_v0  ;;  %v6772_v0 = vld [vmem:[#allocation18_spill] sm:$0xff] }
 0x268   :  { %v1268_v1 = vadd.f32 %v6176_v35, %v6772_v0  ;;  %v6325_v0 = vld [vmem:[%s6727_s5] sm:$0xff] }
 0x269   :  { %v1520_v47 = vadd.f32 %v1519_v7, %v1431_v19 }
 0x26a   :  { %v1672_v63 = vpop.f32.mrf.mxu2 }
 0x26b   :  { %v1562_v8 = vmax.f32 %v1520_v47, 0.0  ;;  %v1673_v17 = vadd.f32 %v6182_v44, %v1672_v63  ;;  %v1357_v47 = vadd.f32 %v6071_v26, %v1268_v1 }
 0x26d   :  { %v1581_v52 = vpack.c.bf16 %v1562_v8, %v1561_v30  ;;  %1743 = vst.msk [vmem:[#allocation2 + $0x38] sm:$0xff] %vm1735_vm1, %v1673_v17 }
 0x26e   :  { %v1433_v25 = vpop.f32.mrf.mxu0 }
 0x26f   :  { %v1522_v56 = vpop.f32.mrf.mxu1  ;;  %4677 = vmatmul.msk.bf16.gmra.mxu2 %vm1597_vm0, %v1581_v52  ;;  %v1434_v2 = vadd.f32 %v1433_v25, %v1345_v16 }
 0x271   :  { %v1523_v27 = vadd.f32 %v1522_v56, %v1434_v2 }
 0x272   :  { %v1675_v21 = vpop.f32.mrf.mxu2 }
 0x273   :  { %v1676_v34 = vadd.f32 %v6182_v44, %v1675_v21  ;;  %v1563_v60 = vmax.f32 %v1523_v27, 0.0 }
 0x275   :  { %1744 = vst.msk [vmem:[#allocation2 + $0x40] sm:$0xff] %vm1735_vm1, %v1676_v34 }
 0x276   :  { %v1435_v50 = vpop.f32.mrf.mxu0 }
 0x277   :  { %v1524_v51 = vpop.f32.mrf.mxu1  ;;  %v1436_v3 = vadd.f32 %v1435_v50, %v1347_v41 }
 0x279   :  { %v1525_v48 = vadd.f32 %v1524_v51, %v1436_v3 }
 0x27a   :  { %v1677_v49 = vpop.f32.mrf.mxu2 }
 0x27b   :  { %v1564_v46 = vmax.f32 %v1525_v48, 0.0  ;;  %v1678_v31 = vadd.f32 %v6182_v44, %v1677_v49 }
 0x27d   :  { %v1582_v12 = vpack.c.bf16 %v1564_v46, %v1563_v60  ;;  %1745 = vst.msk [vmem:[#allocation2 + $0x48] sm:$0xff] %vm1735_vm1, %v1678_v31 }
 0x27e   :  { %v1438_v39 = vpop.f32.mrf.mxu0 }
 0x27f   :  { %v1527_v5 = vpop.f32.mrf.mxu1  ;;  %4678 = vmatmul.msk.bf16.gmra.mxu2 %vm1597_vm0, %v1582_v12  ;;  %v1439_v37 = vadd.f32 %v1438_v39, %v1350_v33 }
 0x281   :  { %v1528_v28 = vadd.f32 %v1527_v5, %v1439_v37 }
 0x282   :  { %v1680_v55 = vpop.f32.mrf.mxu2 }
 0x283   :  { %v1681_v4 = vadd.f32 %v6182_v44, %v1680_v55  ;;  %v1565_v9 = vmax.f32 %v1528_v28, 0.0 }
 0x285   :  { %1746 = vst.msk [vmem:[#allocation2 + $0x50] sm:$0xff] %vm1735_vm1, %v1681_v4 }
 0x286   :  { %v1440_v40 = vpop.f32.mrf.mxu0 }
 0x287   :  { %v1529_v57 = vpop.f32.mrf.mxu1  ;;  %v1441_v6 = vadd.f32 %v1440_v40, %v1352_v38 }
 0x289   :  { %v1530_v58 = vadd.f32 %v1529_v57, %v1441_v6 }
 0x28a   :  { %v1682_v59 = vpop.f32.mrf.mxu2 }
 0x28b   :  { %v1566_v13 = vmax.f32 %v1530_v58, 0.0  ;;  %v1683_v42 = vadd.f32 %v6182_v44, %v1682_v59 }
 0x28d   :  { %v1583_v29 = vpack.c.bf16 %v1566_v13, %v1565_v9  ;;  %1747 = vst.msk [vmem:[#allocation2 + $0x58] sm:$0xff] %vm1735_vm1, %v1683_v42 }
 0x28e   :  { %v1443_v61 = vpop.f32.mrf.mxu0 }
 0x28f   :  { %v1532_v14 = vpop.f32.mrf.mxu1  ;;  %4679 = vmatmul.msk.bf16.gmra.mxu2 %vm1597_vm0, %v1583_v29  ;;  %v1444_v18 = vadd.f32 %v1443_v61, %v1355_v62  ;;  %v6319_v62 = vld [vmem:[%s6727_s5 + $0x8] sm:$0xff] }
 0x291   :  { %v1533_v8 = vadd.f32 %v1532_v14, %v1444_v18 }
 0x292   :  { %v1685_v7 = vpop.f32.mrf.mxu2 }
 0x293   :  { %v1686_v19 = vadd.f32 %v6182_v44, %v1685_v7  ;;  %v1567_v56 = vmax.f32 %v1533_v8, 0.0  ;;  %v6773_v7 = vld [vmem:[#allocation20_spill] sm:$0xff] }
 0x295   :  { %1748 = vst.msk [vmem:[#allocation2 + $0x60] sm:$0xff] %vm1735_vm1, %v1686_v19  ;;  %v1846_v19 = vld [vmem:[#allocation2 + $0x8] sm:$0xff] }
 0x296   :  { %v1445_v63 = vpop.f32.mrf.mxu0 }
 0x297   :  { %v1534_v30 = vpop.f32.mrf.mxu1  ;;  %v1446_v17 = vadd.f32 %v1445_v63, %v1357_v47 }
 0x299   :  { %v1535_v52 = vadd.f32 %v1534_v30, %v1446_v17 }
 0x29a   :  { %v1687_v25 = vpop.f32.mrf.mxu2 }
 0x29b   :  { %v1568_v10 = vmax.f32 %v1535_v52, 0.0  ;;  %v1688_v53 = vadd.f32 %v6182_v44, %v1687_v25 }
 0x29d   :  { %v1584_v11 = vpack.c.bf16 %v1568_v10, %v1567_v56  ;;  %1749 = vst.msk [vmem:[#allocation2 + $0x68] sm:$0xff] %vm1735_vm1, %v1688_v53 }
 0x29f   :  { %4680 = vmatmul.msk.bf16.gmra.mxu2 %vm1597_vm0, %v1584_v11 }
 0x2a2   :  { %v1690_v35 = vpop.f32.mrf.mxu2 }
 0x2a3   :  { %v1691_v26 = vadd.f32 %v6182_v44, %v1690_v35 }
 0x2a5   :  { %1750 = vst.msk [vmem:[#allocation2 + $0x70] sm:$0xff] %vm1735_vm1, %v1691_v26 }
 0x2aa   :  { %v1692_v16 = vpop.f32.mrf.mxu2 }
 0x2ab   :  { %v1693_v23 = vadd.f32 %v6182_v44, %v1692_v16 }
 0x2ad   :  { %1751 = vst.msk [vmem:[#allocation2 + $0x78] sm:$0xff] %vm1735_vm1, %v1693_v23 }
 0x2b2   :  { %v1695_v24 = vpop.f32.mrf.mxu2 }
 0x2b3   :  { %v1696_v45 = vadd.f32 %v6182_v44, %v1695_v24 }
 0x2b5   :  { %1752 = vst.msk [vmem:[#allocation2 + $0x80] sm:$0xff] %vm1735_vm1, %v1696_v45 }
 0x2ba   :  { %v1697_v21 = vpop.f32.mrf.mxu2 }
 0x2bb   :  { %v1698_v2 = vadd.f32 %v6182_v44, %v1697_v21 }
 0x2bd   :  { %1753 = vst.msk [vmem:[#allocation2 + $0x88] sm:$0xff] %vm1735_vm1, %v1698_v2 }
 0x2c2   :  { %v1700_v34 = vpop.f32.mrf.mxu2 }
 0x2c3   :  { %v1701_v41 = vadd.f32 %v6182_v44, %v1700_v34 }
 0x2c5   :  { %1754 = vst.msk [vmem:[#allocation2 + $0x90] sm:$0xff] %vm1735_vm1, %v1701_v41 }
 0x2ca   :  { %v1702_v50 = vpop.f32.mrf.mxu2 }
 0x2cb   :  { %v1703_v51 = vadd.f32 %v6182_v44, %v1702_v50 }
 0x2cd   :  { %1755 = vst.msk [vmem:[#allocation2 + $0x98] sm:$0xff] %vm1735_vm1, %v1703_v51 }
 0x2cf   :  { %v1831_v27 = vpop.permute.xlu1 %1830 }
 0x2d0   :  { %v1833_v3 = vadd.f32 %v1831_v27, %v6192_v22 }
 0x2d2   :  { %4934 = vtanh.f32 %v1833_v3  ;;  %v1705_v48 = vpop.f32.mrf.mxu2 }
 0x2d3   :  { %v1706_v49 = vadd.f32 %v6182_v44, %v1705_v48 }
 0x2d5   :  { %1756 = vst.msk [vmem:[#allocation2 + $0xa0] sm:$0xff] %vm1735_vm1, %v1706_v49 }
 0x2d8   :  { %v4935_v60 = vpop.eup %4934 }
 0x2d9   :  { %v1835_v46 = vsub.f32 0.0, %v4935_v60 }
 0x2da   :  { %v1707_v31 = vpop.f32.mrf.mxu2 }
 0x2db   :  { %v1708_v12 = vadd.f32 %v6182_v44, %v1707_v31  ;;  %1837 = vrot.lane.b32.xlu1 %v1835_v46, %s5136_s4 }
 0x2dd   :  { %1757 = vst.msk [vmem:[#allocation2 + $0xa8] sm:$0xff] %vm1735_vm1, %v1708_v12 }
 0x2e2   :  { %v1710_v39 = vpop.f32.mrf.mxu2 }
 0x2e3   :  { %v1711_v5 = vadd.f32 %v6182_v44, %v1710_v39 }
 0x2e5   :  { %1758 = vst.msk [vmem:[#allocation2 + $0xb0] sm:$0xff] %vm1735_vm1, %v1711_v5 }
 0x2ea   :  { %v1712_v22 = vpop.f32.mrf.mxu2 }
 0x2eb   :  { %v1713_v32 = vadd.f32 %v6182_v44, %v1712_v22 }
 0x2ed   :  { %1759 = vst.msk [vmem:[#allocation2 + $0xb8] sm:$0xff] %vm1735_vm1, %v1713_v32 }
 0x2f2   :  { %v1715_v33 = vpop.f32.mrf.mxu2 }
 0x2f3   :  { %v1716_v36 = vadd.f32 %v6182_v44, %v1715_v33 }
 0x2f5   :  { %1760 = vst.msk [vmem:[#allocation2 + $0xc0] sm:$0xff] %vm1735_vm1, %v1716_v36 }
 0x2fa   :  { %v1717_v43 = vpop.f32.mrf.mxu2 }
 0x2fb   :  { %v1718_v55 = vadd.f32 %v6182_v44, %v1717_v43 }
 0x2fd   :  { %1761 = vst.msk [vmem:[#allocation2 + $0xc8] sm:$0xff] %vm1735_vm1, %v1718_v55 }
 0x302   :  { %v1720_v37 = vpop.f32.mrf.mxu2 }
 0x303   :  { %v1721_v4 = vadd.f32 %v6182_v44, %v1720_v37 }
 0x305   :  { %1762 = vst.msk [vmem:[#allocation2 + $0xd0] sm:$0xff] %vm1735_vm1, %v1721_v4 }
 0x30a   :  { %v1722_v15 = vpop.f32.mrf.mxu2 }
 0x30b   :  { %v1723_v38 = vadd.f32 %v6182_v44, %v1722_v15 }
 0x30d   :  { %1763 = vst.msk [vmem:[#allocation2 + $0xd8] sm:$0xff] %vm1735_vm1, %v1723_v38 }
 0x312   :  { %v1725_v40 = vpop.f32.mrf.mxu2 }
 0x313   :  { %v1726_v57 = vadd.f32 %v6182_v44, %v1725_v40 }
 0x315   :  { %1764 = vst.msk [vmem:[#allocation2 + $0xe0] sm:$0xff] %vm1735_vm1, %v1726_v57 }
 0x31a   :  { %v1727_v28 = vpop.f32.mrf.mxu2 }
 0x31b   :  { %v1728_v6 = vadd.f32 %v6182_v44, %v1727_v28 }
 0x31d   :  { %1765 = vst.msk [vmem:[#allocation2 + $0xe8] sm:$0xff] %vm1735_vm1, %v1728_v6 }
 0x322   :  { %v1730_v58 = vpop.f32.mrf.mxu2 }
 0x323   :  { %v1731_v59 = vadd.f32 %v6182_v44, %v1730_v58 }
 0x325   :  { %1766 = vst.msk [vmem:[#allocation2 + $0xf0] sm:$0xff] %vm1735_vm1, %v1731_v59 }
 0x32a   :  { %v1732_v9 = vpop.f32.mrf.mxu2 }
 0x32b   :  { %v1733_v13 = vadd.f32 %v6182_v44, %v1732_v9  ;;  %v6307_v44 = vld [vmem:[%s6727_s5 + $0x18] sm:$0xff] }
 0x32d   :  { %1767 = vst.msk [vmem:[#allocation2 + $0xf8] sm:$0xff] %vm1735_vm1, %v1733_v13 }
 0x34d   :  { %v1838_v42 = vpop.permute.xlu1 %1837 }
 0x34e   :  { %v1840_v29 = vmul.f32 %v1838_v42, %v6215_v54  ;;  %v6313_v54 = vld [vmem:[%s6727_s5 + $0x10] sm:$0xff] }
 0x350   :  { %1842 = vrot.lane.b32.xlu2 %v1840_v29, %s5137_s21 }
 0x3aa   :  { %v1843_v61 = vpop.permute.xlu2 %1842 }
 0x3ab   :  { %v1845_v14 = vadd.f32 %v4935_v60, %v1843_v61  ;;  %v1915_v60 = vld [vmem:[#allocation2 + $0x10] sm:$0xff] }
 0x3ad   :  { %1848 = vrot.lane.b32.xlu2 %v1845_v14, %s5135_s3 }
 0x407   :  { %v1849_v20 = vpop.permute.xlu2 %1848 }
 0x408   :  { %4682 = vmatmul.msk.f32.vlgmr.msra.gmra.mxu3 %vm1774_vm6, %v1849_v20  ;;  %v1984_v20 = vld [vmem:[#allocation2 + $0x18] sm:$0xff] }
 0x409   :  { %2002 = vmatpush.msra.mxu3 %v6307_v44 }
 0x40b   :  { %2003 = vmatpush.msra.mxu3 %v6313_v54 }
 0x40d   :  { %2004 = vmatpush.msra.mxu3 %v6319_v62 }
 0x40f   :  { %2005 = vmatpush.msra.mxu3 %v6325_v0 }
 0x48b   :  { %v1869_v1 = vpop.f32.mrf.mxu3 }
 0x48c   :  { %v1892_v18 = vadd.f32 %v1869_v1, %v6773_v7  ;;  %v1872_v47 = vadd.f32 %v1869_v1, %v1846_v19 }
 0x48e   :  { %1894 = vrot.lane.b32.xlu0 %v1892_v18, %s5135_s3  ;;  %v4683_v63 = vmul.f32 -1.442695, %v1872_v47 }
 0x490   :  { %4936 = vpow2.f32 %v4683_v63 }
 0x496   :  { %v4937_v30 = vpop.eup %4936 }
 0x497   :  { %v1876_v8 = vadd.f32 1.0, %v4937_v30 }
 0x499   :  { %4938 = vrcp.f32 %v1876_v8  ;;  %v1888_v53 = vand.u32 2147483648, %v1876_v8  ;;  %vm1882_vm8 = vweird.f32 %v1876_v8  ;;  %v1886_v11 = vand.u32 2147483647, %v1876_v8 }
 0x49b   :  { %v1889_v26 = vor.u32 1.1754944e-38, %v1888_v53  ;;  %vm1887_vm10 = vcmp.eq.f32.partialorder %v1886_v11, 8.507059e+37 }
 0x49f   :  { %v4939_v17 = vpop.eup %4938 }
 0x4a0   :  { %v1878_v52 = vmul.f32 %v4939_v17, %v1876_v8  ;;  %vm1883_vm7 = vweird.f32 %v4939_v17 }
 0x4a1   :  { %vm1884_vm9 = vmor %vm1882_vm8, %vm1883_vm7 }
 0x4a2   :  { %v1879_v25 = vsub.f32 1.0, %v1878_v52 }
 0x4a4   :  { %v1880_v56 = vmul.f32 %v4939_v17, %v1879_v25 }
 0x4a6   :  { %v1881_v10 = vadd.f32 %v4939_v17, %v1880_v56 }
 0x4a8   :  { %v1885_v35 = vsel %vm1884_vm9, %v4939_v17, %v1881_v10 }
 0x4a9   :  { %v1890_v23 = vsel %vm1887_vm10, %v1889_v26, %v1885_v35 }
 0x500   :  { %v1895_v16 = vpop.permute.xlu0 %1894 }
 0x501   :  { %v1897_v24 = vmul.f32 %v1895_v16, %v1890_v23 }
 0x503   :  { %1899 = vrot.lane.b32.xlu1 %v1897_v24, %s5135_s3 }
 0x575   :  { %v1900_v45 = vpop.permute.xlu1 %1899 }
 0x576   :  { %v1902_v21 = vadd.f32 %v1900_v45, %v1846_v19 }
 0x578   :  { %4940 = vtanh.f32 %v1902_v21 }
 0x57e   :  { %v4941_v2 = vpop.eup %4940 }
 0x57f   :  { %v1904_v34 = vsub.f32 %v1845_v14, %v4941_v2 }
 0x581   :  { %1906 = vrot.lane.b32.xlu2 %v1904_v34, %s5136_s4 }
 0x5db   :  { %v1907_v41 = vpop.permute.xlu2 %1906 }
 0x5dc   :  { %v1909_v50 = vmul.f32 %v1907_v41, %v1890_v23 }
 0x5de   :  { %1911 = vrot.lane.b32.xlu0 %v1909_v50, %s5137_s21 }
 0x650   :  { %v1912_v51 = vpop.permute.xlu0 %1911 }
 0x651   :  { %v1914_v27 = vadd.f32 %v4941_v2, %v1912_v51 }
 0x653   :  { %1917 = vrot.lane.b32.xlu1 %v1914_v27, %s5135_s3 }
 0x6c5   :  { %v1918_v3 = vpop.permute.xlu1 %1917 }
 0x6c6   :  { %4684 = vmatmul.msk.f32.vlgmr.msrb.gmra.mxu3 %vm1774_vm6, %v1918_v3  ;;  %v2053_v3 = vld [vmem:[#allocation2 + $0x20] sm:$0xff] }
 0x6c7   :  { %2071 = vmatpush.msrb.mxu3 %v6307_v44 }
 0x6c9   :  { %2072 = vmatpush.msrb.mxu3 %v6313_v54 }
 0x6cb   :  { %2073 = vmatpush.msrb.mxu3 %v6319_v62 }
 0x6cd   :  { %2074 = vmatpush.msrb.mxu3 %v6325_v0 }
 0x749   :  { %v1938_v48 = vpop.f32.mrf.mxu3 }
 0x74a   :  { %v1961_v49 = vadd.f32 %v1938_v48, %v6773_v7  ;;  %v1941_v46 = vadd.f32 %v1938_v48, %v1915_v60 }
 0x74c   :  { %1963 = vrot.lane.b32.xlu2 %v1961_v49, %s5135_s3  ;;  %v4685_v31 = vmul.f32 -1.442695, %v1941_v46 }
 0x74e   :  { %4942 = vpow2.f32 %v4685_v31 }
 0x754   :  { %v4943_v12 = vpop.eup %4942 }
 0x755   :  { %v1945_v39 = vadd.f32 1.0, %v4943_v12 }
 0x757   :  { %4944 = vrcp.f32 %v1945_v39  ;;  %v1957_v43 = vand.u32 2147483648, %v1945_v39  ;;  %vm1951_vm12 = vweird.f32 %v1945_v39  ;;  %v1955_v55 = vand.u32 2147483647, %v1945_v39 }
 0x759   :  { %v1958_v4 = vor.u32 1.1754944e-38, %v1957_v43  ;;  %vm1956_vm14 = vcmp.eq.f32.partialorder %v1955_v55, 8.507059e+37 }
 0x75d   :  { %v4945_v5 = vpop.eup %4944 }
 0x75e   :  { %v1947_v22 = vmul.f32 %v4945_v5, %v1945_v39  ;;  %vm1952_vm11 = vweird.f32 %v4945_v5 }
 0x75f   :  { %vm1953_vm13 = vmor %vm1951_vm12, %vm1952_vm11 }
 0x760   :  { %v1948_v32 = vsub.f32 1.0, %v1947_v22 }
 0x762   :  { %v1949_v33 = vmul.f32 %v4945_v5, %v1948_v32 }
 0x764   :  { %v1950_v36 = vadd.f32 %v4945_v5, %v1949_v33 }
 0x766   :  { %v1954_v37 = vsel %vm1953_vm13, %v4945_v5, %v1950_v36 }
 0x767   :  { %v1959_v38 = vsel %vm1956_vm14, %v1958_v4, %v1954_v37 }
 0x7a6   :  { %v1964_v15 = vpop.permute.xlu2 %1963 }
 0x7a7   :  { %v1966_v40 = vmul.f32 %v1964_v15, %v1959_v38 }
 0x7a9   :  { %1968 = vrot.lane.b32.xlu0 %v1966_v40, %s5135_s3 }
 0x81b   :  { %v1969_v57 = vpop.permute.xlu0 %1968 }
 0x81c   :  { %v1971_v28 = vadd.f32 %v1969_v57, %v1915_v60 }
 0x81e   :  { %4946 = vtanh.f32 %v1971_v28 }
 0x824   :  { %v4947_v6 = vpop.eup %4946 }
 0x825   :  { %v1973_v58 = vsub.f32 %v1914_v27, %v4947_v6 }
 0x827   :  { %1975 = vrot.lane.b32.xlu1 %v1973_v58, %s5136_s4 }
 0x899   :  { %v1976_v59 = vpop.permute.xlu1 %1975 }
 0x89a   :  { %v1978_v9 = vmul.f32 %v1976_v59, %v1959_v38 }
 0x89c   :  { %1980 = vrot.lane.b32.xlu2 %v1978_v9, %s5137_s21 }
 0x8f6   :  { %v1981_v13 = vpop.permute.xlu2 %1980 }
 0x8f7   :  { %v1983_v42 = vadd.f32 %v4947_v6, %v1981_v13 }
 0x8f9   :  { %1986 = vrot.lane.b32.xlu0 %v1983_v42, %s5135_s3 }
 0x96b   :  { %v1987_v29 = vpop.permute.xlu0 %1986 }
 0x96c   :  { %4686 = vmatmul.msk.f32.vlgmr.msra.gmra.mxu3 %vm1774_vm6, %v1987_v29  ;;  %v2122_v29 = vld [vmem:[#allocation2 + $0x28] sm:$0xff] }
 0x96d   :  { %2140 = vmatpush.msra.mxu3 %v6307_v44 }
 0x96f   :  { %2141 = vmatpush.msra.mxu3 %v6313_v54 }
 0x971   :  { %2142 = vmatpush.msra.mxu3 %v6319_v62 }
 0x973   :  { %2143 = vmatpush.msra.mxu3 %v6325_v0 }
 0x9ef   :  { %v2007_v61 = vpop.f32.mrf.mxu3 }
 0x9f0   :  { %v2030_v14 = vadd.f32 %v2007_v61, %v6773_v7  ;;  %v2010_v1 = vadd.f32 %v2007_v61, %v1984_v20 }
 0x9f2   :  { %2032 = vrot.lane.b32.xlu1 %v2030_v14, %s5135_s3  ;;  %v4687_v18 = vmul.f32 -1.442695, %v2010_v1 }
 0x9f4   :  { %4948 = vpow2.f32 %v4687_v18 }
 0x9fa   :  { %v4949_v19 = vpop.eup %4948 }
 0x9fb   :  { %v2014_v47 = vadd.f32 1.0, %v4949_v19 }
 0x9fd   :  { %4950 = vrcp.f32 %v2014_v47  ;;  %v2026_v25 = vand.u32 2147483648, %v2014_v47  ;;  %vm2020_vm0 = vweird.f32 %v2014_v47  ;;  %v2024_v56 = vand.u32 2147483647, %v2014_v47 }
 0x9ff   :  { %v2027_v53 = vor.u32 1.1754944e-38, %v2026_v25  ;;  %vm2025_vm2 = vcmp.eq.f32.partialorder %v2024_v56, 8.507059e+37 }
 0xa03   :  { %v4951_v63 = vpop.eup %4950 }
 0xa04   :  { %v2016_v30 = vmul.f32 %v4951_v63, %v2014_v47  ;;  %vm2021_vm15 = vweird.f32 %v4951_v63 }
 0xa05   :  { %vm2022_vm1 = vmor %vm2020_vm0, %vm2021_vm15 }
 0xa06   :  { %v2017_v8 = vsub.f32 1.0, %v2016_v30 }
 0xa08   :  { %v2018_v17 = vmul.f32 %v4951_v63, %v2017_v8 }
 0xa0a   :  { %v2019_v52 = vadd.f32 %v4951_v63, %v2018_v17 }
 0xa0c   :  { %v2023_v10 = vsel %vm2022_vm1, %v4951_v63, %v2019_v52 }
 0xa0d   :  { %v2028_v35 = vsel %vm2025_vm2, %v2027_v53, %v2023_v10 }
 0xa64   :  { %v2033_v11 = vpop.permute.xlu1 %2032 }
 0xa65   :  { %v2035_v26 = vmul.f32 %v2033_v11, %v2028_v35 }
 0xa67   :  { %2037 = vrot.lane.b32.xlu2 %v2035_v26, %s5135_s3 }
 0xac1   :  { %v2038_v16 = vpop.permute.xlu2 %2037 }
 0xac2   :  { %v2040_v23 = vadd.f32 %v2038_v16, %v1984_v20 }
 0xac4   :  { %4952 = vtanh.f32 %v2040_v23 }
 0xaca   :  { %v4953_v24 = vpop.eup %4952 }
 0xacb   :  { %v2042_v45 = vsub.f32 %v1983_v42, %v4953_v24 }
 0xacd   :  { %2044 = vrot.lane.b32.xlu0 %v2042_v45, %s5136_s4 }
 0xb3f   :  { %v2045_v21 = vpop.permute.xlu0 %2044 }
 0xb40   :  { %v2047_v2 = vmul.f32 %v2045_v21, %v2028_v35 }
 0xb42   :  { %2049 = vrot.lane.b32.xlu1 %v2047_v2, %s5137_s21 }
 0xbb4   :  { %v2050_v34 = vpop.permute.xlu1 %2049 }
 0xbb5   :  { %v2052_v41 = vadd.f32 %v4953_v24, %v2050_v34 }
 0xbb7   :  { %2055 = vrot.lane.b32.xlu2 %v2052_v41, %s5135_s3 }
 0xc11   :  { %v2056_v50 = vpop.permute.xlu2 %2055 }
 0xc12   :  { %4688 = vmatmul.msk.f32.vlgmr.msrb.gmra.mxu3 %vm1774_vm6, %v2056_v50  ;;  %v2191_v50 = vld [vmem:[#allocation2 + $0x30] sm:$0xff] }
 0xc13   :  { %2209 = vmatpush.msrb.mxu3 %v6307_v44 }
 0xc15   :  { %2210 = vmatpush.msrb.mxu3 %v6313_v54 }
 0xc17   :  { %2211 = vmatpush.msrb.mxu3 %v6319_v62 }
 0xc19   :  { %2212 = vmatpush.msrb.mxu3 %v6325_v0 }
 0xc95   :  { %v2076_v51 = vpop.f32.mrf.mxu3 }
 0xc96   :  { %v2099_v27 = vadd.f32 %v2076_v51, %v6773_v7  ;;  %v2079_v48 = vadd.f32 %v2076_v51, %v2053_v3 }
 0xc98   :  { %2101 = vrot.lane.b32.xlu0 %v2099_v27, %s5135_s3  ;;  %v4689_v49 = vmul.f32 -1.442695, %v2079_v48 }
 0xc9a   :  { %4954 = vpow2.f32 %v4689_v49 }
 0xca0   :  { %v4955_v60 = vpop.eup %4954 }
 0xca1   :  { %v2083_v46 = vadd.f32 1.0, %v4955_v60 }
 0xca3   :  { %4956 = vrcp.f32 %v2083_v46  ;;  %v2095_v32 = vand.u32 2147483648, %v2083_v46  ;;  %vm2089_vm4 = vweird.f32 %v2083_v46  ;;  %v2093_v33 = vand.u32 2147483647, %v2083_v46 }
 0xca5   :  { %v2096_v43 = vor.u32 1.1754944e-38, %v2095_v32  ;;  %vm2094_vm7 = vcmp.eq.f32.partialorder %v2093_v33, 8.507059e+37 }
 0xca9   :  { %v4957_v31 = vpop.eup %4956 }
 0xcaa   :  { %v2085_v12 = vmul.f32 %v4957_v31, %v2083_v46  ;;  %vm2090_vm3 = vweird.f32 %v4957_v31 }
 0xcab   :  { %vm2091_vm5 = vmor %vm2089_vm4, %vm2090_vm3 }
 0xcac   :  { %v2086_v39 = vsub.f32 1.0, %v2085_v12 }
 0xcae   :  { %v2087_v5 = vmul.f32 %v4957_v31, %v2086_v39 }
 0xcb0   :  { %v2088_v22 = vadd.f32 %v4957_v31, %v2087_v5 }
 0xcb2   :  { %v2092_v36 = vsel %vm2091_vm5, %v4957_v31, %v2088_v22 }
 0xcb3   :  { %v2097_v37 = vsel %vm2094_vm7, %v2096_v43, %v2092_v36 }
 0xd0a   :  { %v2102_v55 = vpop.permute.xlu0 %2101 }
 0xd0b   :  { %v2104_v4 = vmul.f32 %v2102_v55, %v2097_v37 }
 0xd0d   :  { %2106 = vrot.lane.b32.xlu1 %v2104_v4, %s5135_s3 }
 0xd7f   :  { %v2107_v15 = vpop.permute.xlu1 %2106 }
 0xd80   :  { %v2109_v38 = vadd.f32 %v2107_v15, %v2053_v3 }
 0xd82   :  { %4958 = vtanh.f32 %v2109_v38 }
 0xd88   :  { %v4959_v40 = vpop.eup %4958 }
 0xd89   :  { %v2111_v57 = vsub.f32 %v2052_v41, %v4959_v40 }
 0xd8b   :  { %2113 = vrot.lane.b32.xlu2 %v2111_v57, %s5136_s4 }
 0xde5   :  { %v2114_v28 = vpop.permute.xlu2 %2113 }
 0xde6   :  { %v2116_v6 = vmul.f32 %v2114_v28, %v2097_v37 }
 0xde8   :  { %2118 = vrot.lane.b32.xlu0 %v2116_v6, %s5137_s21 }
 0xe5a   :  { %v2119_v58 = vpop.permute.xlu0 %2118 }
 0xe5b   :  { %v2121_v59 = vadd.f32 %v4959_v40, %v2119_v58 }
 0xe5d   :  { %2124 = vrot.lane.b32.xlu1 %v2121_v59, %s5135_s3 }
 0xecf   :  { %v2125_v9 = vpop.permute.xlu1 %2124 }
 0xed0   :  { %4690 = vmatmul.msk.f32.vlgmr.msra.gmra.mxu3 %vm1774_vm6, %v2125_v9  ;;  %v2260_v9 = vld [vmem:[#allocation2 + $0x38] sm:$0xff] }
 0xed1   :  { %2278 = vmatpush.msra.mxu3 %v6307_v44 }
 0xed3   :  { %2279 = vmatpush.msra.mxu3 %v6313_v54 }
 0xed5   :  { %2280 = vmatpush.msra.mxu3 %v6319_v62 }
 0xed7   :  { %2281 = vmatpush.msra.mxu3 %v6325_v0 }
 0xf53   :  { %v2145_v13 = vpop.f32.mrf.mxu3 }
 0xf54   :  { %v2168_v42 = vadd.f32 %v2145_v13, %v6773_v7  ;;  %v2148_v61 = vadd.f32 %v2145_v13, %v2122_v29 }
 0xf56   :  { %2170 = vrot.lane.b32.xlu2 %v2168_v42, %s5135_s3  ;;  %v4691_v14 = vmul.f32 -1.442695, %v2148_v61 }
 0xf58   :  { %4960 = vpow2.f32 %v4691_v14 }
 0xf5e   :  { %v4961_v20 = vpop.eup %4960 }
 0xf5f   :  { %v2152_v1 = vadd.f32 1.0, %v4961_v20 }
 0xf61   :  { %4962 = vrcp.f32 %v2152_v1  ;;  %v2164_v8 = vand.u32 2147483648, %v2152_v1  ;;  %vm2158_vm9 = vweird.f32 %v2152_v1  ;;  %v2162_v17 = vand.u32 2147483647, %v2152_v1 }
 0xf63   :  { %v2165_v25 = vor.u32 1.1754944e-38, %v2164_v8  ;;  %vm2163_vm11 = vcmp.eq.f32.partialorder %v2162_v17, 8.507059e+37 }
 0xf67   :  { %v4963_v18 = vpop.eup %4962 }
 0xf68   :  { %v2154_v19 = vmul.f32 %v4963_v18, %v2152_v1  ;;  %vm2159_vm8 = vweird.f32 %v4963_v18 }
 0xf69   :  { %vm2160_vm10 = vmor %vm2158_vm9, %vm2159_vm8 }
 0xf6a   :  { %v2155_v47 = vsub.f32 1.0, %v2154_v19 }
 0xf6c   :  { %v2156_v63 = vmul.f32 %v4963_v18, %v2155_v47 }
 0xf6e   :  { %v2157_v30 = vadd.f32 %v4963_v18, %v2156_v63 }
 0xf70   :  { %v2161_v52 = vsel %vm2160_vm10, %v4963_v18, %v2157_v30 }
 0xf71   :  { %v2166_v10 = vsel %vm2163_vm11, %v2165_v25, %v2161_v52 }
 0xfb0   :  { %v2171_v56 = vpop.permute.xlu2 %2170 }
 0xfb1   :  { %v2173_v53 = vmul.f32 %v2171_v56, %v2166_v10 }
 0xfb3   :  { %2175 = vrot.lane.b32.xlu0 %v2173_v53, %s5135_s3 }
0x1025   :  { %v2176_v11 = vpop.permute.xlu0 %2175 }
0x1026   :  { %v2178_v35 = vadd.f32 %v2176_v11, %v2122_v29 }
0x1028   :  { %4964 = vtanh.f32 %v2178_v35 }
0x102e   :  { %v4965_v26 = vpop.eup %4964 }
0x102f   :  { %v2180_v16 = vsub.f32 %v2121_v59, %v4965_v26 }
0x1031   :  { %2182 = vrot.lane.b32.xlu1 %v2180_v16, %s5136_s4 }
0x10a3   :  { %v2183_v23 = vpop.permute.xlu1 %2182 }
0x10a4   :  { %v2185_v24 = vmul.f32 %v2183_v23, %v2166_v10 }
0x10a6   :  { %2187 = vrot.lane.b32.xlu2 %v2185_v24, %s5137_s21 }
0x1100   :  { %v2188_v45 = vpop.permute.xlu2 %2187 }
0x1101   :  { %v2190_v21 = vadd.f32 %v4965_v26, %v2188_v45 }
0x1103   :  { %2193 = vrot.lane.b32.xlu0 %v2190_v21, %s5135_s3 }
0x1175   :  { %v2194_v2 = vpop.permute.xlu0 %2193 }
0x1176   :  { %4692 = vmatmul.msk.f32.vlgmr.msrb.gmra.mxu3 %vm1774_vm6, %v2194_v2  ;;  %v2329_v2 = vld [vmem:[#allocation2 + $0x40] sm:$0xff] }
0x1177   :  { %2347 = vmatpush.msrb.mxu3 %v6307_v44 }
0x1179   :  { %2348 = vmatpush.msrb.mxu3 %v6313_v54 }
0x117b   :  { %2349 = vmatpush.msrb.mxu3 %v6319_v62 }
0x117d   :  { %2350 = vmatpush.msrb.mxu3 %v6325_v0 }
0x11f9   :  { %v2214_v34 = vpop.f32.mrf.mxu3 }
0x11fa   :  { %v2237_v41 = vadd.f32 %v2214_v34, %v6773_v7  ;;  %v2217_v51 = vadd.f32 %v2214_v34, %v2191_v50 }
0x11fc   :  { %2239 = vrot.lane.b32.xlu1 %v2237_v41, %s5135_s3  ;;  %v4693_v27 = vmul.f32 -1.442695, %v2217_v51 }
0x11fe   :  { %4966 = vpow2.f32 %v4693_v27 }
0x1204   :  { %v4967_v3 = vpop.eup %4966 }
0x1205   :  { %v2221_v48 = vadd.f32 1.0, %v4967_v3 }
0x1207   :  { %4968 = vrcp.f32 %v2221_v48  ;;  %v2233_v39 = vand.u32 2147483648, %v2221_v48  ;;  %vm2227_vm13 = vweird.f32 %v2221_v48  ;;  %v2231_v5 = vand.u32 2147483647, %v2221_v48 }
0x1209   :  { %v2234_v32 = vor.u32 1.1754944e-38, %v2233_v39  ;;  %vm2232_vm15 = vcmp.eq.f32.partialorder %v2231_v5, 8.507059e+37 }
0x120d   :  { %v4969_v49 = vpop.eup %4968 }
0x120e   :  { %v2223_v60 = vmul.f32 %v4969_v49, %v2221_v48  ;;  %vm2228_vm12 = vweird.f32 %v4969_v49 }
0x120f   :  { %vm2229_vm14 = vmor %vm2227_vm13, %vm2228_vm12 }
0x1210   :  { %v2224_v46 = vsub.f32 1.0, %v2223_v60 }
0x1212   :  { %v2225_v31 = vmul.f32 %v4969_v49, %v2224_v46 }
0x1214   :  { %v2226_v12 = vadd.f32 %v4969_v49, %v2225_v31 }
0x1216   :  { %v2230_v22 = vsel %vm2229_vm14, %v4969_v49, %v2226_v12 }
0x1217   :  { %v2235_v36 = vsel %vm2232_vm15, %v2234_v32, %v2230_v22 }
0x126e   :  { %v2240_v33 = vpop.permute.xlu1 %2239 }
0x126f   :  { %v2242_v43 = vmul.f32 %v2240_v33, %v2235_v36 }
0x1271   :  { %2244 = vrot.lane.b32.xlu2 %v2242_v43, %s5135_s3 }
0x12cb   :  { %v2245_v55 = vpop.permute.xlu2 %2244 }
0x12cc   :  { %v2247_v37 = vadd.f32 %v2245_v55, %v2191_v50 }
0x12ce   :  { %4970 = vtanh.f32 %v2247_v37 }
0x12d4   :  { %v4971_v4 = vpop.eup %4970 }
0x12d5   :  { %v2249_v15 = vsub.f32 %v2190_v21, %v4971_v4 }
0x12d7   :  { %2251 = vrot.lane.b32.xlu0 %v2249_v15, %s5136_s4 }
0x1349   :  { %v2252_v38 = vpop.permute.xlu0 %2251 }
0x134a   :  { %v2254_v40 = vmul.f32 %v2252_v38, %v2235_v36 }
0x134c   :  { %2256 = vrot.lane.b32.xlu1 %v2254_v40, %s5137_s21 }
0x13be   :  { %v2257_v57 = vpop.permute.xlu1 %2256 }
0x13bf   :  { %v2259_v28 = vadd.f32 %v4971_v4, %v2257_v57 }
0x13c1   :  { %2262 = vrot.lane.b32.xlu2 %v2259_v28, %s5135_s3 }
0x141b   :  { %v2263_v6 = vpop.permute.xlu2 %2262 }
0x141c   :  { %4694 = vmatmul.msk.f32.vlgmr.msra.gmra.mxu3 %vm1774_vm6, %v2263_v6  ;;  %v2398_v6 = vld [vmem:[#allocation2 + $0x48] sm:$0xff] }
0x141d   :  { %2416 = vmatpush.msra.mxu3 %v6307_v44 }
0x141f   :  { %2417 = vmatpush.msra.mxu3 %v6313_v54 }
0x1421   :  { %2418 = vmatpush.msra.mxu3 %v6319_v62 }
0x1423   :  { %2419 = vmatpush.msra.mxu3 %v6325_v0 }
0x149f   :  { %v2283_v58 = vpop.f32.mrf.mxu3 }
0x14a0   :  { %v2306_v59 = vadd.f32 %v2283_v58, %v6773_v7  ;;  %v2286_v13 = vadd.f32 %v2283_v58, %v2260_v9 }
0x14a2   :  { %2308 = vrot.lane.b32.xlu0 %v2306_v59, %s5135_s3  ;;  %v4695_v42 = vmul.f32 -1.442695, %v2286_v13 }
0x14a4   :  { %4972 = vpow2.f32 %v4695_v42 }
0x14aa   :  { %v4973_v29 = vpop.eup %4972 }
0x14ab   :  { %v2290_v61 = vadd.f32 1.0, %v4973_v29 }
0x14ad   :  { %4974 = vrcp.f32 %v2290_v61  ;;  %v2302_v47 = vand.u32 2147483648, %v2290_v61  ;;  %vm2296_vm1 = vweird.f32 %v2290_v61  ;;  %v2300_v63 = vand.u32 2147483647, %v2290_v61 }
0x14af   :  { %v2303_v8 = vor.u32 1.1754944e-38, %v2302_v47  ;;  %vm2301_vm3 = vcmp.eq.f32.partialorder %v2300_v63, 8.507059e+37 }
0x14b3   :  { %v4975_v14 = vpop.eup %4974 }
0x14b4   :  { %v2292_v20 = vmul.f32 %v4975_v14, %v2290_v61  ;;  %vm2297_vm0 = vweird.f32 %v4975_v14 }
0x14b5   :  { %vm2298_vm2 = vmor %vm2296_vm1, %vm2297_vm0 }
0x14b6   :  { %v2293_v1 = vsub.f32 1.0, %v2292_v20 }
0x14b8   :  { %v2294_v18 = vmul.f32 %v4975_v14, %v2293_v1 }
0x14ba   :  { %v2295_v19 = vadd.f32 %v4975_v14, %v2294_v18 }
0x14bc   :  { %v2299_v30 = vsel %vm2298_vm2, %v4975_v14, %v2295_v19 }
0x14bd   :  { %v2304_v52 = vsel %vm2301_vm3, %v2303_v8, %v2299_v30 }
0x1514   :  { %v2309_v17 = vpop.permute.xlu0 %2308 }
0x1515   :  { %v2311_v25 = vmul.f32 %v2309_v17, %v2304_v52 }
0x1517   :  { %2313 = vrot.lane.b32.xlu1 %v2311_v25, %s5135_s3 }
0x1589   :  { %v2314_v56 = vpop.permute.xlu1 %2313 }
0x158a   :  { %v2316_v10 = vadd.f32 %v2314_v56, %v2260_v9 }
0x158c   :  { %4976 = vtanh.f32 %v2316_v10 }
0x1592   :  { %v4977_v53 = vpop.eup %4976 }
0x1593   :  { %v2318_v11 = vsub.f32 %v2259_v28, %v4977_v53 }
0x1595   :  { %2320 = vrot.lane.b32.xlu2 %v2318_v11, %s5136_s4 }
0x15ef   :  { %v2321_v35 = vpop.permute.xlu2 %2320 }
0x15f0   :  { %v2323_v26 = vmul.f32 %v2321_v35, %v2304_v52 }
0x15f2   :  { %2325 = vrot.lane.b32.xlu0 %v2323_v26, %s5137_s21 }
0x1664   :  { %v2326_v16 = vpop.permute.xlu0 %2325 }
0x1665   :  { %v2328_v23 = vadd.f32 %v4977_v53, %v2326_v16 }
0x1667   :  { %2331 = vrot.lane.b32.xlu1 %v2328_v23, %s5135_s3 }
0x16d9   :  { %v2332_v24 = vpop.permute.xlu1 %2331 }
0x16da   :  { %4696 = vmatmul.msk.f32.vlgmr.msrb.gmra.mxu3 %vm1774_vm6, %v2332_v24  ;;  %v2467_v24 = vld [vmem:[#allocation2 + $0x50] sm:$0xff] }
0x16db   :  { %2485 = vmatpush.msrb.mxu3 %v6307_v44 }
0x16dd   :  { %2486 = vmatpush.msrb.mxu3 %v6313_v54 }
0x16df   :  { %2487 = vmatpush.msrb.mxu3 %v6319_v62 }
0x16e1   :  { %2488 = vmatpush.msrb.mxu3 %v6325_v0 }
0x175d   :  { %v2352_v45 = vpop.f32.mrf.mxu3 }
0x175e   :  { %v2375_v21 = vadd.f32 %v2352_v45, %v6773_v7  ;;  %v2355_v34 = vadd.f32 %v2352_v45, %v2329_v2 }
0x1760   :  { %2377 = vrot.lane.b32.xlu2 %v2375_v21, %s5135_s3  ;;  %v4697_v41 = vmul.f32 -1.442695, %v2355_v34 }
0x1762   :  { %4978 = vpow2.f32 %v4697_v41 }
0x1768   :  { %v4979_v50 = vpop.eup %4978 }
0x1769   :  { %v2359_v51 = vadd.f32 1.0, %v4979_v50 }
0x176b   :  { %4980 = vrcp.f32 %v2359_v51  ;;  %v2371_v46 = vand.u32 2147483648, %v2359_v51  ;;  %vm2365_vm5 = vweird.f32 %v2359_v51  ;;  %v2369_v31 = vand.u32 2147483647, %v2359_v51 }
0x176d   :  { %v2372_v39 = vor.u32 1.1754944e-38, %v2371_v46  ;;  %vm2370_vm8 = vcmp.eq.f32.partialorder %v2369_v31, 8.507059e+37 }
0x1771   :  { %v4981_v27 = vpop.eup %4980 }
0x1772   :  { %v2361_v3 = vmul.f32 %v4981_v27, %v2359_v51  ;;  %vm2366_vm4 = vweird.f32 %v4981_v27 }
0x1773   :  { %vm2367_vm7 = vmor %vm2365_vm5, %vm2366_vm4 }
0x1774   :  { %v2362_v48 = vsub.f32 1.0, %v2361_v3 }
0x1776   :  { %v2363_v49 = vmul.f32 %v4981_v27, %v2362_v48 }
0x1778   :  { %v2364_v60 = vadd.f32 %v4981_v27, %v2363_v49 }
0x177a   :  { %v2368_v12 = vsel %vm2367_vm7, %v4981_v27, %v2364_v60 }
0x177b   :  { %v2373_v22 = vsel %vm2370_vm8, %v2372_v39, %v2368_v12 }
0x17ba   :  { %v2378_v5 = vpop.permute.xlu2 %2377 }
0x17bb   :  { %v2380_v32 = vmul.f32 %v2378_v5, %v2373_v22 }
0x17bd   :  { %2382 = vrot.lane.b32.xlu0 %v2380_v32, %s5135_s3 }
0x182f   :  { %v2383_v33 = vpop.permute.xlu0 %2382 }
0x1830   :  { %v2385_v36 = vadd.f32 %v2383_v33, %v2329_v2 }
0x1832   :  { %4982 = vtanh.f32 %v2385_v36 }
0x1838   :  { %v4983_v43 = vpop.eup %4982 }
0x1839   :  { %v2387_v55 = vsub.f32 %v2328_v23, %v4983_v43 }
0x183b   :  { %2389 = vrot.lane.b32.xlu1 %v2387_v55, %s5136_s4 }
0x18ad   :  { %v2390_v37 = vpop.permute.xlu1 %2389 }
0x18ae   :  { %v2392_v4 = vmul.f32 %v2390_v37, %v2373_v22 }
0x18b0   :  { %2394 = vrot.lane.b32.xlu2 %v2392_v4, %s5137_s21 }
0x190a   :  { %v2395_v15 = vpop.permute.xlu2 %2394 }
0x190b   :  { %v2397_v38 = vadd.f32 %v4983_v43, %v2395_v15 }
0x190d   :  { %2400 = vrot.lane.b32.xlu0 %v2397_v38, %s5135_s3 }
0x197f   :  { %v2401_v40 = vpop.permute.xlu0 %2400 }
0x1980   :  { %4698 = vmatmul.msk.f32.vlgmr.msra.gmra.mxu3 %vm1774_vm6, %v2401_v40  ;;  %v2536_v40 = vld [vmem:[#allocation2 + $0x58] sm:$0xff] }
0x1981   :  { %2554 = vmatpush.msra.mxu3 %v6307_v44 }
0x1983   :  { %2555 = vmatpush.msra.mxu3 %v6313_v54 }
0x1985   :  { %2556 = vmatpush.msra.mxu3 %v6319_v62 }
0x1987   :  { %2557 = vmatpush.msra.mxu3 %v6325_v0 }
0x1a03   :  { %v2421_v57 = vpop.f32.mrf.mxu3 }
0x1a04   :  { %v2444_v28 = vadd.f32 %v2421_v57, %v6773_v7  ;;  %v2424_v58 = vadd.f32 %v2421_v57, %v2398_v6 }
0x1a06   :  { %2446 = vrot.lane.b32.xlu1 %v2444_v28, %s5135_s3  ;;  %v4699_v59 = vmul.f32 -1.442695, %v2424_v58 }
0x1a08   :  { %4984 = vpow2.f32 %v4699_v59 }
0x1a0e   :  { %v4985_v9 = vpop.eup %4984 }
0x1a0f   :  { %v2428_v13 = vadd.f32 1.0, %v4985_v9 }
0x1a11   :  { %4986 = vrcp.f32 %v2428_v13  ;;  %v2440_v1 = vand.u32 2147483648, %v2428_v13  ;;  %vm2434_vm10 = vweird.f32 %v2428_v13  ;;  %v2438_v18 = vand.u32 2147483647, %v2428_v13 }
0x1a13   :  { %v2441_v47 = vor.u32 1.1754944e-38, %v2440_v1  ;;  %vm2439_vm12 = vcmp.eq.f32.partialorder %v2438_v18, 8.507059e+37 }
0x1a17   :  { %v4987_v42 = vpop.eup %4986 }
0x1a18   :  { %v2430_v29 = vmul.f32 %v4987_v42, %v2428_v13  ;;  %vm2435_vm9 = vweird.f32 %v4987_v42 }
0x1a19   :  { %vm2436_vm11 = vmor %vm2434_vm10, %vm2435_vm9 }
0x1a1a   :  { %v2431_v61 = vsub.f32 1.0, %v2430_v29 }
0x1a1c   :  { %v2432_v14 = vmul.f32 %v4987_v42, %v2431_v61 }
0x1a1e   :  { %v2433_v20 = vadd.f32 %v4987_v42, %v2432_v14 }
0x1a20   :  { %v2437_v19 = vsel %vm2436_vm11, %v4987_v42, %v2433_v20 }
0x1a21   :  { %v2442_v30 = vsel %vm2439_vm12, %v2441_v47, %v2437_v19 }
0x1a78   :  { %v2447_v63 = vpop.permute.xlu1 %2446 }
0x1a79   :  { %v2449_v8 = vmul.f32 %v2447_v63, %v2442_v30 }
0x1a7b   :  { %2451 = vrot.lane.b32.xlu2 %v2449_v8, %s5135_s3 }
0x1ad5   :  { %v2452_v17 = vpop.permute.xlu2 %2451 }
0x1ad6   :  { %v2454_v52 = vadd.f32 %v2452_v17, %v2398_v6 }
0x1ad8   :  { %4988 = vtanh.f32 %v2454_v52 }
0x1ade   :  { %v4989_v25 = vpop.eup %4988 }
0x1adf   :  { %v2456_v56 = vsub.f32 %v2397_v38, %v4989_v25 }
0x1ae1   :  { %2458 = vrot.lane.b32.xlu0 %v2456_v56, %s5136_s4 }
0x1b53   :  { %v2459_v10 = vpop.permute.xlu0 %2458 }
0x1b54   :  { %v2461_v53 = vmul.f32 %v2459_v10, %v2442_v30 }
0x1b56   :  { %2463 = vrot.lane.b32.xlu1 %v2461_v53, %s5137_s21 }
0x1bc8   :  { %v2464_v11 = vpop.permute.xlu1 %2463 }
0x1bc9   :  { %v2466_v35 = vadd.f32 %v4989_v25, %v2464_v11 }
0x1bcb   :  { %2469 = vrot.lane.b32.xlu2 %v2466_v35, %s5135_s3 }
0x1c25   :  { %v2470_v26 = vpop.permute.xlu2 %2469 }
0x1c26   :  { %4700 = vmatmul.msk.f32.vlgmr.msrb.gmra.mxu3 %vm1774_vm6, %v2470_v26  ;;  %v2605_v26 = vld [vmem:[#allocation2 + $0x60] sm:$0xff] }
0x1c27   :  { %2623 = vmatpush.msrb.mxu3 %v6307_v44 }
0x1c29   :  { %2624 = vmatpush.msrb.mxu3 %v6313_v54 }
0x1c2b   :  { %2625 = vmatpush.msrb.mxu3 %v6319_v62 }
0x1c2d   :  { %2626 = vmatpush.msrb.mxu3 %v6325_v0 }
0x1ca9   :  { %v2490_v16 = vpop.f32.mrf.mxu3 }
0x1caa   :  { %v2513_v23 = vadd.f32 %v2490_v16, %v6773_v7  ;;  %v2493_v45 = vadd.f32 %v2490_v16, %v2467_v24 }
0x1cac   :  { %2515 = vrot.lane.b32.xlu0 %v2513_v23, %s5135_s3  ;;  %v4701_v21 = vmul.f32 -1.442695, %v2493_v45 }
0x1cae   :  { %4990 = vpow2.f32 %v4701_v21 }
0x1cb4   :  { %v4991_v2 = vpop.eup %4990 }
0x1cb5   :  { %v2497_v34 = vadd.f32 1.0, %v4991_v2 }
0x1cb7   :  { %4992 = vrcp.f32 %v2497_v34  ;;  %v2509_v48 = vand.u32 2147483648, %v2497_v34  ;;  %vm2503_vm14 = vweird.f32 %v2497_v34  ;;  %v2507_v49 = vand.u32 2147483647, %v2497_v34 }
0x1cb9   :  { %v2510_v46 = vor.u32 1.1754944e-38, %v2509_v48  ;;  %vm2508_vm0 = vcmp.eq.f32.partialorder %v2507_v49, 8.507059e+37 }
0x1cbd   :  { %v4993_v41 = vpop.eup %4992 }
0x1cbe   :  { %v2499_v50 = vmul.f32 %v4993_v41, %v2497_v34  ;;  %vm2504_vm13 = vweird.f32 %v4993_v41 }
0x1cbf   :  { %vm2505_vm15 = vmor %vm2503_vm14, %vm2504_vm13 }
0x1cc0   :  { %v2500_v51 = vsub.f32 1.0, %v2499_v50 }
0x1cc2   :  { %v2501_v27 = vmul.f32 %v4993_v41, %v2500_v51 }
0x1cc4   :  { %v2502_v3 = vadd.f32 %v4993_v41, %v2501_v27 }
0x1cc6   :  { %v2506_v60 = vsel %vm2505_vm15, %v4993_v41, %v2502_v3 }
0x1cc7   :  { %v2511_v12 = vsel %vm2508_vm0, %v2510_v46, %v2506_v60 }
0x1d1e   :  { %v2516_v31 = vpop.permute.xlu0 %2515 }
0x1d1f   :  { %v2518_v39 = vmul.f32 %v2516_v31, %v2511_v12 }
0x1d21   :  { %2520 = vrot.lane.b32.xlu1 %v2518_v39, %s5135_s3 }
0x1d93   :  { %v2521_v5 = vpop.permute.xlu1 %2520 }
0x1d94   :  { %v2523_v22 = vadd.f32 %v2521_v5, %v2467_v24 }
0x1d96   :  { %4994 = vtanh.f32 %v2523_v22 }
0x1d9c   :  { %v4995_v32 = vpop.eup %4994 }
0x1d9d   :  { %v2525_v33 = vsub.f32 %v2466_v35, %v4995_v32 }
0x1d9f   :  { %2527 = vrot.lane.b32.xlu2 %v2525_v33, %s5136_s4  ;;  %v6465_v33 = vld [vmem:[%s6727_s5 + $0x10] sm:$0xff] }
0x1df9   :  { %v2528_v36 = vpop.permute.xlu2 %2527 }
0x1dfa   :  { %v2530_v43 = vmul.f32 %v2528_v36, %v2511_v12  ;;  %v6471_v36 = vld [vmem:[%s6727_s5 + $0x8] sm:$0xff] }
0x1dfc   :  { %2532 = vrot.lane.b32.xlu0 %v2530_v43, %s5137_s21  ;;  %v6477_v43 = vld [vmem:[%s6727_s5] sm:$0xff] }
0x1e6e   :  { %v2533_v55 = vpop.permute.xlu0 %2532 }
0x1e6f   :  { %v2535_v37 = vadd.f32 %v4995_v32, %v2533_v55  ;;  %v6459_v32 = vld [vmem:[%s6727_s5 + $0x18] sm:$0xff] }
0x1e71   :  { %2538 = vrot.lane.b32.xlu1 %v2535_v37, %s5135_s3 }
0x1ee3   :  { %v2539_v4 = vpop.permute.xlu1 %2538 }
0x1ee4   :  { %4702 = vmatmul.msk.f32.vlgmr.msra.gmra.mxu3 %vm1774_vm6, %v2539_v4  ;;  %v2674_v4 = vld [vmem:[#allocation2 + $0x68] sm:$0xff] }
0x1ee5   :  { %2692 = vmatpush.msra.mxu3 %v6307_v44 }
0x1ee7   :  { %2693 = vmatpush.msra.mxu3 %v6313_v54 }
0x1ee9   :  { %2694 = vmatpush.msra.mxu3 %v6319_v62 }
0x1eeb   :  { %2695 = vmatpush.msra.mxu3 %v6325_v0 }
0x1f67   :  { %v2559_v15 = vpop.f32.mrf.mxu3 }
0x1f68   :  { %v2582_v38 = vadd.f32 %v2559_v15, %v6773_v7  ;;  %v2562_v57 = vadd.f32 %v2559_v15, %v2536_v40 }
0x1f6a   :  { %2584 = vrot.lane.b32.xlu2 %v2582_v38, %s5135_s3  ;;  %v4703_v28 = vmul.f32 -1.442695, %v2562_v57 }
0x1f6c   :  { %4996 = vpow2.f32 %v4703_v28 }
0x1f72   :  { %v4997_v6 = vpop.eup %4996 }
0x1f73   :  { %v2566_v58 = vadd.f32 1.0, %v4997_v6 }
0x1f75   :  { %4998 = vrcp.f32 %v2566_v58  ;;  %v2578_v61 = vand.u32 2147483648, %v2566_v58  ;;  %vm2572_vm2 = vweird.f32 %v2566_v58  ;;  %v2576_v14 = vand.u32 2147483647, %v2566_v58 }
0x1f77   :  { %v2579_v1 = vor.u32 1.1754944e-38, %v2578_v61  ;;  %vm2577_vm4 = vcmp.eq.f32.partialorder %v2576_v14, 8.507059e+37 }
0x1f7b   :  { %v4999_v59 = vpop.eup %4998 }
0x1f7c   :  { %v2568_v9 = vmul.f32 %v4999_v59, %v2566_v58  ;;  %vm2573_vm1 = vweird.f32 %v4999_v59 }
0x1f7d   :  { %vm2574_vm3 = vmor %vm2572_vm2, %vm2573_vm1 }
0x1f7e   :  { %v2569_v13 = vsub.f32 1.0, %v2568_v9 }
0x1f80   :  { %v2570_v42 = vmul.f32 %v4999_v59, %v2569_v13 }
0x1f82   :  { %v2571_v29 = vadd.f32 %v4999_v59, %v2570_v42 }
0x1f84   :  { %v2575_v20 = vsel %vm2574_vm3, %v4999_v59, %v2571_v29 }
0x1f85   :  { %v2580_v19 = vsel %vm2577_vm4, %v2579_v1, %v2575_v20 }
0x1fc4   :  { %v2585_v18 = vpop.permute.xlu2 %2584 }
0x1fc5   :  { %v2587_v47 = vmul.f32 %v2585_v18, %v2580_v19 }
0x1fc7   :  { %2589 = vrot.lane.b32.xlu0 %v2587_v47, %s5135_s3 }
0x2039   :  { %v2590_v63 = vpop.permute.xlu0 %2589 }
0x203a   :  { %v2592_v30 = vadd.f32 %v2590_v63, %v2536_v40 }
0x203c   :  { %5000 = vtanh.f32 %v2592_v30 }
0x2042   :  { %v5001_v8 = vpop.eup %5000 }
0x2043   :  { %v2594_v17 = vsub.f32 %v2535_v37, %v5001_v8 }
0x2045   :  { %2596 = vrot.lane.b32.xlu1 %v2594_v17, %s5136_s4 }
0x20b7   :  { %v2597_v52 = vpop.permute.xlu1 %2596 }
0x20b8   :  { %v2599_v25 = vmul.f32 %v2597_v52, %v2580_v19 }
0x20ba   :  { %2601 = vrot.lane.b32.xlu2 %v2599_v25, %s5137_s21 }
0x2114   :  { %v2602_v56 = vpop.permute.xlu2 %2601 }
0x2115   :  { %v2604_v10 = vadd.f32 %v5001_v8, %v2602_v56 }
0x2117   :  { %2607 = vrot.lane.b32.xlu0 %v2604_v10, %s5135_s3 }
0x2189   :  { %v2608_v53 = vpop.permute.xlu0 %2607 }
0x218a   :  { %4704 = vmatmul.msk.f32.vlgmr.msrb.gmra.mxu3 %vm1774_vm6, %v2608_v53  ;;  %v2743_v53 = vld [vmem:[#allocation2 + $0x70] sm:$0xff] }
0x218b   :  { %2761 = vmatpush.msrb.mxu3 %v6307_v44 }
0x218d   :  { %2762 = vmatpush.msrb.mxu3 %v6313_v54 }
0x218f   :  { %2763 = vmatpush.msrb.mxu3 %v6319_v62 }
0x2191   :  { %2764 = vmatpush.msrb.mxu3 %v6325_v0 }
0x220d   :  { %v2628_v11 = vpop.f32.mrf.mxu3 }
0x220e   :  { %v2651_v35 = vadd.f32 %v2628_v11, %v6773_v7  ;;  %v2631_v16 = vadd.f32 %v2628_v11, %v2605_v26 }
0x2210   :  { %2653 = vrot.lane.b32.xlu1 %v2651_v35, %s5135_s3  ;;  %v4705_v23 = vmul.f32 -1.442695, %v2631_v16 }
0x2212   :  { %5002 = vpow2.f32 %v4705_v23 }
0x2218   :  { %v5003_v24 = vpop.eup %5002 }
0x2219   :  { %v2635_v45 = vadd.f32 1.0, %v5003_v24 }
0x221b   :  { %5004 = vrcp.f32 %v2635_v45  ;;  %v2647_v62 = vand.u32 2147483648, %v2635_v45  ;;  %vm2641_vm7 = vweird.f32 %v2635_v45  ;;  %v2645_v0 = vand.u32 2147483647, %v2635_v45 }
0x221d   :  { %v2648_v50 = vor.u32 1.1754944e-38, %v2647_v62  ;;  %vm2646_vm9 = vcmp.eq.f32.partialorder %v2645_v0, 8.507059e+37 }
0x2221   :  { %v5005_v21 = vpop.eup %5004 }
0x2222   :  { %v2637_v44 = vmul.f32 %v5005_v21, %v2635_v45  ;;  %vm2642_vm5 = vweird.f32 %v5005_v21 }
0x2223   :  { %vm2643_vm8 = vmor %vm2641_vm7, %vm2642_vm5 }
0x2224   :  { %v2638_v2 = vsub.f32 1.0, %v2637_v44 }
0x2226   :  { %v2639_v54 = vmul.f32 %v5005_v21, %v2638_v2 }
0x2228   :  { %v2640_v34 = vadd.f32 %v5005_v21, %v2639_v54 }
0x222a   :  { %v2644_v41 = vsel %vm2643_vm8, %v5005_v21, %v2640_v34 }
0x222b   :  { %v2649_v27 = vsel %vm2646_vm9, %v2648_v50, %v2644_v41 }
0x2282   :  { %v2654_v51 = vpop.permute.xlu1 %2653 }
0x2283   :  { %v2656_v3 = vmul.f32 %v2654_v51, %v2649_v27 }
0x2285   :  { %2658 = vrot.lane.b32.xlu2 %v2656_v3, %s5135_s3 }
0x22df   :  { %v2659_v48 = vpop.permute.xlu2 %2658 }
0x22e0   :  { %v2661_v49 = vadd.f32 %v2659_v48, %v2605_v26 }
0x22e2   :  { %5006 = vtanh.f32 %v2661_v49 }
0x22e8   :  { %v5007_v60 = vpop.eup %5006 }
0x22e9   :  { %v2663_v46 = vsub.f32 %v2604_v10, %v5007_v60 }
0x22eb   :  { %2665 = vrot.lane.b32.xlu0 %v2663_v46, %s5136_s4 }
0x235d   :  { %v2666_v31 = vpop.permute.xlu0 %2665 }
0x235e   :  { %v2668_v12 = vmul.f32 %v2666_v31, %v2649_v27 }
0x2360   :  { %2670 = vrot.lane.b32.xlu1 %v2668_v12, %s5137_s21 }
0x23d2   :  { %v2671_v39 = vpop.permute.xlu1 %2670 }
0x23d3   :  { %v2673_v5 = vadd.f32 %v5007_v60, %v2671_v39 }
0x23d5   :  { %2676 = vrot.lane.b32.xlu2 %v2673_v5, %s5135_s3 }
0x242f   :  { %v2677_v22 = vpop.permute.xlu2 %2676 }
0x2430   :  { %4706 = vmatmul.msk.f32.vlgmr.msra.gmra.mxu3 %vm1774_vm6, %v2677_v22  ;;  %v2812_v22 = vld [vmem:[#allocation2 + $0x78] sm:$0xff] }
0x2431   :  { %2830 = vmatpush.msra.mxu3 %v6459_v32 }
0x2433   :  { %2831 = vmatpush.msra.mxu3 %v6465_v33 }
0x2435   :  { %2832 = vmatpush.msra.mxu3 %v6471_v36 }
0x2437   :  { %2833 = vmatpush.msra.mxu3 %v6477_v43 }
0x24b3   :  { %v2697_v55 = vpop.f32.mrf.mxu3 }
0x24b4   :  { %v2720_v37 = vadd.f32 %v2697_v55, %v6773_v7  ;;  %v2700_v15 = vadd.f32 %v2697_v55, %v2674_v4 }
0x24b6   :  { %2722 = vrot.lane.b32.xlu0 %v2720_v37, %s5135_s3  ;;  %v4707_v38 = vmul.f32 -1.442695, %v2700_v15 }
0x24b8   :  { %5008 = vpow2.f32 %v4707_v38 }
0x24be   :  { %v5009_v40 = vpop.eup %5008 }
0x24bf   :  { %v2704_v57 = vadd.f32 1.0, %v5009_v40 }
0x24c1   :  { %5010 = vrcp.f32 %v2704_v57  ;;  %v2716_v13 = vand.u32 2147483648, %v2704_v57  ;;  %vm2710_vm11 = vweird.f32 %v2704_v57  ;;  %v2714_v42 = vand.u32 2147483647, %v2704_v57 }
0x24c3   :  { %v2717_v61 = vor.u32 1.1754944e-38, %v2716_v13  ;;  %vm2715_vm13 = vcmp.eq.f32.partialorder %v2714_v42, 8.507059e+37 }
0x24c7   :  { %v5011_v28 = vpop.eup %5010 }
0x24c8   :  { %v2706_v6 = vmul.f32 %v5011_v28, %v2704_v57  ;;  %vm2711_vm10 = vweird.f32 %v5011_v28 }
0x24c9   :  { %vm2712_vm12 = vmor %vm2710_vm11, %vm2711_vm10 }
0x24ca   :  { %v2707_v58 = vsub.f32 1.0, %v2706_v6 }
0x24cc   :  { %v2708_v59 = vmul.f32 %v5011_v28, %v2707_v58 }
0x24ce   :  { %v2709_v9 = vadd.f32 %v5011_v28, %v2708_v59 }
0x24d0   :  { %v2713_v29 = vsel %vm2712_vm12, %v5011_v28, %v2709_v9 }
0x24d1   :  { %v2718_v20 = vsel %vm2715_vm13, %v2717_v61, %v2713_v29 }
0x2528   :  { %v2723_v14 = vpop.permute.xlu0 %2722 }
0x2529   :  { %v2725_v1 = vmul.f32 %v2723_v14, %v2718_v20 }
0x252b   :  { %2727 = vrot.lane.b32.xlu1 %v2725_v1, %s5135_s3 }
0x259d   :  { %v2728_v18 = vpop.permute.xlu1 %2727 }
0x259e   :  { %v2730_v19 = vadd.f32 %v2728_v18, %v2674_v4 }
0x25a0   :  { %5012 = vtanh.f32 %v2730_v19 }
0x25a6   :  { %v5013_v47 = vpop.eup %5012 }
0x25a7   :  { %v2732_v63 = vsub.f32 %v2673_v5, %v5013_v47 }
0x25a9   :  { %2734 = vrot.lane.b32.xlu2 %v2732_v63, %s5136_s4 }
0x2603   :  { %v2735_v30 = vpop.permute.xlu2 %2734 }
0x2604   :  { %v2737_v8 = vmul.f32 %v2735_v30, %v2718_v20 }
0x2606   :  { %2739 = vrot.lane.b32.xlu0 %v2737_v8, %s5137_s21 }
0x2678   :  { %v2740_v17 = vpop.permute.xlu0 %2739 }
0x2679   :  { %v2742_v52 = vadd.f32 %v5013_v47, %v2740_v17 }
0x267b   :  { %2745 = vrot.lane.b32.xlu1 %v2742_v52, %s5135_s3 }
0x26ed   :  { %v2746_v25 = vpop.permute.xlu1 %2745 }
0x26ee   :  { %4708 = vmatmul.msk.f32.vlgmr.msrb.gmra.mxu3 %vm1774_vm6, %v2746_v25  ;;  %v2881_v25 = vld [vmem:[#allocation2 + $0x80] sm:$0xff] }
0x26ef   :  { %2899 = vmatpush.msrb.mxu3 %v6459_v32 }
0x26f1   :  { %2900 = vmatpush.msrb.mxu3 %v6465_v33 }
0x26f3   :  { %2901 = vmatpush.msrb.mxu3 %v6471_v36 }
0x26f5   :  { %2902 = vmatpush.msrb.mxu3 %v6477_v43 }
0x2771   :  { %v2766_v56 = vpop.f32.mrf.mxu3 }
0x2772   :  { %v2789_v10 = vadd.f32 %v2766_v56, %v6773_v7  ;;  %v2769_v11 = vadd.f32 %v2766_v56, %v2743_v53 }
0x2774   :  { %2791 = vrot.lane.b32.xlu2 %v2789_v10, %s5135_s3  ;;  %v4709_v35 = vmul.f32 -1.442695, %v2769_v11 }
0x2776   :  { %5014 = vpow2.f32 %v4709_v35 }
0x277c   :  { %v5015_v26 = vpop.eup %5014 }
0x277d   :  { %v2773_v16 = vadd.f32 1.0, %v5015_v26 }
0x277f   :  { %5016 = vrcp.f32 %v2773_v16  ;;  %v2785_v2 = vand.u32 2147483648, %v2773_v16  ;;  %vm2779_vm15 = vweird.f32 %v2773_v16  ;;  %v2783_v54 = vand.u32 2147483647, %v2773_v16 }
0x2781   :  { %v2786_v62 = vor.u32 1.1754944e-38, %v2785_v2  ;;  %vm2784_vm1 = vcmp.eq.f32.partialorder %v2783_v54, 8.507059e+37 }
0x2785   :  { %v5017_v23 = vpop.eup %5016 }
0x2786   :  { %v2775_v24 = vmul.f32 %v5017_v23, %v2773_v16  ;;  %vm2780_vm14 = vweird.f32 %v5017_v23 }
0x2787   :  { %vm2781_vm0 = vmor %vm2779_vm15, %vm2780_vm14 }
0x2788   :  { %v2776_v45 = vsub.f32 1.0, %v2775_v24 }
0x278a   :  { %v2777_v21 = vmul.f32 %v5017_v23, %v2776_v45 }
0x278c   :  { %v2778_v44 = vadd.f32 %v5017_v23, %v2777_v21 }
0x278e   :  { %v2782_v34 = vsel %vm2781_vm0, %v5017_v23, %v2778_v44 }
0x278f   :  { %v2787_v41 = vsel %vm2784_vm1, %v2786_v62, %v2782_v34 }
0x27ce   :  { %v2792_v0 = vpop.permute.xlu2 %2791 }
0x27cf   :  { %v2794_v50 = vmul.f32 %v2792_v0, %v2787_v41 }
0x27d1   :  { %2796 = vrot.lane.b32.xlu0 %v2794_v50, %s5135_s3 }
0x2843   :  { %v2797_v51 = vpop.permute.xlu0 %2796 }
0x2844   :  { %v2799_v27 = vadd.f32 %v2797_v51, %v2743_v53 }
0x2846   :  { %5018 = vtanh.f32 %v2799_v27 }
0x284c   :  { %v5019_v3 = vpop.eup %5018 }
0x284d   :  { %v2801_v48 = vsub.f32 %v2742_v52, %v5019_v3 }
0x284f   :  { %2803 = vrot.lane.b32.xlu1 %v2801_v48, %s5136_s4 }
0x28c1   :  { %v2804_v49 = vpop.permute.xlu1 %2803 }
0x28c2   :  { %v2806_v60 = vmul.f32 %v2804_v49, %v2787_v41 }
0x28c4   :  { %2808 = vrot.lane.b32.xlu2 %v2806_v60, %s5137_s21 }
0x291e   :  { %v2809_v46 = vpop.permute.xlu2 %2808 }
0x291f   :  { %v2811_v31 = vadd.f32 %v5019_v3, %v2809_v46 }
0x2921   :  { %2814 = vrot.lane.b32.xlu0 %v2811_v31, %s5135_s3 }
0x2993   :  { %v2815_v12 = vpop.permute.xlu0 %2814 }
0x2994   :  { %4710 = vmatmul.msk.f32.vlgmr.msra.gmra.mxu3 %vm1774_vm6, %v2815_v12  ;;  %v2950_v12 = vld [vmem:[#allocation2 + $0x88] sm:$0xff] }
0x2995   :  { %2968 = vmatpush.msra.mxu3 %v6459_v32 }
0x2997   :  { %2969 = vmatpush.msra.mxu3 %v6465_v33 }
0x2999   :  { %2970 = vmatpush.msra.mxu3 %v6471_v36 }
0x299b   :  { %2971 = vmatpush.msra.mxu3 %v6477_v43 }
0x2a17   :  { %v2835_v39 = vpop.f32.mrf.mxu3 }
0x2a18   :  { %v2858_v5 = vadd.f32 %v2835_v39, %v6773_v7  ;;  %v2838_v55 = vadd.f32 %v2835_v39, %v2812_v22 }
0x2a1a   :  { %2860 = vrot.lane.b32.xlu1 %v2858_v5, %s5135_s3  ;;  %v4711_v37 = vmul.f32 -1.442695, %v2838_v55 }
0x2a1c   :  { %5020 = vpow2.f32 %v4711_v37 }
0x2a22   :  { %v5021_v4 = vpop.eup %5020 }
0x2a23   :  { %v2842_v15 = vadd.f32 1.0, %v5021_v4 }
0x2a25   :  { %5022 = vrcp.f32 %v2842_v15  ;;  %v2854_v58 = vand.u32 2147483648, %v2842_v15  ;;  %vm2848_vm3 = vweird.f32 %v2842_v15  ;;  %v2852_v59 = vand.u32 2147483647, %v2842_v15 }
0x2a27   :  { %v2855_v13 = vor.u32 1.1754944e-38, %v2854_v58  ;;  %vm2853_vm5 = vcmp.eq.f32.partialorder %v2852_v59, 8.507059e+37 }
0x2a2b   :  { %v5023_v38 = vpop.eup %5022 }
0x2a2c   :  { %v2844_v40 = vmul.f32 %v5023_v38, %v2842_v15  ;;  %vm2849_vm2 = vweird.f32 %v5023_v38 }
0x2a2d   :  { %vm2850_vm4 = vmor %vm2848_vm3, %vm2849_vm2 }
0x2a2e   :  { %v2845_v57 = vsub.f32 1.0, %v2844_v40 }
0x2a30   :  { %v2846_v28 = vmul.f32 %v5023_v38, %v2845_v57 }
0x2a32   :  { %v2847_v6 = vadd.f32 %v5023_v38, %v2846_v28 }
0x2a34   :  { %v2851_v9 = vsel %vm2850_vm4, %v5023_v38, %v2847_v6 }
0x2a35   :  { %v2856_v29 = vsel %vm2853_vm5, %v2855_v13, %v2851_v9 }
0x2a8c   :  { %v2861_v42 = vpop.permute.xlu1 %2860 }
0x2a8d   :  { %v2863_v61 = vmul.f32 %v2861_v42, %v2856_v29 }
0x2a8f   :  { %2865 = vrot.lane.b32.xlu2 %v2863_v61, %s5135_s3 }
0x2ae9   :  { %v2866_v14 = vpop.permute.xlu2 %2865 }
0x2aea   :  { %v2868_v20 = vadd.f32 %v2866_v14, %v2812_v22 }
0x2aec   :  { %5024 = vtanh.f32 %v2868_v20 }
0x2af2   :  { %v5025_v1 = vpop.eup %5024 }
0x2af3   :  { %v2870_v18 = vsub.f32 %v2811_v31, %v5025_v1 }
0x2af5   :  { %2872 = vrot.lane.b32.xlu0 %v2870_v18, %s5136_s4 }
0x2b67   :  { %v2873_v19 = vpop.permute.xlu0 %2872 }
0x2b68   :  { %v2875_v47 = vmul.f32 %v2873_v19, %v2856_v29 }
0x2b6a   :  { %2877 = vrot.lane.b32.xlu1 %v2875_v47, %s5137_s21 }
0x2bdc   :  { %v2878_v63 = vpop.permute.xlu1 %2877 }
0x2bdd   :  { %v2880_v30 = vadd.f32 %v5025_v1, %v2878_v63 }
0x2bdf   :  { %2883 = vrot.lane.b32.xlu2 %v2880_v30, %s5135_s3 }
0x2c39   :  { %v2884_v8 = vpop.permute.xlu2 %2883 }
0x2c3a   :  { %4712 = vmatmul.msk.f32.vlgmr.msrb.gmra.mxu3 %vm1774_vm6, %v2884_v8  ;;  %v3019_v8 = vld [vmem:[#allocation2 + $0x90] sm:$0xff] }
0x2c3b   :  { %3037 = vmatpush.msrb.mxu3 %v6459_v32 }
0x2c3d   :  { %3038 = vmatpush.msrb.mxu3 %v6465_v33 }
0x2c3f   :  { %3039 = vmatpush.msrb.mxu3 %v6471_v36 }
0x2c41   :  { %3040 = vmatpush.msrb.mxu3 %v6477_v43 }
0x2cbd   :  { %v2904_v17 = vpop.f32.mrf.mxu3 }
0x2cbe   :  { %v2927_v52 = vadd.f32 %v2904_v17, %v6773_v7  ;;  %v2907_v56 = vadd.f32 %v2904_v17, %v2881_v25 }
0x2cc0   :  { %2929 = vrot.lane.b32.xlu0 %v2927_v52, %s5135_s3  ;;  %v4713_v10 = vmul.f32 -1.442695, %v2907_v56 }
0x2cc2   :  { %5026 = vpow2.f32 %v4713_v10 }
0x2cc8   :  { %v5027_v53 = vpop.eup %5026 }
0x2cc9   :  { %v2911_v11 = vadd.f32 1.0, %v5027_v53 }
0x2ccb   :  { %5028 = vrcp.f32 %v2911_v11  ;;  %v2923_v45 = vand.u32 2147483648, %v2911_v11  ;;  %vm2917_vm8 = vweird.f32 %v2911_v11  ;;  %v2921_v21 = vand.u32 2147483647, %v2911_v11 }
0x2ccd   :  { %v2924_v2 = vor.u32 1.1754944e-38, %v2923_v45  ;;  %vm2922_vm10 = vcmp.eq.f32.partialorder %v2921_v21, 8.507059e+37 }
0x2cd1   :  { %v5029_v35 = vpop.eup %5028 }
0x2cd2   :  { %v2913_v26 = vmul.f32 %v5029_v35, %v2911_v11  ;;  %vm2918_vm7 = vweird.f32 %v5029_v35 }
0x2cd3   :  { %vm2919_vm9 = vmor %vm2917_vm8, %vm2918_vm7 }
0x2cd4   :  { %v2914_v16 = vsub.f32 1.0, %v2913_v26 }
0x2cd6   :  { %v2915_v23 = vmul.f32 %v5029_v35, %v2914_v16 }
0x2cd8   :  { %v2916_v24 = vadd.f32 %v5029_v35, %v2915_v23 }
0x2cda   :  { %v2920_v44 = vsel %vm2919_vm9, %v5029_v35, %v2916_v24 }
0x2cdb   :  { %v2925_v34 = vsel %vm2922_vm10, %v2924_v2, %v2920_v44 }
0x2d32   :  { %v2930_v54 = vpop.permute.xlu0 %2929 }
0x2d33   :  { %v2932_v62 = vmul.f32 %v2930_v54, %v2925_v34 }
0x2d35   :  { %2934 = vrot.lane.b32.xlu1 %v2932_v62, %s5135_s3 }
0x2da7   :  { %v2935_v0 = vpop.permute.xlu1 %2934 }
0x2da8   :  { %v2937_v41 = vadd.f32 %v2935_v0, %v2881_v25 }
0x2daa   :  { %5030 = vtanh.f32 %v2937_v41 }
0x2db0   :  { %v5031_v50 = vpop.eup %5030 }
0x2db1   :  { %v2939_v51 = vsub.f32 %v2880_v30, %v5031_v50 }
0x2db3   :  { %2941 = vrot.lane.b32.xlu2 %v2939_v51, %s5136_s4 }
0x2e0d   :  { %v2942_v27 = vpop.permute.xlu2 %2941 }
0x2e0e   :  { %v2944_v3 = vmul.f32 %v2942_v27, %v2925_v34 }
0x2e10   :  { %2946 = vrot.lane.b32.xlu0 %v2944_v3, %s5137_s21 }
0x2e82   :  { %v2947_v48 = vpop.permute.xlu0 %2946 }
0x2e83   :  { %v2949_v49 = vadd.f32 %v5031_v50, %v2947_v48 }
0x2e85   :  { %2952 = vrot.lane.b32.xlu1 %v2949_v49, %s5135_s3 }
0x2ef7   :  { %v2953_v60 = vpop.permute.xlu1 %2952 }
0x2ef8   :  { %4714 = vmatmul.msk.f32.vlgmr.msra.gmra.mxu3 %vm1774_vm6, %v2953_v60  ;;  %v3088_v60 = vld [vmem:[#allocation2 + $0x98] sm:$0xff] }
0x2ef9   :  { %3106 = vmatpush.msra.mxu3 %v6459_v32 }
0x2efb   :  { %3107 = vmatpush.msra.mxu3 %v6465_v33 }
0x2efd   :  { %3108 = vmatpush.msra.mxu3 %v6471_v36 }
0x2eff   :  { %3109 = vmatpush.msra.mxu3 %v6477_v43 }
0x2f7b   :  { %v2973_v46 = vpop.f32.mrf.mxu3 }
0x2f7c   :  { %v2996_v31 = vadd.f32 %v2973_v46, %v6773_v7  ;;  %v2976_v39 = vadd.f32 %v2973_v46, %v2950_v12 }
0x2f7e   :  { %2998 = vrot.lane.b32.xlu2 %v2996_v31, %s5135_s3  ;;  %v4715_v5 = vmul.f32 -1.442695, %v2976_v39 }
0x2f80   :  { %5032 = vpow2.f32 %v4715_v5 }
0x2f86   :  { %v5033_v22 = vpop.eup %5032 }
0x2f87   :  { %v2980_v55 = vadd.f32 1.0, %v5033_v22 }
0x2f89   :  { %5034 = vrcp.f32 %v2980_v55  ;;  %v2992_v57 = vand.u32 2147483648, %v2980_v55  ;;  %vm2986_vm12 = vweird.f32 %v2980_v55  ;;  %v2990_v28 = vand.u32 2147483647, %v2980_v55 }
0x2f8b   :  { %v2993_v58 = vor.u32 1.1754944e-38, %v2992_v57  ;;  %vm2991_vm14 = vcmp.eq.f32.partialorder %v2990_v28, 8.507059e+37 }
0x2f8f   :  { %v5035_v37 = vpop.eup %5034 }
0x2f90   :  { %v2982_v4 = vmul.f32 %v5035_v37, %v2980_v55  ;;  %vm2987_vm11 = vweird.f32 %v5035_v37 }
0x2f91   :  { %vm2988_vm13 = vmor %vm2986_vm12, %vm2987_vm11 }
0x2f92   :  { %v2983_v15 = vsub.f32 1.0, %v2982_v4 }
0x2f94   :  { %v2984_v38 = vmul.f32 %v5035_v37, %v2983_v15 }
0x2f96   :  { %v2985_v40 = vadd.f32 %v5035_v37, %v2984_v38 }
0x2f98   :  { %v2989_v6 = vsel %vm2988_vm13, %v5035_v37, %v2985_v40 }
0x2f99   :  { %v2994_v9 = vsel %vm2991_vm14, %v2993_v58, %v2989_v6 }
0x2fd8   :  { %v2999_v59 = vpop.permute.xlu2 %2998 }
0x2fd9   :  { %v3001_v13 = vmul.f32 %v2999_v59, %v2994_v9 }
0x2fdb   :  { %3003 = vrot.lane.b32.xlu0 %v3001_v13, %s5135_s3 }
0x304d   :  { %v3004_v42 = vpop.permute.xlu0 %3003 }
0x304e   :  { %v3006_v29 = vadd.f32 %v3004_v42, %v2950_v12 }
0x3050   :  { %5036 = vtanh.f32 %v3006_v29 }
0x3056   :  { %v5037_v61 = vpop.eup %5036 }
0x3057   :  { %v3008_v14 = vsub.f32 %v2949_v49, %v5037_v61 }
0x3059   :  { %3010 = vrot.lane.b32.xlu1 %v3008_v14, %s5136_s4 }
0x30cb   :  { %v3011_v20 = vpop.permute.xlu1 %3010 }
0x30cc   :  { %v3013_v1 = vmul.f32 %v3011_v20, %v2994_v9 }
0x30ce   :  { %3015 = vrot.lane.b32.xlu2 %v3013_v1, %s5137_s21 }
0x3128   :  { %v3016_v18 = vpop.permute.xlu2 %3015 }
0x3129   :  { %v3018_v19 = vadd.f32 %v5037_v61, %v3016_v18 }
0x312b   :  { %3021 = vrot.lane.b32.xlu0 %v3018_v19, %s5135_s3 }
0x319d   :  { %v3022_v47 = vpop.permute.xlu0 %3021 }
0x319e   :  { %4716 = vmatmul.msk.f32.vlgmr.msrb.gmra.mxu3 %vm1774_vm6, %v3022_v47  ;;  %v3157_v47 = vld [vmem:[#allocation2 + $0xa0] sm:$0xff] }
0x319f   :  { %3175 = vmatpush.msrb.mxu3 %v6459_v32 }
0x31a1   :  { %3176 = vmatpush.msrb.mxu3 %v6465_v33 }
0x31a3   :  { %3177 = vmatpush.msrb.mxu3 %v6471_v36 }
0x31a5   :  { %3178 = vmatpush.msrb.mxu3 %v6477_v43 }
0x3221   :  { %v3042_v63 = vpop.f32.mrf.mxu3 }
0x3222   :  { %v3065_v30 = vadd.f32 %v3042_v63, %v6773_v7  ;;  %v3045_v17 = vadd.f32 %v3042_v63, %v3019_v8 }
0x3224   :  { %3067 = vrot.lane.b32.xlu1 %v3065_v30, %s5135_s3  ;;  %v4717_v52 = vmul.f32 -1.442695, %v3045_v17 }
0x3226   :  { %5038 = vpow2.f32 %v4717_v52 }
0x322c   :  { %v5039_v25 = vpop.eup %5038 }
0x322d   :  { %v3049_v56 = vadd.f32 1.0, %v5039_v25 }
0x322f   :  { %5040 = vrcp.f32 %v3049_v56  ;;  %v3061_v16 = vand.u32 2147483648, %v3049_v56  ;;  %vm3055_vm0 = vweird.f32 %v3049_v56  ;;  %v3059_v23 = vand.u32 2147483647, %v3049_v56 }
0x3231   :  { %v3062_v45 = vor.u32 1.1754944e-38, %v3061_v16  ;;  %vm3060_vm2 = vcmp.eq.f32.partialorder %v3059_v23, 8.507059e+37 }
0x3235   :  { %v5041_v10 = vpop.eup %5040 }
0x3236   :  { %v3051_v53 = vmul.f32 %v5041_v10, %v3049_v56  ;;  %vm3056_vm15 = vweird.f32 %v5041_v10 }
0x3237   :  { %vm3057_vm1 = vmor %vm3055_vm0, %vm3056_vm15 }
0x3238   :  { %v3052_v11 = vsub.f32 1.0, %v3051_v53 }
0x323a   :  { %v3053_v35 = vmul.f32 %v5041_v10, %v3052_v11 }
0x323c   :  { %v3054_v26 = vadd.f32 %v5041_v10, %v3053_v35 }
0x323e   :  { %v3058_v24 = vsel %vm3057_vm1, %v5041_v10, %v3054_v26 }
0x323f   :  { %v3063_v44 = vsel %vm3060_vm2, %v3062_v45, %v3058_v24 }
0x3296   :  { %v3068_v21 = vpop.permute.xlu1 %3067 }
0x3297   :  { %v3070_v2 = vmul.f32 %v3068_v21, %v3063_v44 }
0x3299   :  { %3072 = vrot.lane.b32.xlu2 %v3070_v2, %s5135_s3 }
0x32f3   :  { %v3073_v54 = vpop.permute.xlu2 %3072 }
0x32f4   :  { %v3075_v34 = vadd.f32 %v3073_v54, %v3019_v8 }
0x32f6   :  { %5042 = vtanh.f32 %v3075_v34 }
0x32fc   :  { %v5043_v62 = vpop.eup %5042 }
0x32fd   :  { %v3077_v0 = vsub.f32 %v3018_v19, %v5043_v62 }
0x32ff   :  { %3079 = vrot.lane.b32.xlu0 %v3077_v0, %s5136_s4 }
0x3371   :  { %v3080_v41 = vpop.permute.xlu0 %3079 }
0x3372   :  { %v3082_v50 = vmul.f32 %v3080_v41, %v3063_v44 }
0x3374   :  { %3084 = vrot.lane.b32.xlu1 %v3082_v50, %s5137_s21 }
0x33e6   :  { %v3085_v51 = vpop.permute.xlu1 %3084 }
0x33e7   :  { %v3087_v27 = vadd.f32 %v5043_v62, %v3085_v51 }
0x33e9   :  { %3090 = vrot.lane.b32.xlu2 %v3087_v27, %s5135_s3 }
0x3443   :  { %v3091_v3 = vpop.permute.xlu2 %3090 }
0x3444   :  { %4718 = vmatmul.msk.f32.vlgmr.msra.gmra.mxu3 %vm1774_vm6, %v3091_v3  ;;  %v3226_v3 = vld [vmem:[#allocation2 + $0xa8] sm:$0xff] }
0x3445   :  { %3244 = vmatpush.msra.mxu3 %v6459_v32 }
0x3447   :  { %3245 = vmatpush.msra.mxu3 %v6465_v33 }
0x3449   :  { %3246 = vmatpush.msra.mxu3 %v6471_v36 }
0x344b   :  { %3247 = vmatpush.msra.mxu3 %v6477_v43 }
0x34c7   :  { %v3111_v48 = vpop.f32.mrf.mxu3 }
0x34c8   :  { %v3134_v49 = vadd.f32 %v3111_v48, %v6773_v7  ;;  %v3114_v46 = vadd.f32 %v3111_v48, %v3088_v60 }
0x34ca   :  { %3136 = vrot.lane.b32.xlu0 %v3134_v49, %s5135_s3  ;;  %v4719_v31 = vmul.f32 -1.442695, %v3114_v46 }
0x34cc   :  { %5044 = vpow2.f32 %v4719_v31 }
0x34d2   :  { %v5045_v12 = vpop.eup %5044 }
0x34d3   :  { %v3118_v39 = vadd.f32 1.0, %v5045_v12 }
0x34d5   :  { %5046 = vrcp.f32 %v3118_v39  ;;  %v3130_v15 = vand.u32 2147483648, %v3118_v39  ;;  %vm3124_vm4 = vweird.f32 %v3118_v39  ;;  %v3128_v38 = vand.u32 2147483647, %v3118_v39 }
0x34d7   :  { %v3131_v57 = vor.u32 1.1754944e-38, %v3130_v15  ;;  %vm3129_vm7 = vcmp.eq.f32.partialorder %v3128_v38, 8.507059e+37 }
0x34db   :  { %v5047_v5 = vpop.eup %5046 }
0x34dc   :  { %v3120_v22 = vmul.f32 %v5047_v5, %v3118_v39  ;;  %vm3125_vm3 = vweird.f32 %v5047_v5 }
0x34dd   :  { %vm3126_vm5 = vmor %vm3124_vm4, %vm3125_vm3 }
0x34de   :  { %v3121_v55 = vsub.f32 1.0, %v3120_v22 }
0x34e0   :  { %v3122_v37 = vmul.f32 %v5047_v5, %v3121_v55 }
0x34e2   :  { %v3123_v4 = vadd.f32 %v5047_v5, %v3122_v37 }
0x34e4   :  { %v3127_v40 = vsel %vm3126_vm5, %v5047_v5, %v3123_v4 }
0x34e5   :  { %v3132_v6 = vsel %vm3129_vm7, %v3131_v57, %v3127_v40 }
0x353c   :  { %v3137_v28 = vpop.permute.xlu0 %3136 }
0x353d   :  { %v3139_v58 = vmul.f32 %v3137_v28, %v3132_v6 }
0x353f   :  { %3141 = vrot.lane.b32.xlu1 %v3139_v58, %s5135_s3 }
0x35b1   :  { %v3142_v59 = vpop.permute.xlu1 %3141 }
0x35b2   :  { %v3144_v9 = vadd.f32 %v3142_v59, %v3088_v60 }
0x35b4   :  { %5048 = vtanh.f32 %v3144_v9 }
0x35ba   :  { %v5049_v13 = vpop.eup %5048 }
0x35bb   :  { %v3146_v42 = vsub.f32 %v3087_v27, %v5049_v13 }
0x35bd   :  { %3148 = vrot.lane.b32.xlu2 %v3146_v42, %s5136_s4 }
0x3617   :  { %v3149_v29 = vpop.permute.xlu2 %3148 }
0x3618   :  { %v3151_v61 = vmul.f32 %v3149_v29, %v3132_v6 }
0x361a   :  { %3153 = vrot.lane.b32.xlu0 %v3151_v61, %s5137_s21 }
0x368c   :  { %v3154_v14 = vpop.permute.xlu0 %3153 }
0x368d   :  { %v3156_v20 = vadd.f32 %v5049_v13, %v3154_v14 }
0x368f   :  { %3159 = vrot.lane.b32.xlu1 %v3156_v20, %s5135_s3 }
0x3701   :  { %v3160_v1 = vpop.permute.xlu1 %3159 }
0x3702   :  { %4720 = vmatmul.msk.f32.vlgmr.msrb.gmra.mxu3 %vm1774_vm6, %v3160_v1  ;;  %v3295_v1 = vld [vmem:[#allocation2 + $0xb0] sm:$0xff] }
0x3703   :  { %3313 = vmatpush.msrb.mxu3 %v6459_v32 }
0x3705   :  { %3314 = vmatpush.msrb.mxu3 %v6465_v33 }
0x3707   :  { %3315 = vmatpush.msrb.mxu3 %v6471_v36 }
0x3709   :  { %3316 = vmatpush.msrb.mxu3 %v6477_v43 }
0x3785   :  { %v3180_v18 = vpop.f32.mrf.mxu3 }
0x3786   :  { %v3203_v19 = vadd.f32 %v3180_v18, %v6773_v7  ;;  %v3183_v63 = vadd.f32 %v3180_v18, %v3157_v47 }
0x3788   :  { %3205 = vrot.lane.b32.xlu2 %v3203_v19, %s5135_s3  ;;  %v4721_v30 = vmul.f32 -1.442695, %v3183_v63 }
0x378a   :  { %5050 = vpow2.f32 %v4721_v30 }
0x3790   :  { %v5051_v8 = vpop.eup %5050 }
0x3791   :  { %v3187_v17 = vadd.f32 1.0, %v5051_v8 }
0x3793   :  { %5052 = vrcp.f32 %v3187_v17  ;;  %v3199_v11 = vand.u32 2147483648, %v3187_v17  ;;  %vm3193_vm9 = vweird.f32 %v3187_v17  ;;  %v3197_v35 = vand.u32 2147483647, %v3187_v17 }
0x3795   :  { %v3200_v16 = vor.u32 1.1754944e-38, %v3199_v11  ;;  %vm3198_vm11 = vcmp.eq.f32.partialorder %v3197_v35, 8.507059e+37 }
0x3799   :  { %v5053_v52 = vpop.eup %5052 }
0x379a   :  { %v3189_v25 = vmul.f32 %v5053_v52, %v3187_v17  ;;  %vm3194_vm8 = vweird.f32 %v5053_v52 }
0x379b   :  { %vm3195_vm10 = vmor %vm3193_vm9, %vm3194_vm8 }
0x379c   :  { %v3190_v56 = vsub.f32 1.0, %v3189_v25 }
0x379e   :  { %v3191_v10 = vmul.f32 %v5053_v52, %v3190_v56 }
0x37a0   :  { %v3192_v53 = vadd.f32 %v5053_v52, %v3191_v10 }
0x37a2   :  { %v3196_v26 = vsel %vm3195_vm10, %v5053_v52, %v3192_v53 }
0x37a3   :  { %v3201_v24 = vsel %vm3198_vm11, %v3200_v16, %v3196_v26 }
0x37e2   :  { %v3206_v23 = vpop.permute.xlu2 %3205 }
0x37e3   :  { %v3208_v45 = vmul.f32 %v3206_v23, %v3201_v24 }
0x37e5   :  { %3210 = vrot.lane.b32.xlu0 %v3208_v45, %s5135_s3 }
0x3857   :  { %v3211_v21 = vpop.permute.xlu0 %3210 }
0x3858   :  { %v3213_v44 = vadd.f32 %v3211_v21, %v3157_v47 }
0x385a   :  { %5054 = vtanh.f32 %v3213_v44 }
0x3860   :  { %v5055_v2 = vpop.eup %5054 }
0x3861   :  { %v3215_v54 = vsub.f32 %v3156_v20, %v5055_v2 }
0x3863   :  { %3217 = vrot.lane.b32.xlu1 %v3215_v54, %s5136_s4 }
0x38d5   :  { %v3218_v34 = vpop.permute.xlu1 %3217 }
0x38d6   :  { %v3220_v62 = vmul.f32 %v3218_v34, %v3201_v24 }
0x38d8   :  { %3222 = vrot.lane.b32.xlu2 %v3220_v62, %s5137_s21 }
0x3932   :  { %v3223_v0 = vpop.permute.xlu2 %3222 }
0x3933   :  { %v3225_v41 = vadd.f32 %v5055_v2, %v3223_v0 }
0x3935   :  { %3228 = vrot.lane.b32.xlu0 %v3225_v41, %s5135_s3 }
0x39a7   :  { %v3229_v50 = vpop.permute.xlu0 %3228 }
0x39a8   :  { %4722 = vmatmul.msk.f32.vlgmr.msra.gmra.mxu3 %vm1774_vm6, %v3229_v50  ;;  %v3364_v50 = vld [vmem:[#allocation2 + $0xb8] sm:$0xff] }
0x39a9   :  { %3382 = vmatpush.msra.mxu3 %v6459_v32 }
0x39ab   :  { %3383 = vmatpush.msra.mxu3 %v6465_v33 }
0x39ad   :  { %3384 = vmatpush.msra.mxu3 %v6471_v36 }
0x39af   :  { %3385 = vmatpush.msra.mxu3 %v6477_v43 }
0x3a2b   :  { %v3249_v51 = vpop.f32.mrf.mxu3 }
0x3a2c   :  { %v3272_v27 = vadd.f32 %v3249_v51, %v6773_v7  ;;  %v3252_v48 = vadd.f32 %v3249_v51, %v3226_v3 }
0x3a2e   :  { %3274 = vrot.lane.b32.xlu1 %v3272_v27, %s5135_s3  ;;  %v4723_v49 = vmul.f32 -1.442695, %v3252_v48 }
0x3a30   :  { %5056 = vpow2.f32 %v4723_v49 }
0x3a36   :  { %v5057_v60 = vpop.eup %5056 }
0x3a37   :  { %v3256_v46 = vadd.f32 1.0, %v5057_v60 }
0x3a39   :  { %5058 = vrcp.f32 %v3256_v46  ;;  %v3268_v55 = vand.u32 2147483648, %v3256_v46  ;;  %vm3262_vm13 = vweird.f32 %v3256_v46  ;;  %v3266_v37 = vand.u32 2147483647, %v3256_v46 }
0x3a3b   :  { %v3269_v15 = vor.u32 1.1754944e-38, %v3268_v55  ;;  %vm3267_vm15 = vcmp.eq.f32.partialorder %v3266_v37, 8.507059e+37 }
0x3a3f   :  { %v5059_v31 = vpop.eup %5058 }
0x3a40   :  { %v3258_v12 = vmul.f32 %v5059_v31, %v3256_v46  ;;  %vm3263_vm12 = vweird.f32 %v5059_v31 }
0x3a41   :  { %vm3264_vm14 = vmor %vm3262_vm13, %vm3263_vm12 }
0x3a42   :  { %v3259_v39 = vsub.f32 1.0, %v3258_v12 }
0x3a44   :  { %v3260_v5 = vmul.f32 %v5059_v31, %v3259_v39 }
0x3a46   :  { %v3261_v22 = vadd.f32 %v5059_v31, %v3260_v5 }
0x3a48   :  { %v3265_v4 = vsel %vm3264_vm14, %v5059_v31, %v3261_v22 }
0x3a49   :  { %v3270_v40 = vsel %vm3267_vm15, %v3269_v15, %v3265_v4 }
0x3aa0   :  { %v3275_v38 = vpop.permute.xlu1 %3274 }
0x3aa1   :  { %v3277_v57 = vmul.f32 %v3275_v38, %v3270_v40 }
0x3aa3   :  { %3279 = vrot.lane.b32.xlu2 %v3277_v57, %s5135_s3 }
0x3afd   :  { %v3280_v28 = vpop.permute.xlu2 %3279 }
0x3afe   :  { %v3282_v6 = vadd.f32 %v3280_v28, %v3226_v3 }
0x3b00   :  { %5060 = vtanh.f32 %v3282_v6 }
0x3b06   :  { %v5061_v58 = vpop.eup %5060 }
0x3b07   :  { %v3284_v59 = vsub.f32 %v3225_v41, %v5061_v58 }
0x3b09   :  { %3286 = vrot.lane.b32.xlu0 %v3284_v59, %s5136_s4 }
0x3b7b   :  { %v3287_v9 = vpop.permute.xlu0 %3286 }
0x3b7c   :  { %v3289_v13 = vmul.f32 %v3287_v9, %v3270_v40 }
0x3b7e   :  { %3291 = vrot.lane.b32.xlu1 %v3289_v13, %s5137_s21 }
0x3bf0   :  { %v3292_v42 = vpop.permute.xlu1 %3291 }
0x3bf1   :  { %v3294_v29 = vadd.f32 %v5061_v58, %v3292_v42 }
0x3bf3   :  { %3297 = vrot.lane.b32.xlu2 %v3294_v29, %s5135_s3 }
0x3c4d   :  { %v3298_v61 = vpop.permute.xlu2 %3297 }
0x3c4e   :  { %4724 = vmatmul.msk.f32.vlgmr.msrb.gmra.mxu3 %vm1774_vm6, %v3298_v61  ;;  %v3433_v61 = vld [vmem:[#allocation2 + $0xc0] sm:$0xff] }
0x3c4f   :  { %3451 = vmatpush.msrb.mxu3 %v6459_v32 }
0x3c51   :  { %3452 = vmatpush.msrb.mxu3 %v6465_v33 }
0x3c53   :  { %3453 = vmatpush.msrb.mxu3 %v6471_v36 }
0x3c55   :  { %3454 = vmatpush.msrb.mxu3 %v6477_v43 }
0x3cd1   :  { %v3318_v14 = vpop.f32.mrf.mxu3 }
0x3cd2   :  { %v3341_v20 = vadd.f32 %v3318_v14, %v6773_v7  ;;  %v3321_v18 = vadd.f32 %v3318_v14, %v3295_v1 }
0x3cd4   :  { %3343 = vrot.lane.b32.xlu0 %v3341_v20, %s5135_s3  ;;  %v4725_v19 = vmul.f32 -1.442695, %v3321_v18 }
0x3cd6   :  { %5062 = vpow2.f32 %v4725_v19 }
0x3cdc   :  { %v5063_v47 = vpop.eup %5062 }
0x3cdd   :  { %v3325_v63 = vadd.f32 1.0, %v5063_v47 }
0x3cdf   :  { %5064 = vrcp.f32 %v3325_v63  ;;  %v3337_v56 = vand.u32 2147483648, %v3325_v63  ;;  %vm3331_vm1 = vweird.f32 %v3325_v63  ;;  %v3335_v10 = vand.u32 2147483647, %v3325_v63 }
0x3ce1   :  { %v3338_v11 = vor.u32 1.1754944e-38, %v3337_v56  ;;  %vm3336_vm3 = vcmp.eq.f32.partialorder %v3335_v10, 8.507059e+37 }
0x3ce5   :  { %v5065_v30 = vpop.eup %5064 }
0x3ce6   :  { %v3327_v8 = vmul.f32 %v5065_v30, %v3325_v63  ;;  %vm3332_vm0 = vweird.f32 %v5065_v30 }
0x3ce7   :  { %vm3333_vm2 = vmor %vm3331_vm1, %vm3332_vm0 }
0x3ce8   :  { %v3328_v17 = vsub.f32 1.0, %v3327_v8 }
0x3cea   :  { %v3329_v52 = vmul.f32 %v5065_v30, %v3328_v17 }
0x3cec   :  { %v3330_v25 = vadd.f32 %v5065_v30, %v3329_v52 }
0x3cee   :  { %v3334_v53 = vsel %vm3333_vm2, %v5065_v30, %v3330_v25 }
0x3cef   :  { %v3339_v26 = vsel %vm3336_vm3, %v3338_v11, %v3334_v53 }
0x3d46   :  { %v3344_v35 = vpop.permute.xlu0 %3343 }
0x3d47   :  { %v3346_v16 = vmul.f32 %v3344_v35, %v3339_v26 }
0x3d49   :  { %3348 = vrot.lane.b32.xlu1 %v3346_v16, %s5135_s3 }
0x3dbb   :  { %v3349_v23 = vpop.permute.xlu1 %3348 }
0x3dbc   :  { %v3351_v24 = vadd.f32 %v3349_v23, %v3295_v1 }
0x3dbe   :  { %5066 = vtanh.f32 %v3351_v24 }
0x3dc4   :  { %v5067_v45 = vpop.eup %5066 }
0x3dc5   :  { %v3353_v21 = vsub.f32 %v3294_v29, %v5067_v45 }
0x3dc7   :  { %3355 = vrot.lane.b32.xlu2 %v3353_v21, %s5136_s4  ;;  %v6617_v21 = vld [vmem:[%s6727_s5 + $0x10] sm:$0xff] }
0x3e21   :  { %v3356_v44 = vpop.permute.xlu2 %3355 }
0x3e22   :  { %v3358_v2 = vmul.f32 %v3356_v44, %v3339_v26  ;;  %v6623_v44 = vld [vmem:[%s6727_s5 + $0x8] sm:$0xff] }
0x3e24   :  { %3360 = vrot.lane.b32.xlu0 %v3358_v2, %s5137_s21  ;;  %v6629_v2 = vld [vmem:[%s6727_s5] sm:$0xff] }
0x3e96   :  { %v3361_v54 = vpop.permute.xlu0 %3360 }
0x3e97   :  { %v3363_v34 = vadd.f32 %v5067_v45, %v3361_v54  ;;  %v6611_v45 = vld [vmem:[%s6727_s5 + $0x18] sm:$0xff] }
0x3e99   :  { %3366 = vrot.lane.b32.xlu1 %v3363_v34, %s5135_s3 }
0x3f0b   :  { %v3367_v62 = vpop.permute.xlu1 %3366 }
0x3f0c   :  { %4726 = vmatmul.msk.f32.vlgmr.msra.gmra.mxu3 %vm1774_vm6, %v3367_v62  ;;  %v3502_v62 = vld [vmem:[#allocation2 + $0xc8] sm:$0xff] }
0x3f0d   :  { %3520 = vmatpush.msra.mxu3 %v6459_v32 }
0x3f0f   :  { %3521 = vmatpush.msra.mxu3 %v6465_v33 }
0x3f11   :  { %3522 = vmatpush.msra.mxu3 %v6471_v36 }
0x3f13   :  { %3523 = vmatpush.msra.mxu3 %v6477_v43 }
0x3f8f   :  { %v3387_v0 = vpop.f32.mrf.mxu3 }
0x3f90   :  { %v3410_v41 = vadd.f32 %v3387_v0, %v6773_v7  ;;  %v3390_v51 = vadd.f32 %v3387_v0, %v3364_v50 }
0x3f92   :  { %3412 = vrot.lane.b32.xlu2 %v3410_v41, %s5135_s3  ;;  %v4727_v27 = vmul.f32 -1.442695, %v3390_v51 }
0x3f94   :  { %5068 = vpow2.f32 %v4727_v27 }
0x3f9a   :  { %v5069_v3 = vpop.eup %5068 }
0x3f9b   :  { %v3394_v48 = vadd.f32 1.0, %v5069_v3 }
0x3f9d   :  { %5070 = vrcp.f32 %v3394_v48  ;;  %v3406_v39 = vand.u32 2147483648, %v3394_v48  ;;  %vm3400_vm5 = vweird.f32 %v3394_v48  ;;  %v3404_v5 = vand.u32 2147483647, %v3394_v48 }
0x3f9f   :  { %v3407_v55 = vor.u32 1.1754944e-38, %v3406_v39  ;;  %vm3405_vm8 = vcmp.eq.f32.partialorder %v3404_v5, 8.507059e+37 }
0x3fa3   :  { %v5071_v49 = vpop.eup %5070 }
0x3fa4   :  { %v3396_v60 = vmul.f32 %v5071_v49, %v3394_v48  ;;  %vm3401_vm4 = vweird.f32 %v5071_v49 }
0x3fa5   :  { %vm3402_vm7 = vmor %vm3400_vm5, %vm3401_vm4 }
0x3fa6   :  { %v3397_v46 = vsub.f32 1.0, %v3396_v60 }
0x3fa8   :  { %v3398_v31 = vmul.f32 %v5071_v49, %v3397_v46 }
0x3faa   :  { %v3399_v12 = vadd.f32 %v5071_v49, %v3398_v31 }
0x3fac   :  { %v3403_v22 = vsel %vm3402_vm7, %v5071_v49, %v3399_v12 }
0x3fad   :  { %v3408_v4 = vsel %vm3405_vm8, %v3407_v55, %v3403_v22 }
0x3fec   :  { %v3413_v37 = vpop.permute.xlu2 %3412 }
0x3fed   :  { %v3415_v15 = vmul.f32 %v3413_v37, %v3408_v4 }
0x3fef   :  { %3417 = vrot.lane.b32.xlu0 %v3415_v15, %s5135_s3 }
0x4061   :  { %v3418_v38 = vpop.permute.xlu0 %3417 }
0x4062   :  { %v3420_v40 = vadd.f32 %v3418_v38, %v3364_v50 }
0x4064   :  { %5072 = vtanh.f32 %v3420_v40 }
0x406a   :  { %v5073_v57 = vpop.eup %5072 }
0x406b   :  { %v3422_v28 = vsub.f32 %v3363_v34, %v5073_v57 }
0x406d   :  { %3424 = vrot.lane.b32.xlu1 %v3422_v28, %s5136_s4 }
0x40df   :  { %v3425_v6 = vpop.permute.xlu1 %3424 }
0x40e0   :  { %v3427_v58 = vmul.f32 %v3425_v6, %v3408_v4 }
0x40e2   :  { %3429 = vrot.lane.b32.xlu2 %v3427_v58, %s5137_s21 }
0x413c   :  { %v3430_v59 = vpop.permute.xlu2 %3429 }
0x413d   :  { %v3432_v9 = vadd.f32 %v5073_v57, %v3430_v59 }
0x413f   :  { %3435 = vrot.lane.b32.xlu0 %v3432_v9, %s5135_s3 }
0x41b1   :  { %v3436_v13 = vpop.permute.xlu0 %3435 }
0x41b2   :  { %4728 = vmatmul.msk.f32.vlgmr.msrb.gmra.mxu3 %vm1774_vm6, %v3436_v13  ;;  %v3571_v13 = vld [vmem:[#allocation2 + $0xd0] sm:$0xff] }
0x41b3   :  { %3589 = vmatpush.msrb.mxu3 %v6459_v32 }
0x41b5   :  { %3590 = vmatpush.msrb.mxu3 %v6465_v33 }
0x41b7   :  { %3591 = vmatpush.msrb.mxu3 %v6471_v36 }
0x41b9   :  { %3592 = vmatpush.msrb.mxu3 %v6477_v43 }
0x4235   :  { %v3456_v42 = vpop.f32.mrf.mxu3 }
0x4236   :  { %v3479_v29 = vadd.f32 %v3456_v42, %v6773_v7  ;;  %v3459_v14 = vadd.f32 %v3456_v42, %v3433_v61 }
0x4238   :  { %3481 = vrot.lane.b32.xlu1 %v3479_v29, %s5135_s3  ;;  %v4729_v20 = vmul.f32 -1.442695, %v3459_v14 }
0x423a   :  { %5074 = vpow2.f32 %v4729_v20 }
0x4240   :  { %v5075_v1 = vpop.eup %5074 }
0x4241   :  { %v3463_v18 = vadd.f32 1.0, %v5075_v1 }
0x4243   :  { %5076 = vrcp.f32 %v3463_v18  ;;  %v3475_v36 = vand.u32 2147483648, %v3463_v18  ;;  %vm3469_vm10 = vweird.f32 %v3463_v18  ;;  %v3473_v43 = vand.u32 2147483647, %v3463_v18 }
0x4245   :  { %v3476_v8 = vor.u32 1.1754944e-38, %v3475_v36  ;;  %vm3474_vm12 = vcmp.eq.f32.partialorder %v3473_v43, 8.507059e+37 }
0x4249   :  { %v5077_v19 = vpop.eup %5076 }
0x424a   :  { %v3465_v32 = vmul.f32 %v5077_v19, %v3463_v18  ;;  %vm3470_vm9 = vweird.f32 %v5077_v19 }
0x424b   :  { %vm3471_vm11 = vmor %vm3469_vm10, %vm3470_vm9 }
0x424c   :  { %v3466_v47 = vsub.f32 1.0, %v3465_v32 }
0x424e   :  { %v3467_v33 = vmul.f32 %v5077_v19, %v3466_v47 }
0x4250   :  { %v3468_v63 = vadd.f32 %v5077_v19, %v3467_v33 }
0x4252   :  { %v3472_v30 = vsel %vm3471_vm11, %v5077_v19, %v3468_v63 }
0x4253   :  { %v3477_v52 = vsel %vm3474_vm12, %v3476_v8, %v3472_v30 }
0x42aa   :  { %v3482_v17 = vpop.permute.xlu1 %3481 }
0x42ab   :  { %v3484_v25 = vmul.f32 %v3482_v17, %v3477_v52 }
0x42ad   :  { %3486 = vrot.lane.b32.xlu2 %v3484_v25, %s5135_s3 }
0x4307   :  { %v3487_v56 = vpop.permute.xlu2 %3486 }
0x4308   :  { %v3489_v10 = vadd.f32 %v3487_v56, %v3433_v61 }
0x430a   :  { %5078 = vtanh.f32 %v3489_v10 }
0x4310   :  { %v5079_v53 = vpop.eup %5078 }
0x4311   :  { %v3491_v11 = vsub.f32 %v3432_v9, %v5079_v53 }
0x4313   :  { %3493 = vrot.lane.b32.xlu0 %v3491_v11, %s5136_s4 }
0x4385   :  { %v3494_v35 = vpop.permute.xlu0 %3493 }
0x4386   :  { %v3496_v26 = vmul.f32 %v3494_v35, %v3477_v52 }
0x4388   :  { %3498 = vrot.lane.b32.xlu1 %v3496_v26, %s5137_s21 }
0x43fa   :  { %v3499_v16 = vpop.permute.xlu1 %3498 }
0x43fb   :  { %v3501_v23 = vadd.f32 %v5079_v53, %v3499_v16 }
0x43fd   :  { %3504 = vrot.lane.b32.xlu2 %v3501_v23, %s5135_s3 }
0x4457   :  { %v3505_v24 = vpop.permute.xlu2 %3504 }
0x4458   :  { %4730 = vmatmul.msk.f32.vlgmr.msra.gmra.mxu3 %vm1774_vm6, %v3505_v24  ;;  %v3640_v24 = vld [vmem:[#allocation2 + $0xd8] sm:$0xff] }
0x4459   :  { %3658 = vmatpush.msra.mxu3 %v6611_v45 }
0x445b   :  { %3659 = vmatpush.msra.mxu3 %v6617_v21 }
0x445d   :  { %3660 = vmatpush.msra.mxu3 %v6623_v44 }
0x445f   :  { %3661 = vmatpush.msra.mxu3 %v6629_v2 }
0x44db   :  { %v3525_v54 = vpop.f32.mrf.mxu3 }
0x44dc   :  { %v3548_v34 = vadd.f32 %v3525_v54, %v6773_v7  ;;  %v3528_v0 = vadd.f32 %v3525_v54, %v3502_v62 }
0x44de   :  { %3550 = vrot.lane.b32.xlu0 %v3548_v34, %s5135_s3  ;;  %v4731_v41 = vmul.f32 -1.442695, %v3528_v0 }
0x44e0   :  { %5080 = vpow2.f32 %v4731_v41 }
0x44e6   :  { %v5081_v50 = vpop.eup %5080 }
0x44e7   :  { %v3532_v51 = vadd.f32 1.0, %v5081_v50 }
0x44e9   :  { %5082 = vrcp.f32 %v3532_v51  ;;  %v3544_v46 = vand.u32 2147483648, %v3532_v51  ;;  %vm3538_vm14 = vweird.f32 %v3532_v51  ;;  %v3542_v31 = vand.u32 2147483647, %v3532_v51 }
0x44eb   :  { %v3545_v39 = vor.u32 1.1754944e-38, %v3544_v46  ;;  %vm3543_vm0 = vcmp.eq.f32.partialorder %v3542_v31, 8.507059e+37 }
0x44ef   :  { %v5083_v27 = vpop.eup %5082 }
0x44f0   :  { %v3534_v3 = vmul.f32 %v5083_v27, %v3532_v51  ;;  %vm3539_vm13 = vweird.f32 %v5083_v27 }
0x44f1   :  { %vm3540_vm15 = vmor %vm3538_vm14, %vm3539_vm13 }
0x44f2   :  { %v3535_v48 = vsub.f32 1.0, %v3534_v3 }
0x44f4   :  { %v3536_v49 = vmul.f32 %v5083_v27, %v3535_v48 }
0x44f6   :  { %v3537_v60 = vadd.f32 %v5083_v27, %v3536_v49 }
0x44f8   :  { %v3541_v12 = vsel %vm3540_vm15, %v5083_v27, %v3537_v60 }
0x44f9   :  { %v3546_v22 = vsel %vm3543_vm0, %v3545_v39, %v3541_v12 }
0x4550   :  { %v3551_v5 = vpop.permute.xlu0 %3550 }
0x4551   :  { %v3553_v55 = vmul.f32 %v3551_v5, %v3546_v22 }
0x4553   :  { %3555 = vrot.lane.b32.xlu1 %v3553_v55, %s5135_s3 }
0x45c5   :  { %v3556_v37 = vpop.permute.xlu1 %3555 }
0x45c6   :  { %v3558_v4 = vadd.f32 %v3556_v37, %v3502_v62 }
0x45c8   :  { %5084 = vtanh.f32 %v3558_v4 }
0x45ce   :  { %v5085_v15 = vpop.eup %5084 }
0x45cf   :  { %v3560_v38 = vsub.f32 %v3501_v23, %v5085_v15 }
0x45d1   :  { %3562 = vrot.lane.b32.xlu2 %v3560_v38, %s5136_s4 }
0x462b   :  { %v3563_v40 = vpop.permute.xlu2 %3562 }
0x462c   :  { %v3565_v57 = vmul.f32 %v3563_v40, %v3546_v22 }
0x462e   :  { %3567 = vrot.lane.b32.xlu0 %v3565_v57, %s5137_s21 }
0x46a0   :  { %v3568_v28 = vpop.permute.xlu0 %3567 }
0x46a1   :  { %v3570_v6 = vadd.f32 %v5085_v15, %v3568_v28 }
0x46a3   :  { %3573 = vrot.lane.b32.xlu1 %v3570_v6, %s5135_s3 }
0x4715   :  { %v3574_v58 = vpop.permute.xlu1 %3573 }
0x4716   :  { %4732 = vmatmul.msk.f32.vlgmr.msrb.gmra.mxu3 %vm1774_vm6, %v3574_v58  ;;  %v3709_v58 = vld [vmem:[#allocation2 + $0xe0] sm:$0xff] }
0x4717   :  { %3727 = vmatpush.msrb.mxu3 %v6611_v45 }
0x4719   :  { %3728 = vmatpush.msrb.mxu3 %v6617_v21 }
0x471b   :  { %3729 = vmatpush.msrb.mxu3 %v6623_v44 }
0x471d   :  { %3730 = vmatpush.msrb.mxu3 %v6629_v2 }
0x4799   :  { %v3594_v59 = vpop.f32.mrf.mxu3 }
0x479a   :  { %v3617_v9 = vadd.f32 %v3594_v59, %v6773_v7  ;;  %v3597_v42 = vadd.f32 %v3594_v59, %v3571_v13 }
0x479c   :  { %3619 = vrot.lane.b32.xlu2 %v3617_v9, %s5135_s3  ;;  %v4733_v29 = vmul.f32 -1.442695, %v3597_v42 }
0x479e   :  { %5086 = vpow2.f32 %v4733_v29 }
0x47a4   :  { %v5087_v61 = vpop.eup %5086 }
0x47a5   :  { %v3601_v14 = vadd.f32 1.0, %v5087_v61 }
0x47a7   :  { %5088 = vrcp.f32 %v3601_v14  ;;  %v3613_v47 = vand.u32 2147483648, %v3601_v14  ;;  %vm3607_vm2 = vweird.f32 %v3601_v14  ;;  %v3611_v33 = vand.u32 2147483647, %v3601_v14 }
0x47a9   :  { %v3614_v36 = vor.u32 1.1754944e-38, %v3613_v47  ;;  %vm3612_vm4 = vcmp.eq.f32.partialorder %v3611_v33, 8.507059e+37 }
0x47ad   :  { %v5089_v20 = vpop.eup %5088 }
0x47ae   :  { %v3603_v1 = vmul.f32 %v5089_v20, %v3601_v14  ;;  %vm3608_vm1 = vweird.f32 %v5089_v20 }
0x47af   :  { %vm3609_vm3 = vmor %vm3607_vm2, %vm3608_vm1 }
0x47b0   :  { %v3604_v18 = vsub.f32 1.0, %v3603_v1 }
0x47b2   :  { %v3605_v19 = vmul.f32 %v5089_v20, %v3604_v18 }
0x47b4   :  { %v3606_v32 = vadd.f32 %v5089_v20, %v3605_v19 }
0x47b6   :  { %v3610_v63 = vsel %vm3609_vm3, %v5089_v20, %v3606_v32 }
0x47b7   :  { %v3615_v30 = vsel %vm3612_vm4, %v3614_v36, %v3610_v63 }
0x47f6   :  { %v3620_v43 = vpop.permute.xlu2 %3619 }
0x47f7   :  { %v3622_v8 = vmul.f32 %v3620_v43, %v3615_v30 }
0x47f9   :  { %3624 = vrot.lane.b32.xlu0 %v3622_v8, %s5135_s3 }
0x486b   :  { %v3625_v17 = vpop.permute.xlu0 %3624 }
0x486c   :  { %v3627_v52 = vadd.f32 %v3625_v17, %v3571_v13 }
0x486e   :  { %5090 = vtanh.f32 %v3627_v52 }
0x4874   :  { %v5091_v25 = vpop.eup %5090 }
0x4875   :  { %v3629_v56 = vsub.f32 %v3570_v6, %v5091_v25 }
0x4877   :  { %3631 = vrot.lane.b32.xlu1 %v3629_v56, %s5136_s4 }
0x48e9   :  { %v3632_v10 = vpop.permute.xlu1 %3631 }
0x48ea   :  { %v3634_v53 = vmul.f32 %v3632_v10, %v3615_v30 }
0x48ec   :  { %3636 = vrot.lane.b32.xlu2 %v3634_v53, %s5137_s21 }
0x4946   :  { %v3637_v11 = vpop.permute.xlu2 %3636 }
0x4947   :  { %v3639_v35 = vadd.f32 %v5091_v25, %v3637_v11 }
0x4949   :  { %3642 = vrot.lane.b32.xlu0 %v3639_v35, %s5135_s3 }
0x49bb   :  { %v3643_v26 = vpop.permute.xlu0 %3642 }
0x49bc   :  { %4734 = vmatmul.msk.f32.vlgmr.msra.gmra.mxu3 %vm1774_vm6, %v3643_v26  ;;  %v3778_v26 = vld [vmem:[#allocation2 + $0xe8] sm:$0xff] }
0x49bd   :  { %3796 = vmatpush.msra.mxu3 %v6611_v45 }
0x49bf   :  { %3797 = vmatpush.msra.mxu3 %v6617_v21 }
0x49c1   :  { %3798 = vmatpush.msra.mxu3 %v6623_v44 }
0x49c3   :  { %3799 = vmatpush.msra.mxu3 %v6629_v2 }
0x4a3f   :  { %v3663_v16 = vpop.f32.mrf.mxu3 }
0x4a40   :  { %v3686_v23 = vadd.f32 %v3663_v16, %v6773_v7  ;;  %v3666_v54 = vadd.f32 %v3663_v16, %v3640_v24 }
0x4a42   :  { %3688 = vrot.lane.b32.xlu1 %v3686_v23, %s5135_s3  ;;  %v4735_v34 = vmul.f32 -1.442695, %v3666_v54 }
0x4a44   :  { %5092 = vpow2.f32 %v4735_v34 }
0x4a4a   :  { %v5093_v62 = vpop.eup %5092 }
0x4a4b   :  { %v3670_v0 = vadd.f32 1.0, %v5093_v62 }
0x4a4d   :  { %5094 = vrcp.f32 %v3670_v0  ;;  %v3682_v48 = vand.u32 2147483648, %v3670_v0  ;;  %vm3676_vm7 = vweird.f32 %v3670_v0  ;;  %v3680_v49 = vand.u32 2147483647, %v3670_v0 }
0x4a4f   :  { %v3683_v46 = vor.u32 1.1754944e-38, %v3682_v48  ;;  %vm3681_vm9 = vcmp.eq.f32.partialorder %v3680_v49, 8.507059e+37 }
0x4a53   :  { %v5095_v41 = vpop.eup %5094 }
0x4a54   :  { %v3672_v50 = vmul.f32 %v5095_v41, %v3670_v0  ;;  %vm3677_vm5 = vweird.f32 %v5095_v41 }
0x4a55   :  { %vm3678_vm8 = vmor %vm3676_vm7, %vm3677_vm5 }
0x4a56   :  { %v3673_v51 = vsub.f32 1.0, %v3672_v50 }
0x4a58   :  { %v3674_v27 = vmul.f32 %v5095_v41, %v3673_v51 }
0x4a5a   :  { %v3675_v3 = vadd.f32 %v5095_v41, %v3674_v27 }
0x4a5c   :  { %v3679_v60 = vsel %vm3678_vm8, %v5095_v41, %v3675_v3 }
0x4a5d   :  { %v3684_v12 = vsel %vm3681_vm9, %v3683_v46, %v3679_v60 }
0x4ab4   :  { %v3689_v31 = vpop.permute.xlu1 %3688 }
0x4ab5   :  { %v3691_v39 = vmul.f32 %v3689_v31, %v3684_v12 }
0x4ab7   :  { %3693 = vrot.lane.b32.xlu2 %v3691_v39, %s5135_s3 }
0x4b11   :  { %v3694_v5 = vpop.permute.xlu2 %3693 }
0x4b12   :  { %v3696_v22 = vadd.f32 %v3694_v5, %v3640_v24 }
0x4b14   :  { %5096 = vtanh.f32 %v3696_v22 }
0x4b1a   :  { %v5097_v55 = vpop.eup %5096 }
0x4b1b   :  { %v3698_v37 = vsub.f32 %v3639_v35, %v5097_v55 }
0x4b1d   :  { %3700 = vrot.lane.b32.xlu0 %v3698_v37, %s5136_s4 }
0x4b8f   :  { %v3701_v4 = vpop.permute.xlu0 %3700 }
0x4b90   :  { %v3703_v15 = vmul.f32 %v3701_v4, %v3684_v12  ;;  %v3847_v4 = vld [vmem:[#allocation2 + $0xf0] sm:$0xff] }
0x4b92   :  { %3705 = vrot.lane.b32.xlu1 %v3703_v15, %s5137_s21 }
0x4c04   :  { %v3706_v38 = vpop.permute.xlu1 %3705 }
0x4c05   :  { %v3708_v40 = vadd.f32 %v5097_v55, %v3706_v38 }
0x4c07   :  { %3711 = vrot.lane.b32.xlu2 %v3708_v40, %s5135_s3 }
0x4c61   :  { %v3712_v57 = vpop.permute.xlu2 %3711 }
0x4c62   :  { %4736 = vmatmul.msk.f32.vlgmr.msrb.gmra.mxu3 %vm1774_vm6, %v3712_v57 }
0x4c63   :  { %3865 = vmatpush.msrb.mxu3 %v6611_v45 }
0x4c65   :  { %3866 = vmatpush.msrb.mxu3 %v6617_v21 }
0x4c67   :  { %3867 = vmatpush.msrb.mxu3 %v6623_v44 }
0x4c69   :  { %3868 = vmatpush.msrb.mxu3 %v6629_v2 }
0x4ce5   :  { %v3732_v28 = vpop.f32.mrf.mxu3 }
0x4ce6   :  { %v3755_v6 = vadd.f32 %v3732_v28, %v6773_v7  ;;  %v3735_v59 = vadd.f32 %v3732_v28, %v3709_v58 }
0x4ce8   :  { %3757 = vrot.lane.b32.xlu0 %v3755_v6, %s5135_s3  ;;  %v4737_v9 = vmul.f32 -1.442695, %v3735_v59 }
0x4cea   :  { %5098 = vpow2.f32 %v4737_v9 }
0x4cf0   :  { %v5099_v13 = vpop.eup %5098 }
0x4cf1   :  { %v3739_v42 = vadd.f32 1.0, %v5099_v13 }
0x4cf3   :  { %5100 = vrcp.f32 %v3739_v42  ;;  %v3751_v18 = vand.u32 2147483648, %v3739_v42  ;;  %vm3745_vm11 = vweird.f32 %v3739_v42  ;;  %v3749_v19 = vand.u32 2147483647, %v3739_v42 }
0x4cf5   :  { %v3752_v47 = vor.u32 1.1754944e-38, %v3751_v18  ;;  %vm3750_vm13 = vcmp.eq.f32.partialorder %v3749_v19, 8.507059e+37 }
0x4cf9   :  { %v5101_v29 = vpop.eup %5100 }
0x4cfa   :  { %v3741_v61 = vmul.f32 %v5101_v29, %v3739_v42  ;;  %vm3746_vm10 = vweird.f32 %v5101_v29 }
0x4cfb   :  { %vm3747_vm12 = vmor %vm3745_vm11, %vm3746_vm10  ;;  %vm4062_vm11 = vcmask 523264  }
0x4cfc   :  { %v3742_v14 = vsub.f32 1.0, %v3741_v61 }
0x4cfe   :  { %v3743_v20 = vmul.f32 %v5101_v29, %v3742_v14 }
0x4d00   :  { %v3744_v1 = vadd.f32 %v5101_v29, %v3743_v20 }
0x4d02   :  { %v3748_v32 = vsel %vm3747_vm12, %v5101_v29, %v3744_v1  ;;  %vm4079_vm12 = vcmask 408576  }
0x4d03   :  { %v3753_v63 = vsel %vm3750_vm13, %v3752_v47, %v3748_v32 }
0x4d5a   :  { %v3758_v33 = vpop.permute.xlu0 %3757 }
0x4d5b   :  { %v3760_v36 = vmul.f32 %v3758_v33, %v3753_v63 }
0x4d5d   :  { %3762 = vrot.lane.b32.xlu1 %v3760_v36, %s5135_s3 }
0x4dcf   :  { %v3763_v43 = vpop.permute.xlu1 %3762 }
0x4dd0   :  { %v3765_v30 = vadd.f32 %v3763_v43, %v3709_v58 }
0x4dd2   :  { %5102 = vtanh.f32 %v3765_v30 }
0x4dd8   :  { %v5103_v8 = vpop.eup %5102 }
0x4dd9   :  { %v3767_v17 = vsub.f32 %v3708_v40, %v5103_v8 }
0x4ddb   :  { %3769 = vrot.lane.b32.xlu2 %v3767_v17, %s5136_s4 }
0x4e35   :  { %v3770_v52 = vpop.permute.xlu2 %3769 }
0x4e36   :  { %v3772_v25 = vmul.f32 %v3770_v52, %v3753_v63  ;;  %v3916_v52 = vld [vmem:[#allocation2 + $0xf8] sm:$0xff] }
0x4e38   :  { %3774 = vrot.lane.b32.xlu0 %v3772_v25, %s5137_s21 }
0x4eaa   :  { %v3775_v56 = vpop.permute.xlu0 %3774 }
0x4eab   :  { %v3777_v10 = vadd.f32 %v5103_v8, %v3775_v56 }
0x4ead   :  { %3780 = vrot.lane.b32.xlu1 %v3777_v10, %s5135_s3 }
0x4f1f   :  { %v3781_v53 = vpop.permute.xlu1 %3780 }
0x4f20   :  { %4738 = vmatmul.msk.f32.vlgmr.msra.gmra.mxu3 %vm1774_vm6, %v3781_v53 }
0x4f21   :  { %3934 = vmatpush.msra.mxu3 %v6611_v45 }
0x4f23   :  { %3935 = vmatpush.msra.mxu3 %v6617_v21 }
0x4f25   :  { %3936 = vmatpush.msra.mxu3 %v6623_v44 }
0x4f27   :  { %3937 = vmatpush.msra.mxu3 %v6629_v2 }
0x4fa3   :  { %v3801_v11 = vpop.f32.mrf.mxu3 }
0x4fa4   :  { %v3824_v35 = vadd.f32 %v3801_v11, %v6773_v7  ;;  %v3804_v16 = vadd.f32 %v3801_v11, %v3778_v26 }
0x4fa6   :  { %3826 = vrot.lane.b32.xlu2 %v3824_v35, %s5135_s3  ;;  %v4739_v23 = vmul.f32 -1.442695, %v3804_v16 }
0x4fa8   :  { %5104 = vpow2.f32 %v4739_v23 }
0x4fae   :  { %v5105_v24 = vpop.eup %5104 }
0x4faf   :  { %v3808_v54 = vadd.f32 1.0, %v5105_v24 }
0x4fb1   :  { %5106 = vrcp.f32 %v3808_v54  ;;  %v3820_v44 = vand.u32 2147483648, %v3808_v54  ;;  %vm3814_vm15 = vweird.f32 %v3808_v54  ;;  %v3818_v2 = vand.u32 2147483647, %v3808_v54 }
0x4fb3   :  { %v3821_v50 = vor.u32 1.1754944e-38, %v3820_v44  ;;  %vm3819_vm1 = vcmp.eq.f32.partialorder %v3818_v2, 8.507059e+37 }
0x4fb7   :  { %v5107_v34 = vpop.eup %5106 }
0x4fb8   :  { %v3810_v45 = vmul.f32 %v5107_v34, %v3808_v54  ;;  %vm3815_vm14 = vweird.f32 %v5107_v34 }
0x4fb9   :  { %vm3816_vm0 = vmor %vm3814_vm15, %vm3815_vm14 }
0x4fba   :  { %v3811_v62 = vsub.f32 1.0, %v3810_v45 }
0x4fbc   :  { %v3812_v21 = vmul.f32 %v5107_v34, %v3811_v62 }
0x4fbe   :  { %v3813_v0 = vadd.f32 %v5107_v34, %v3812_v21 }
0x4fc0   :  { %v3817_v41 = vsel %vm3816_vm0, %v5107_v34, %v3813_v0  ;;  %v4916_v0 = vld [vmem:[%s6731_s7 + $0x8] sm:$0xff] }
0x4fc1   :  { %v3822_v27 = vsel %vm3819_vm1, %v3821_v50, %v3817_v41  ;;  %4018 = vmatpush.bf16.msra.mxu0 %v4916_v0 }
0x5000   :  { %v3827_v51 = vpop.permute.xlu2 %3826 }
0x5001   :  { %v3829_v3 = vmul.f32 %v3827_v51, %v3822_v27  ;;  %v4915_v51 = vld [vmem:[%s6731_s7] sm:$0xff] }
0x5002   :  { %4019 = vmatpush.bf16.msra.mxu0 %v4915_v51 }
0x5003   :  { %3831 = vrot.lane.b32.xlu0 %v3829_v3, %s5135_s3 }
0x5075   :  { %v3832_v48 = vpop.permute.xlu0 %3831 }
0x5076   :  { %v3834_v49 = vadd.f32 %v3832_v48, %v3778_v26 }
0x5078   :  { %5108 = vtanh.f32 %v3834_v49  ;;  %v4919_v49 = vld [vmem:[%s6732_s9 + $0x10] sm:$0xff] }
0x507e   :  { %v5109_v60 = vpop.eup %5108 }
0x507f   :  { %v3836_v46 = vsub.f32 %v3777_v10, %v5109_v60 }
0x5081   :  { %3838 = vrot.lane.b32.xlu1 %v3836_v46, %s5136_s4 }
0x50f3   :  { %v3839_v31 = vpop.permute.xlu1 %3838 }
0x50f4   :  { %v3841_v12 = vmul.f32 %v3839_v31, %v3822_v27  ;;  %v4920_v27 = vld [vmem:[%s6732_s9 + $0x18] sm:$0xff] }
0x50f5   :  { %4070 = vmatpush.bf16.msra.mxu1 %v4920_v27 }
0x50f6   :  { %3843 = vrot.lane.b32.xlu2 %v3841_v12, %s5137_s21  ;;  %v4918_v12 = vld [vmem:[%s6732_s9 + $0x8] sm:$0xff] }
0x50f9   :  { %4071 = vmatpush.bf16.msra.mxu1 %v4919_v49 }
0x50fd   :  { %4072 = vmatpush.bf16.msra.mxu1 %v4918_v12 }
0x5150   :  { %v3844_v39 = vpop.permute.xlu2 %3843 }
0x5151   :  { %v3846_v5 = vadd.f32 %v5109_v60, %v3844_v39  ;;  %v4917_v39 = vld [vmem:[%s6732_s9] sm:$0xff] }
0x5152   :  { %4073 = vmatpush.bf16.msra.mxu1 %v4917_v39 }
0x5153   :  { %3849 = vrot.lane.b32.xlu0 %v3846_v5, %s5135_s3 }
0x51c5   :  { %v3850_v22 = vpop.permute.xlu0 %3849 }
0x51c6   :  { %4740 = vmatmul.msk.f32.vlgmr.msrb.gmra.mxu3 %vm1774_vm6, %v3850_v22  ;;  %v4928_v22 = vld [vmem:[%s6733_s8] ss:$0 sm:$0xff] }
0x5249   :  { %v3870_v55 = vpop.f32.mrf.mxu3 }
0x524a   :  { %v3893_v37 = vadd.f32 %v3870_v55, %v6773_v7  ;;  %v3873_v15 = vadd.f32 %v3870_v55, %v3847_v4 }
0x524c   :  { %3895 = vrot.lane.b32.xlu1 %v3893_v37, %s5135_s3  ;;  %v4741_v38 = vmul.f32 -1.442695, %v3873_v15 }
0x524e   :  { %5110 = vpow2.f32 %v4741_v38  ;;  %v4929_v38 = vld [vmem:[%s6734_s10] ss:$0 sm:$0xff] }
0x5254   :  { %v5111_v40 = vpop.eup %5110 }
0x5255   :  { %v3877_v57 = vadd.f32 1.0, %v5111_v40 }
0x5257   :  { %5112 = vrcp.f32 %v3877_v57  ;;  %v3889_v13 = vand.u32 2147483648, %v3877_v57  ;;  %vm3883_vm3 = vweird.f32 %v3877_v57  ;;  %v3887_v42 = vand.u32 2147483647, %v3877_v57 }
0x5259   :  { %v3890_v61 = vor.u32 1.1754944e-38, %v3889_v13  ;;  %vm3888_vm5 = vcmp.eq.f32.partialorder %v3887_v42, 8.507059e+37 }
0x525d   :  { %v5113_v28 = vpop.eup %5112 }
0x525e   :  { %v3879_v6 = vmul.f32 %v5113_v28, %v3877_v57  ;;  %vm3884_vm2 = vweird.f32 %v5113_v28 }
0x525f   :  { %vm3885_vm4 = vmor %vm3883_vm3, %vm3884_vm2 }
0x5260   :  { %v3880_v58 = vsub.f32 1.0, %v3879_v6 }
0x5262   :  { %v3881_v59 = vmul.f32 %v5113_v28, %v3880_v58 }
0x5264   :  { %v3882_v9 = vadd.f32 %v5113_v28, %v3881_v59 }
0x5266   :  { %v3886_v29 = vsel %vm3885_vm4, %v5113_v28, %v3882_v9 }
0x5267   :  { %v3891_v20 = vsel %vm3888_vm5, %v3890_v61, %v3886_v29 }
0x52be   :  { %v3896_v14 = vpop.permute.xlu1 %3895 }
0x52bf   :  { %v3898_v1 = vmul.f32 %v3896_v14, %v3891_v20 }
0x52c1   :  { %3900 = vrot.lane.b32.xlu2 %v3898_v1, %s5135_s3 }
0x531b   :  { %v3901_v18 = vpop.permute.xlu2 %3900 }
0x531c   :  { %v3903_v19 = vadd.f32 %v3901_v18, %v3847_v4 }
0x531e   :  { %5114 = vtanh.f32 %v3903_v19 }
0x5324   :  { %v5115_v32 = vpop.eup %5114 }
0x5325   :  { %v3905_v47 = vsub.f32 %v3846_v5, %v5115_v32 }
0x5327   :  { %3907 = vrot.lane.b32.xlu0 %v3905_v47, %s5136_s4 }
0x5399   :  { %v3908_v33 = vpop.permute.xlu0 %3907 }
0x539a   :  { %v3910_v63 = vmul.f32 %v3908_v33, %v3891_v20 }
0x539c   :  { %3912 = vrot.lane.b32.xlu1 %v3910_v63, %s5137_s21 }
0x540e   :  { %v3913_v36 = vpop.permute.xlu1 %3912 }
0x540f   :  { %v3915_v43 = vadd.f32 %v5115_v32, %v3913_v36 }
0x5411   :  { %3918 = vrot.lane.b32.xlu2 %v3915_v43, %s5135_s3 }
0x546b   :  { %v3919_v30 = vpop.permute.xlu2 %3918 }
0x546c   :  { %4742 = vmatmul.msk.f32.vlgmr.msra.gmra.mxu3 %vm1774_vm6, %v3919_v30 }
0x54ef   :  { %v3939_v8 = vpop.f32.mrf.mxu3 }
0x54f0   :  { %v3962_v17 = vadd.f32 %v3939_v8, %v6773_v7  ;;  %v3942_v25 = vadd.f32 %v3939_v8, %v3916_v52 }
0x54f2   :  { %3964 = vrot.lane.b32.xlu0 %v3962_v17, %s5135_s3  ;;  %v4743_v56 = vmul.f32 -1.442695, %v3942_v25 }
0x54f4   :  { %5116 = vpow2.f32 %v4743_v56 }
0x54fa   :  { %v5117_v10 = vpop.eup %5116 }
0x54fb   :  { %v3946_v53 = vadd.f32 1.0, %v5117_v10 }
0x54fd   :  { %5118 = vrcp.f32 %v3946_v53  ;;  %v3958_v24 = vand.u32 2147483648, %v3946_v53  ;;  %vm3952_vm8 = vweird.f32 %v3946_v53  ;;  %v3956_v54 = vand.u32 2147483647, %v3946_v53 }
0x54ff   :  { %v3959_v34 = vor.u32 1.1754944e-38, %v3958_v24  ;;  %vm3957_vm10 = vcmp.eq.f32.partialorder %v3956_v54, 8.507059e+37 }
0x5503   :  { %v5119_v11 = vpop.eup %5118 }
0x5504   :  { %v3948_v35 = vmul.f32 %v5119_v11, %v3946_v53  ;;  %vm3953_vm7 = vweird.f32 %v5119_v11 }
0x5505   :  { %vm3954_vm9 = vmor %vm3952_vm8, %vm3953_vm7 }
0x5506   :  { %v3949_v26 = vsub.f32 1.0, %v3948_v35 }
0x5508   :  { %v3950_v16 = vmul.f32 %v5119_v11, %v3949_v26 }
0x550a   :  { %v3951_v23 = vadd.f32 %v5119_v11, %v3950_v16 }
0x550c   :  { %v3955_v7 = vsel %vm3954_vm9, %v5119_v11, %v3951_v23 }
0x550d   :  { %v3960_v62 = vsel %vm3957_vm10, %v3959_v34, %v3955_v7 }
0x5564   :  { %v3965_v45 = vpop.permute.xlu0 %3964 }
0x5565   :  { %v3967_v21 = vmul.f32 %v3965_v45, %v3960_v62 }
0x5567   :  { %3969 = vrot.lane.b32.xlu1 %v3967_v21, %s5135_s3 }
0x55d9   :  { %v3970_v44 = vpop.permute.xlu1 %3969 }
0x55da   :  { %v3972_v2 = vadd.f32 %v3970_v44, %v3916_v52 }
0x55dc   :  { %5120 = vtanh.f32 %v3972_v2 }
0x55e2   :  { %v5121_v41 = vpop.eup %5120 }
0x55e3   :  { %v3974_v50 = vsub.f32 %v3915_v43, %v5121_v41 }
0x55e5   :  { %3976 = vrot.lane.b32.xlu2 %v3974_v50, %s5136_s4 }
0x563f   :  { %v3977_v3 = vpop.permute.xlu2 %3976 }
0x5640   :  { %v3979_v48 = vmul.f32 %v3977_v3, %v3960_v62 }
0x5642   :  { %3981 = vrot.lane.b32.xlu0 %v3979_v48, %s5137_s21 }
0x56b4   :  { %v3982_v60 = vpop.permute.xlu0 %3981 }
0x56b5   :  { %v3984_v46 = vadd.f32 %v5121_v41, %v3982_v60 }
0x56b7   :  { %v3985_v31 = vpack.c.bf16 %v3984_v46, %v3984_v46 }
0x56b9   :  { %3995 = vrot.lane.b32.xlu1 %v3985_v31, %s5135_s3 }
0x572b   :  { %v3996_v5 = vpop.permute.xlu1 %3995 }
0x572c   :  { %4752 = vmatmul.msk.bf16.vlgmr.msra.gmra.mxu0 %vm1774_vm6, %v3996_v5 }
0x57a9   :  { %v4021_v55 = vpop.f32.mrf.mxu0 }
0x57aa   :  { %v4022_v37 = vadd.f32 %v4928_v22, %v4021_v55 }
0x57ac   :  { %v4025_v4 = vpack.c.bf16 %v4022_v37, %v4022_v37 }
0x57ae   :  { %4769 = vmatmul.msk.bf16.vlgmr.msra.gmra.mxu1 %vm4062_vm11, %v4025_v4 }
0x57b1   :  { %v4023_v15 = vpop.f32.mrf.mxu0 }
0x582b   :  { %v4075_v40 = vpop.f32.mrf.mxu1 }
0x582c   :  { %v4076_v57 = vadd.f32 %v4929_v38, %v4075_v40 }
0x582e   :  { %4080 = vst.msk [vmem:[%s6735_s11] sm:$0xff] %vm4079_vm12, %v4076_v57 }
0x5833   :  { %v4077_v28 = vpop.f32.mrf.mxu1 }

</bundles_post_ra>
